<compile_context>
chip_gen: v6e
topology: v6e:2x2x1
jax: 0.10.0
libtpu: 0.0.40
codegen_flags: <defaults>
</compile_context>

<pallas_src>
import jax
import jax.numpy as jnp
from jax.experimental import pallas as pl
from jax.experimental.pallas import tpu as pltpu


# ----------------------------------------------------------------------------
# shared helpers
# ----------------------------------------------------------------------------
def _lrelu(x):
    # nn.LeakyReLU(0.2)
    return jnp.where(x > 0, x, 0.2 * x)


def _gru_cell_ref(x, h, wih_t, whh_t, bih, bhh, hidden):
    """Reference PyTorch-semantics GRU step (gate order r, z, n)."""
    gi = jnp.dot(x, wih_t, preferred_element_type=jnp.float32) + bih
    gh = jnp.dot(h, whh_t, preferred_element_type=jnp.float32) + bhh
    r = jax.nn.sigmoid(gi[:, :hidden] + gh[:, :hidden])
    z = jax.nn.sigmoid(gi[:, hidden:2 * hidden] + gh[:, hidden:2 * hidden])
    n = jnp.tanh(gi[:, 2 * hidden:] + r * gh[:, 2 * hidden:])
    return (1.0 - z) * n + z * h


# ----------------------------------------------------------------------------
# Pallas kernel
# ----------------------------------------------------------------------------
def _make_kernel(seq_len, bt, emb, code):
    B = bt

    def gru_step(gi, h, whh, bhn_b, hidden):
        # gi already contains b_ih (all gates) + b_hh (r, z gates).
        gh = jnp.dot(h, whh, preferred_element_type=jnp.float32)
        r = jax.nn.sigmoid(gi[:, :hidden] + gh[:, :hidden])
        z = jax.nn.sigmoid(gi[:, hidden:2 * hidden] + gh[:, hidden:2 * hidden])
        n = jnp.tanh(gi[:, 2 * hidden:] + r * (gh[:, 2 * hidden:] + bhn_b))
        return (1.0 - z) * n + z * h

    def kernel(x_ref,
               e1_wih, e1_whh, e1_bgi, e1_bhn,      # encoder gru1
               e2_wih, e2_whh, e2_bgi, e2_bhn,      # encoder gru2
               ep_w, ep_b,                          # encoder proj
               d1_wih, d1_whh, d1_bgi, d1_bhn,      # decoder gru1
               d2_wih, d2_whh, d2_bgi, d2_bhn,      # decoder gru2
               dp1_w, dp1_b, dp2_w, dp2_b,          # decoder proj1 / proj2
               dp3_w, dp3_b,                        # decoder proj3 (W.T)
               out_ref,
               gi_c_scr,                            # (seq*B, 3*code) gate-input scratch
               gi_e_scr,                            # (seq*B, 3*emb)  gate-input scratch
               hseq_scr,                            # (seq*B, code)   hidden-sequence scratch
               oacc_scr):                           # (B, seq*emb)    output/proj3 accumulator
        # ------------------- Encoder GRU1 (emb -> code), h0 = 0 -------------
        # (seq, B, emb) -> (seq*B, emb): B is sublane-aligned so this is a
        # relayout-free relabel, then ONE batched input projection on the MXU.
        x_all = x_ref[...].reshape(seq_len * B, emb)
        gi_c_scr[...] = jnp.dot(x_all, e1_wih[...],
                                preferred_element_type=jnp.float32) + e1_bgi[...]
        whh = e1_whh[...]
        bhn = jnp.broadcast_to(e1_bhn[...], (B, code))
        h = jnp.zeros((B, code), jnp.float32)
        for t in range(seq_len):
            h = gru_step(gi_c_scr[pl.ds(t * B, B), :], h, whh, bhn, code)
            hseq_scr[pl.ds(t * B, B), :] = h          # sublane-offset store
        res_h = h                                      # (B, C)

        # ------------------- Encoder GRU2 (code -> code) ---------------------
        gi_c_scr[...] = jnp.dot(hseq_scr[...], e2_wih[...],
                                preferred_element_type=jnp.float32) + e2_bgi[...]
        whh = e2_whh[...]
        bhn = jnp.broadcast_to(e2_bhn[...], (B, code))
        h = _lrelu(jnp.dot(res_h, ep_w[...],
                           preferred_element_type=jnp.float32) + ep_b[...])
        for t in range(seq_len):
            h = gru_step(gi_c_scr[pl.ds(t * B, B), :], h, whh, bhn, code)
        code_vec = h + res_h                           # code = last + res_h

        # ------------------- Decoder GRU1 (code -> code) ---------------------
        # Input is code_vec, constant over time: compute its projection ONCE.
        gi_const = jnp.dot(code_vec, d1_wih[...],
                           preferred_element_type=jnp.float32) + d1_bgi[...]
        whh = d1_whh[...]
        bhn = jnp.broadcast_to(d1_bhn[...], (B, code))
        h = _lrelu(jnp.dot(code_vec, dp1_w[...],
                           preferred_element_type=jnp.float32) + dp1_b[...])
        # proj3 accumulated incrementally: out = b3 + sum_t h_t @ W3[tC:(t+1)C]
        oacc_scr[...] = jnp.broadcast_to(dp3_b[...], (B, seq_len * emb))
        for t in range(seq_len):
            h = gru_step(gi_const, h, whh, bhn, code)
            hseq_scr[pl.ds(t * B, B), :] = h
            oacc_scr[...] += jnp.dot(h, dp3_w[pl.ds(t * code, code), :],
                                     preferred_element_type=jnp.float32)
        last_d = h                                     # (B, C)

        # ------------------- Decoder GRU2 (code -> emb) ----------------------
        gi_e_scr[...] = jnp.dot(hseq_scr[...], d2_wih[...],
                                preferred_element_type=jnp.float32) + d2_bgi[...]
        whh = d2_whh[...]
        bhn = jnp.broadcast_to(d2_bhn[...], (B, emb))
        h2 = _lrelu(jnp.dot(last_d, dp2_w[...],
                            preferred_element_type=jnp.float32) + dp2_b[...])
        for t in range(seq_len):
            h2 = gru_step(gi_e_scr[pl.ds(t * B, B), :], h2, whh, bhn, emb)
            # lane-offset add into the (B, seq*E) scratch; rides spare vst
            # cycles while the serial recurrence stalls.
            oacc_scr[:, pl.ds(t * emb, emb)] += h2

        # ------------------- Output: single lane-dense (B, seq*E) store ------
        out_ref[...] = oacc_scr[...]

    return kernel


_KERNEL_PARAM_ORDER = [
    "e1_wih", "e1_whh", "e1_bgi", "e1_bhn",
    "e2_wih", "e2_whh", "e2_bgi", "e2_bhn",
    "ep_w", "ep_b",
    "d1_wih", "d1_whh", "d1_bgi", "d1_bhn",
    "d2_wih", "d2_whh", "d2_bgi", "d2_bhn",
    "dp1_w", "dp1_b", "dp2_w", "dp2_b", "dp3_w", "dp3_b",
]


def _fold_gru_biases(bih, bhh, hidden):
    """Fold b_ih+b_hh for the r/z gates into the input-side bias; keep b_hn
    separate (PyTorch GRU keeps it inside the r * (...) term)."""
    b_gi = jnp.concatenate(
        [bih[:, :2 * hidden] + bhh[:, :2 * hidden], bih[:, 2 * hidden:]], axis=1)
    b_hn = bhh[:, 2 * hidden:]
    return b_gi, b_hn


def _prep_kernel_params(p, emb, code):
    kp = {}
    for name, hidden in (("e1", code), ("e2", code), ("d1", code), ("d2", emb)):
        kp[f"{name}_wih"] = p[f"{name}_wih"]
        kp[f"{name}_whh"] = p[f"{name}_whh"]
        kp[f"{name}_bgi"], kp[f"{name}_bhn"] = _fold_gru_biases(
            p[f"{name}_bih"], p[f"{name}_bhh"], hidden)
    for name in ("ep_w", "ep_b", "dp1_w", "dp1_b", "dp2_w", "dp2_b",
                 "dp3_w", "dp3_b"):
        kp[name] = p[name]
    return kp


def crazy_rnn_seq_ae(x, params, *, batch_tile=None):
    seq_len, batch, emb = x.shape
    code = params["e1_whh"].shape[0]

    if batch_tile is None:
        # Keep >=256 rows per program (fills the 256-row MXU on v6e/v7x;
        # >=128 already fills v5e) before splitting the grid. Once batch is a
        # multiple of 256, the grid gets >=2 programs and
        # dimension_semantics=("parallel",) shards them across v7x's two
        # TensorCores. Toy/small batches stay in a single program.
        if batch <= 256 or batch % 256 != 0:
            batch_tile = batch
        else:
            batch_tile = 256
    assert batch % batch_tile == 0
    assert batch_tile == batch or batch_tile % 8 == 0

    kp = _prep_kernel_params(params, emb, code)
    weight_args = [kp[k] for k in _KERNEL_PARAM_ORDER]

    def _w_spec(arr):
        # Full-array block, constant block index -> loaded once, no re-DMA.
        # (At scale on v7x, pipeline_mode=pl.Buffered(1) on these constant
        # blocks halves the weight VMEM footprint against the 64 MiB/TC.)
        return pl.BlockSpec(arr.shape, lambda b, _n=arr.ndim: (0,) * _n)

    grid_spec = pltpu.PrefetchScalarGridSpec(
        num_scalar_prefetch=0,
        grid=(batch // batch_tile,),
        in_specs=[pl.BlockSpec((seq_len, batch_tile, emb), lambda b: (0, b, 0))]
                + [_w_spec(a) for a in weight_args],
        out_specs=pl.BlockSpec((batch_tile, seq_len * emb), lambda b: (b, 0)),
        scratch_shapes=[
            pltpu.VMEM((seq_len * batch_tile, 3 * code), jnp.float32),  # gi_c
            pltpu.VMEM((seq_len * batch_tile, 3 * emb), jnp.float32),   # gi_e
            pltpu.VMEM((seq_len * batch_tile, code), jnp.float32),      # hseq
            pltpu.VMEM((batch_tile, seq_len * emb), jnp.float32),       # oacc
        ],
    )

    kernel = _make_kernel(seq_len, batch_tile, emb, code)
    out_flat = pl.pallas_call(
        kernel,
        out_shape=jax.ShapeDtypeStruct((batch, seq_len * emb), jnp.float32),
        grid_spec=grid_spec,
        compiler_params=pltpu.CompilerParams(
            dimension_semantics=("parallel",),
            # Explicit limit so a scale-up stays portable to v7x's 64 MiB/TC
            # VMEM (dp3_w grows quadratically in seq and is the hazard there).
            vmem_limit_bytes=32 * 1024 * 1024),
    )(x, *weight_args)

    # (B, seq*E) -> time-major (seq, B, E); done outside the kernel so the
    # kernel store stays a single unmasked lane-dense block.
    return jnp.transpose(out_flat.reshape(batch, seq_len, emb), (1, 0, 2))


# ----------------------------------------------------------------------------
# deterministic synthetic parameters (PyTorch-style uniform init)
# ----------------------------------------------------------------------------
def init_params(key, emb, code, seq_len):
    keys = iter(jax.random.split(key, 32))

    def u(shape, fan):
        s = 1.0 / jnp.sqrt(jnp.float32(fan))
        return jax.random.uniform(next(keys), shape, jnp.float32, -s, s)

    p = {}
    # encoder gru1: GRU(emb -> code)
    p["e1_wih"], p["e1_whh"] = u((emb, 3 * code), code), u((code, 3 * code), code)
    p["e1_bih"], p["e1_bhh"] = u((1, 3 * code), code), u((1, 3 * code), code)
    # encoder gru2: GRU(code -> code)
    p["e2_wih"], p["e2_whh"] = u((code, 3 * code), code), u((code, 3 * code), code)
    p["e2_bih"], p["e2_bhh"] = u((1, 3 * code), code), u((1, 3 * code), code)
    # encoder proj: Linear(code -> code)
    p["ep_w"], p["ep_b"] = u((code, code), code), u((1, code), code)
    # decoder gru1: GRU(code -> code)
    p["d1_wih"], p["d1_whh"] = u((code, 3 * code), code), u((code, 3 * code), code)
    p["d1_bih"], p["d1_bhh"] = u((1, 3 * code), code), u((1, 3 * code), code)
    # decoder gru2: GRU(code -> emb)
    p["d2_wih"], p["d2_whh"] = u((code, 3 * emb), emb), u((emb, 3 * emb), emb)
    p["d2_bih"], p["d2_bhh"] = u((1, 3 * emb), emb), u((1, 3 * emb), emb)
    # decoder proj1: Linear(code -> code), proj2: Linear(code -> emb)
    p["dp1_w"], p["dp1_b"] = u((code, code), code), u((1, code), code)
    p["dp2_w"], p["dp2_b"] = u((code, emb), code), u((1, emb), code)
    # decoder proj3: Linear(seq*code -> seq*emb), stored as W.T
    p["dp3_w"] = u((seq_len * code, seq_len * emb), seq_len * code)
    p["dp3_b"] = u((1, seq_len * emb), seq_len * code)
    return p


# ----------------------------------------------------------------------------
# pure-JAX reference (PyTorch GRU semantics, raw biases) for validation
# ----------------------------------------------------------------------------
def reference(x, p):
    seq_len, batch, emb = x.shape
    code = p["e1_whh"].shape[0]

    # encoder
    h = jnp.zeros((batch, code), jnp.float32)
    h1 = []
    for t in range(seq_len):
        h = _gru_cell_ref(x[t], h, p["e1_wih"], p["e1_whh"],
                          p["e1_bih"], p["e1_bhh"], code)
        h1.append(h)
    res_h = h
    h = _lrelu(res_h @ p["ep_w"] + p["ep_b"])
    for t in range(seq_len):
        h = _gru_cell_ref(h1[t], h, p["e2_wih"], p["e2_whh"],
                          p["e2_bih"], p["e2_bhh"], code)
    code_vec = h + res_h

    # decoder
    h = _lrelu(code_vec @ p["dp1_w"] + p["dp1_b"])
    hd = []
    for t in range(seq_len):
        h = _gru_cell_ref(code_vec, h, p["d1_wih"], p["d1_whh"],
                          p["d1_bih"], p["d1_bhh"], code)
        hd.append(h)
    last_d = h
    h2 = _lrelu(last_d @ p["dp2_w"] + p["dp2_b"])
    xd = []
    for t in range(seq_len):
        h2 = _gru_cell_ref(hd[t], h2, p["d2_wih"], p["d2_whh"],
                           p["d2_bih"], p["d2_bhh"], emb)
        xd.append(h2)
    acc = jnp.concatenate(hd, axis=1) @ p["dp3_w"] + p["dp3_b"]
    out = [xd[t] + acc[:, t * emb:(t + 1) * emb] for t in range(seq_len)]
    return jnp.stack(out, axis=0)


if __name__ == "__main__":
    emb_size, code_size, seq_length, batch = 32, 32, 8, 8
    key = jax.random.PRNGKey(0)
    kx, kparams = jax.random.split(key)

    # X: (seq, batch, emb) — time-major, matching nn.GRU default.
    x = jax.random.normal(kx, (seq_length, batch, emb_size), jnp.float32)
    params = init_params(kparams, emb_size, code_size, seq_length)

    out = crazy_rnn_seq_ae(x, params)
    out = jax.block_until_ready(out)

    ref = reference(x, params)
    assert out.shape == (seq_length, batch, emb_size), out.shape
    assert jnp.allclose(out, ref, atol=2e-3, rtol=2e-3), \
        float(jnp.max(jnp.abs(out - ref)))

    print("KERNEL_OK")
</pallas_src>

<mosaic_0001>
module attributes {stable_mosaic.version = 11 : i64} {
  func.func @kernel(%arg0: i32, %arg1: memref<8x8x32xf32, #tpu.memory_space<vmem>>, %arg2: memref<32x96xf32, #tpu.memory_space<vmem>>, %arg3: memref<32x96xf32, #tpu.memory_space<vmem>>, %arg4: memref<1x96xf32, #tpu.memory_space<vmem>>, %arg5: memref<1x32xf32, #tpu.memory_space<vmem>>, %arg6: memref<32x96xf32, #tpu.memory_space<vmem>>, %arg7: memref<32x96xf32, #tpu.memory_space<vmem>>, %arg8: memref<1x96xf32, #tpu.memory_space<vmem>>, %arg9: memref<1x32xf32, #tpu.memory_space<vmem>>, %arg10: memref<32x32xf32, #tpu.memory_space<vmem>>, %arg11: memref<1x32xf32, #tpu.memory_space<vmem>>, %arg12: memref<32x96xf32, #tpu.memory_space<vmem>>, %arg13: memref<32x96xf32, #tpu.memory_space<vmem>>, %arg14: memref<1x96xf32, #tpu.memory_space<vmem>>, %arg15: memref<1x32xf32, #tpu.memory_space<vmem>>, %arg16: memref<32x96xf32, #tpu.memory_space<vmem>>, %arg17: memref<32x96xf32, #tpu.memory_space<vmem>>, %arg18: memref<1x96xf32, #tpu.memory_space<vmem>>, %arg19: memref<1x32xf32, #tpu.memory_space<vmem>>, %arg20: memref<32x32xf32, #tpu.memory_space<vmem>>, %arg21: memref<1x32xf32, #tpu.memory_space<vmem>>, %arg22: memref<32x32xf32, #tpu.memory_space<vmem>>, %arg23: memref<1x32xf32, #tpu.memory_space<vmem>>, %arg24: memref<256x256xf32, #tpu.memory_space<vmem>>, %arg25: memref<1x256xf32, #tpu.memory_space<vmem>>, %arg26: memref<8x256xf32, #tpu.memory_space<vmem>>, %arg27: memref<64x96xf32, #tpu.memory_space<vmem>>, %arg28: memref<64x96xf32, #tpu.memory_space<vmem>>, %arg29: memref<64x32xf32, #tpu.memory_space<vmem>>, %arg30: memref<8x256xf32, #tpu.memory_space<vmem>>) attributes {dimension_semantics = [#tpu.dimension_semantics<parallel>], iteration_bounds = array<i64: 1>, scalar_prefetch = 0 : i64, scratch_operands = 4 : i64, tpu.core_type = #tpu.core_type<tc>, window_params = [{transform_indices = @transform_0, window_bounds = array<i64: 8, 8, 32>}, {pipeline_mode = #tpu.pipeline_mode<synchronous>, transform_indices = @transform_1, window_bounds = array<i64: 32, 96>}, {pipeline_mode = #tpu.pipeline_mode<synchronous>, transform_indices = @transform_2, window_bounds = array<i64: 32, 96>}, {pipeline_mode = #tpu.pipeline_mode<synchronous>, transform_indices = @transform_3, window_bounds = array<i64: 1, 96>}, {pipeline_mode = #tpu.pipeline_mode<synchronous>, transform_indices = @transform_4, window_bounds = array<i64: 1, 32>}, {pipeline_mode = #tpu.pipeline_mode<synchronous>, transform_indices = @transform_5, window_bounds = array<i64: 32, 96>}, {pipeline_mode = #tpu.pipeline_mode<synchronous>, transform_indices = @transform_6, window_bounds = array<i64: 32, 96>}, {pipeline_mode = #tpu.pipeline_mode<synchronous>, transform_indices = @transform_7, window_bounds = array<i64: 1, 96>}, {pipeline_mode = #tpu.pipeline_mode<synchronous>, transform_indices = @transform_8, window_bounds = array<i64: 1, 32>}, {pipeline_mode = #tpu.pipeline_mode<synchronous>, transform_indices = @transform_9, window_bounds = array<i64: 32, 32>}, {pipeline_mode = #tpu.pipeline_mode<synchronous>, transform_indices = @transform_10, window_bounds = array<i64: 1, 32>}, {pipeline_mode = #tpu.pipeline_mode<synchronous>, transform_indices = @transform_11, window_bounds = array<i64: 32, 96>}, {pipeline_mode = #tpu.pipeline_mode<synchronous>, transform_indices = @transform_12, window_bounds = array<i64: 32, 96>}, {pipeline_mode = #tpu.pipeline_mode<synchronous>, transform_indices = @transform_13, window_bounds = array<i64: 1, 96>}, {pipeline_mode = #tpu.pipeline_mode<synchronous>, transform_indices = @transform_14, window_bounds = array<i64: 1, 32>}, {pipeline_mode = #tpu.pipeline_mode<synchronous>, transform_indices = @transform_15, window_bounds = array<i64: 32, 96>}, {pipeline_mode = #tpu.pipeline_mode<synchronous>, transform_indices = @transform_16, window_bounds = array<i64: 32, 96>}, {pipeline_mode = #tpu.pipeline_mode<synchronous>, transform_indices = @transform_17, window_bounds = array<i64: 1, 96>}, {pipeline_mode = #tpu.pipeline_mode<synchronous>, transform_indices = @transform_18, window_bounds = array<i64: 1, 32>}, {pipeline_mode = #tpu.pipeline_mode<synchronous>, transform_indices = @transform_19, window_bounds = array<i64: 32, 32>}, {pipeline_mode = #tpu.pipeline_mode<synchronous>, transform_indices = @transform_20, window_bounds = array<i64: 1, 32>}, {pipeline_mode = #tpu.pipeline_mode<synchronous>, transform_indices = @transform_21, window_bounds = array<i64: 32, 32>}, {pipeline_mode = #tpu.pipeline_mode<synchronous>, transform_indices = @transform_22, window_bounds = array<i64: 1, 32>}, {pipeline_mode = #tpu.pipeline_mode<synchronous>, transform_indices = @transform_23, window_bounds = array<i64: 256, 256>}, {pipeline_mode = #tpu.pipeline_mode<synchronous>, transform_indices = @transform_24, window_bounds = array<i64: 1, 256>}, {transform_indices = @transform_25, window_bounds = array<i64: 8, 256>}]} {
    %c0 = arith.constant 0 : index
    %c0_0 = arith.constant 0 : index
    %c0_1 = arith.constant 0 : index
    %0 = vector.load %arg1[%c0, %c0_0, %c0_1] : memref<8x8x32xf32, #tpu.memory_space<vmem>>, vector<8x8x32xf32>
    %1 = vector.shape_cast %0 : vector<8x8x32xf32> to vector<64x32xf32>
    %c0_2 = arith.constant 0 : index
    %c0_3 = arith.constant 0 : index
    %2 = vector.load %arg2[%c0_2, %c0_3] : memref<32x96xf32, #tpu.memory_space<vmem>>, vector<32x96xf32>
    %cst = arith.constant dense<0.000000e+00> : vector<64x96xf32>
    %3 = tpu.matmul %1, %2, %cst {dimension_numbers = #tpu.dot_dimension_numbers<[1], [0], [0], [1], [0, 0, 1, 1], [], []>} : vector<64x32xf32>, vector<32x96xf32>, vector<64x96xf32> -> vector<64x96xf32>
    %c0_4 = arith.constant 0 : index
    %c0_5 = arith.constant 0 : index
    %4 = vector.load %arg4[%c0_4, %c0_5] : memref<1x96xf32, #tpu.memory_space<vmem>>, vector<1x96xf32>
    %5 = vector.broadcast %4 : vector<1x96xf32> to vector<64x96xf32>
    %6 = arith.addf %3, %5 : vector<64x96xf32>
    %c0_6 = arith.constant 0 : index
    %c0_7 = arith.constant 0 : index
    %7 = vector.load %arg27[%c0_6, %c0_7] : memref<64x96xf32, #tpu.memory_space<vmem>>, vector<64x96xf32>
    tpu.vector_store %arg27[%c0_6, %c0_7], %6 {strides = array<i32>} : memref<64x96xf32, #tpu.memory_space<vmem>>, vector<64x96xf32>,
    %c0_8 = arith.constant 0 : index
    %c0_9 = arith.constant 0 : index
    %8 = vector.load %arg3[%c0_8, %c0_9] : memref<32x96xf32, #tpu.memory_space<vmem>>, vector<32x96xf32>
    %c0_10 = arith.constant 0 : index
    %c0_11 = arith.constant 0 : index
    %9 = vector.load %arg5[%c0_10, %c0_11] : memref<1x32xf32, #tpu.memory_space<vmem>>, vector<1x32xf32>
    %10 = vector.shape_cast %9 : vector<1x32xf32> to vector<1x32xf32>
    %11 = vector.broadcast %10 : vector<1x32xf32> to vector<8x32xf32>
    %cst_12 = arith.constant 0.000000e+00 : f32
    %12 = vector.broadcast %cst_12 : f32 to vector<8x32xf32>
    %c0_13 = arith.constant 0 : index
    %c0_14 = arith.constant 0 : index
    %13 = vector.load %arg27[%c0_13, %c0_14] : memref<64x96xf32, #tpu.memory_space<vmem>>, vector<8x96xf32>
    %cst_15 = arith.constant dense<0.000000e+00> : vector<8x96xf32>
    %14 = tpu.matmul %12, %8, %cst_15 {dimension_numbers = #tpu.dot_dimension_numbers<[1], [0], [0], [1], [0, 0, 1, 1], [], []>} : vector<8x32xf32>, vector<32x96xf32>, vector<8x96xf32> -> vector<8x96xf32>
    %15 = vector.extract_strided_slice %13 {offsets = [0, 0], sizes = [8, 32], strides = [1, 1]} : vector<8x96xf32> to vector<8x32xf32>
    %16 = vector.extract_strided_slice %14 {offsets = [0, 0], sizes = [8, 32], strides = [1, 1]} : vector<8x96xf32> to vector<8x32xf32>
    %17 = arith.addf %15, %16 : vector<8x32xf32>
    %18 = arith.negf %17 : vector<8x32xf32>
    %19 = math.exp %18 : vector<8x32xf32>
    %cst_16 = arith.constant 1.000000e+00 : f32
    %20 = vector.broadcast %cst_16 : f32 to vector<8x32xf32>
    %21 = arith.addf %20, %19 : vector<8x32xf32>
    %22 = arith.divf %20, %21 : vector<8x32xf32>
    %23 = vector.extract_strided_slice %13 {offsets = [0, 32], sizes = [8, 32], strides = [1, 1]} : vector<8x96xf32> to vector<8x32xf32>
    %24 = vector.extract_strided_slice %14 {offsets = [0, 32], sizes = [8, 32], strides = [1, 1]} : vector<8x96xf32> to vector<8x32xf32>
    %25 = arith.addf %23, %24 : vector<8x32xf32>
    %26 = arith.negf %25 : vector<8x32xf32>
    %27 = math.exp %26 : vector<8x32xf32>
    %cst_17 = arith.constant 1.000000e+00 : f32
    %28 = vector.broadcast %cst_17 : f32 to vector<8x32xf32>
    %29 = arith.addf %28, %27 : vector<8x32xf32>
    %30 = arith.divf %28, %29 : vector<8x32xf32>
    %31 = vector.extract_strided_slice %13 {offsets = [0, 64], sizes = [8, 32], strides = [1, 1]} : vector<8x96xf32> to vector<8x32xf32>
    %32 = vector.extract_strided_slice %14 {offsets = [0, 64], sizes = [8, 32], strides = [1, 1]} : vector<8x96xf32> to vector<8x32xf32>
    %33 = arith.addf %32, %11 : vector<8x32xf32>
    %34 = arith.mulf %22, %33 : vector<8x32xf32>
    %35 = arith.addf %31, %34 : vector<8x32xf32>
    %36 = math.tanh %35 : vector<8x32xf32>
    %cst_18 = arith.constant 1.000000e+00 : f32
    %37 = vector.broadcast %cst_18 : f32 to vector<8x32xf32>
    %38 = arith.subf %37, %30 : vector<8x32xf32>
    %39 = arith.mulf %38, %36 : vector<8x32xf32>
    %40 = arith.mulf %30, %12 : vector<8x32xf32>
    %41 = arith.addf %39, %40 : vector<8x32xf32>
    %c0_19 = arith.constant 0 : index
    %c0_20 = arith.constant 0 : index
    %42 = vector.load %arg29[%c0_19, %c0_20] : memref<64x32xf32, #tpu.memory_space<vmem>>, vector<8x32xf32>
    tpu.vector_store %arg29[%c0_19, %c0_20], %41 {strides = array<i32>} : memref<64x32xf32, #tpu.memory_space<vmem>>, vector<8x32xf32>,
    %c8 = arith.constant 8 : index
    %c0_21 = arith.constant 0 : index
    %43 = vector.load %arg27[%c8, %c0_21] : memref<64x96xf32, #tpu.memory_space<vmem>>, vector<8x96xf32>
    %cst_22 = arith.constant dense<0.000000e+00> : vector<8x96xf32>
    %44 = tpu.matmul %41, %8, %cst_22 {dimension_numbers = #tpu.dot_dimension_numbers<[1], [0], [0], [1], [0, 0, 1, 1], [], []>} : vector<8x32xf32>, vector<32x96xf32>, vector<8x96xf32> -> vector<8x96xf32>
    %45 = vector.extract_strided_slice %43 {offsets = [0, 0], sizes = [8, 32], strides = [1, 1]} : vector<8x96xf32> to vector<8x32xf32>
    %46 = vector.extract_strided_slice %44 {offsets = [0, 0], sizes = [8, 32], strides = [1, 1]} : vector<8x96xf32> to vector<8x32xf32>
    %47 = arith.addf %45, %46 : vector<8x32xf32>
    %48 = arith.negf %47 : vector<8x32xf32>
    %49 = math.exp %48 : vector<8x32xf32>
    %cst_23 = arith.constant 1.000000e+00 : f32
    %50 = vector.broadcast %cst_23 : f32 to vector<8x32xf32>
    %51 = arith.addf %50, %49 : vector<8x32xf32>
    %52 = arith.divf %50, %51 : vector<8x32xf32>
    %53 = vector.extract_strided_slice %43 {offsets = [0, 32], sizes = [8, 32], strides = [1, 1]} : vector<8x96xf32> to vector<8x32xf32>
    %54 = vector.extract_strided_slice %44 {offsets = [0, 32], sizes = [8, 32], strides = [1, 1]} : vector<8x96xf32> to vector<8x32xf32>
    %55 = arith.addf %53, %54 : vector<8x32xf32>
    %56 = arith.negf %55 : vector<8x32xf32>
    %57 = math.exp %56 : vector<8x32xf32>
    %cst_24 = arith.constant 1.000000e+00 : f32
    %58 = vector.broadcast %cst_24 : f32 to vector<8x32xf32>
    %59 = arith.addf %58, %57 : vector<8x32xf32>
    %60 = arith.divf %58, %59 : vector<8x32xf32>
    %61 = vector.extract_strided_slice %43 {offsets = [0, 64], sizes = [8, 32], strides = [1, 1]} : vector<8x96xf32> to vector<8x32xf32>
    %62 = vector.extract_strided_slice %44 {offsets = [0, 64], sizes = [8, 32], strides = [1, 1]} : vector<8x96xf32> to vector<8x32xf32>
    %63 = arith.addf %62, %11 : vector<8x32xf32>
    %64 = arith.mulf %52, %63 : vector<8x32xf32>
    %65 = arith.addf %61, %64 : vector<8x32xf32>
    %66 = math.tanh %65 : vector<8x32xf32>
    %cst_25 = arith.constant 1.000000e+00 : f32
    %67 = vector.broadcast %cst_25 : f32 to vector<8x32xf32>
    %68 = arith.subf %67, %60 : vector<8x32xf32>
    %69 = arith.mulf %68, %66 : vector<8x32xf32>
    %70 = arith.mulf %60, %41 : vector<8x32xf32>
    %71 = arith.addf %69, %70 : vector<8x32xf32>
    %c8_26 = arith.constant 8 : index
    %c0_27 = arith.constant 0 : index
    %72 = vector.load %arg29[%c8_26, %c0_27] : memref<64x32xf32, #tpu.memory_space<vmem>>, vector<8x32xf32>
    tpu.vector_store %arg29[%c8_26, %c0_27], %71 {strides = array<i32>} : memref<64x32xf32, #tpu.memory_space<vmem>>, vector<8x32xf32>,
    %c16 = arith.constant 16 : index
    %c0_28 = arith.constant 0 : index
    %73 = vector.load %arg27[%c16, %c0_28] : memref<64x96xf32, #tpu.memory_space<vmem>>, vector<8x96xf32>
    %cst_29 = arith.constant dense<0.000000e+00> : vector<8x96xf32>
    %74 = tpu.matmul %71, %8, %cst_29 {dimension_numbers = #tpu.dot_dimension_numbers<[1], [0], [0], [1], [0, 0, 1, 1], [], []>} : vector<8x32xf32>, vector<32x96xf32>, vector<8x96xf32> -> vector<8x96xf32>
    %75 = vector.extract_strided_slice %73 {offsets = [0, 0], sizes = [8, 32], strides = [1, 1]} : vector<8x96xf32> to vector<8x32xf32>
    %76 = vector.extract_strided_slice %74 {offsets = [0, 0], sizes = [8, 32], strides = [1, 1]} : vector<8x96xf32> to vector<8x32xf32>
    %77 = arith.addf %75, %76 : vector<8x32xf32>
    %78 = arith.negf %77 : vector<8x32xf32>
    %79 = math.exp %78 : vector<8x32xf32>
    %cst_30 = arith.constant 1.000000e+00 : f32
    %80 = vector.broadcast %cst_30 : f32 to vector<8x32xf32>
    %81 = arith.addf %80, %79 : vector<8x32xf32>
    %82 = arith.divf %80, %81 : vector<8x32xf32>
    %83 = vector.extract_strided_slice %73 {offsets = [0, 32], sizes = [8, 32], strides = [1, 1]} : vector<8x96xf32> to vector<8x32xf32>
    %84 = vector.extract_strided_slice %74 {offsets = [0, 32], sizes = [8, 32], strides = [1, 1]} : vector<8x96xf32> to vector<8x32xf32>
    %85 = arith.addf %83, %84 : vector<8x32xf32>
    %86 = arith.negf %85 : vector<8x32xf32>
    %87 = math.exp %86 : vector<8x32xf32>
    %cst_31 = arith.constant 1.000000e+00 : f32
    %88 = vector.broadcast %cst_31 : f32 to vector<8x32xf32>
    %89 = arith.addf %88, %87 : vector<8x32xf32>
    %90 = arith.divf %88, %89 : vector<8x32xf32>
    %91 = vector.extract_strided_slice %73 {offsets = [0, 64], sizes = [8, 32], strides = [1, 1]} : vector<8x96xf32> to vector<8x32xf32>
    %92 = vector.extract_strided_slice %74 {offsets = [0, 64], sizes = [8, 32], strides = [1, 1]} : vector<8x96xf32> to vector<8x32xf32>
    %93 = arith.addf %92, %11 : vector<8x32xf32>
    %94 = arith.mulf %82, %93 : vector<8x32xf32>
    %95 = arith.addf %91, %94 : vector<8x32xf32>
    %96 = math.tanh %95 : vector<8x32xf32>
    %cst_32 = arith.constant 1.000000e+00 : f32
    %97 = vector.broadcast %cst_32 : f32 to vector<8x32xf32>
    %98 = arith.subf %97, %90 : vector<8x32xf32>
    %99 = arith.mulf %98, %96 : vector<8x32xf32>
    %100 = arith.mulf %90, %71 : vector<8x32xf32>
    %101 = arith.addf %99, %100 : vector<8x32xf32>
    %c16_33 = arith.constant 16 : index
    %c0_34 = arith.constant 0 : index
    %102 = vector.load %arg29[%c16_33, %c0_34] : memref<64x32xf32, #tpu.memory_space<vmem>>, vector<8x32xf32>
    tpu.vector_store %arg29[%c16_33, %c0_34], %101 {strides = array<i32>} : memref<64x32xf32, #tpu.memory_space<vmem>>, vector<8x32xf32>,
    %c24 = arith.constant 24 : index
    %c0_35 = arith.constant 0 : index
    %103 = vector.load %arg27[%c24, %c0_35] : memref<64x96xf32, #tpu.memory_space<vmem>>, vector<8x96xf32>
    %cst_36 = arith.constant dense<0.000000e+00> : vector<8x96xf32>
    %104 = tpu.matmul %101, %8, %cst_36 {dimension_numbers = #tpu.dot_dimension_numbers<[1], [0], [0], [1], [0, 0, 1, 1], [], []>} : vector<8x32xf32>, vector<32x96xf32>, vector<8x96xf32> -> vector<8x96xf32>
    %105 = vector.extract_strided_slice %103 {offsets = [0, 0], sizes = [8, 32], strides = [1, 1]} : vector<8x96xf32> to vector<8x32xf32>
    %106 = vector.extract_strided_slice %104 {offsets = [0, 0], sizes = [8, 32], strides = [1, 1]} : vector<8x96xf32> to vector<8x32xf32>
    %107 = arith.addf %105, %106 : vector<8x32xf32>
    %108 = arith.negf %107 : vector<8x32xf32>
    %109 = math.exp %108 : vector<8x32xf32>
    %cst_37 = arith.constant 1.000000e+00 : f32
    %110 = vector.broadcast %cst_37 : f32 to vector<8x32xf32>
    %111 = arith.addf %110, %109 : vector<8x32xf32>
    %112 = arith.divf %110, %111 : vector<8x32xf32>
    %113 = vector.extract_strided_slice %103 {offsets = [0, 32], sizes = [8, 32], strides = [1, 1]} : vector<8x96xf32> to vector<8x32xf32>
    %114 = vector.extract_strided_slice %104 {offsets = [0, 32], sizes = [8, 32], strides = [1, 1]} : vector<8x96xf32> to vector<8x32xf32>
    %115 = arith.addf %113, %114 : vector<8x32xf32>
    %116 = arith.negf %115 : vector<8x32xf32>
    %117 = math.exp %116 : vector<8x32xf32>
    %cst_38 = arith.constant 1.000000e+00 : f32
    %118 = vector.broadcast %cst_38 : f32 to vector<8x32xf32>
    %119 = arith.addf %118, %117 : vector<8x32xf32>
    %120 = arith.divf %118, %119 : vector<8x32xf32>
    %121 = vector.extract_strided_slice %103 {offsets = [0, 64], sizes = [8, 32], strides = [1, 1]} : vector<8x96xf32> to vector<8x32xf32>
    %122 = vector.extract_strided_slice %104 {offsets = [0, 64], sizes = [8, 32], strides = [1, 1]} : vector<8x96xf32> to vector<8x32xf32>
    %123 = arith.addf %122, %11 : vector<8x32xf32>
    %124 = arith.mulf %112, %123 : vector<8x32xf32>
    %125 = arith.addf %121, %124 : vector<8x32xf32>
    %126 = math.tanh %125 : vector<8x32xf32>
    %cst_39 = arith.constant 1.000000e+00 : f32
    %127 = vector.broadcast %cst_39 : f32 to vector<8x32xf32>
    %128 = arith.subf %127, %120 : vector<8x32xf32>
    %129 = arith.mulf %128, %126 : vector<8x32xf32>
    %130 = arith.mulf %120, %101 : vector<8x32xf32>
    %131 = arith.addf %129, %130 : vector<8x32xf32>
    %c24_40 = arith.constant 24 : index
    %c0_41 = arith.constant 0 : index
    %132 = vector.load %arg29[%c24_40, %c0_41] : memref<64x32xf32, #tpu.memory_space<vmem>>, vector<8x32xf32>
    tpu.vector_store %arg29[%c24_40, %c0_41], %131 {strides = array<i32>} : memref<64x32xf32, #tpu.memory_space<vmem>>, vector<8x32xf32>,
    %c32 = arith.constant 32 : index
    %c0_42 = arith.constant 0 : index
    %133 = vector.load %arg27[%c32, %c0_42] : memref<64x96xf32, #tpu.memory_space<vmem>>, vector<8x96xf32>
    %cst_43 = arith.constant dense<0.000000e+00> : vector<8x96xf32>
    %134 = tpu.matmul %131, %8, %cst_43 {dimension_numbers = #tpu.dot_dimension_numbers<[1], [0], [0], [1], [0, 0, 1, 1], [], []>} : vector<8x32xf32>, vector<32x96xf32>, vector<8x96xf32> -> vector<8x96xf32>
    %135 = vector.extract_strided_slice %133 {offsets = [0, 0], sizes = [8, 32], strides = [1, 1]} : vector<8x96xf32> to vector<8x32xf32>
    %136 = vector.extract_strided_slice %134 {offsets = [0, 0], sizes = [8, 32], strides = [1, 1]} : vector<8x96xf32> to vector<8x32xf32>
    %137 = arith.addf %135, %136 : vector<8x32xf32>
    %138 = arith.negf %137 : vector<8x32xf32>
    %139 = math.exp %138 : vector<8x32xf32>
    %cst_44 = arith.constant 1.000000e+00 : f32
    %140 = vector.broadcast %cst_44 : f32 to vector<8x32xf32>
    %141 = arith.addf %140, %139 : vector<8x32xf32>
    %142 = arith.divf %140, %141 : vector<8x32xf32>
    %143 = vector.extract_strided_slice %133 {offsets = [0, 32], sizes = [8, 32], strides = [1, 1]} : vector<8x96xf32> to vector<8x32xf32>
    %144 = vector.extract_strided_slice %134 {offsets = [0, 32], sizes = [8, 32], strides = [1, 1]} : vector<8x96xf32> to vector<8x32xf32>
    %145 = arith.addf %143, %144 : vector<8x32xf32>
    %146 = arith.negf %145 : vector<8x32xf32>
    %147 = math.exp %146 : vector<8x32xf32>
    %cst_45 = arith.constant 1.000000e+00 : f32
    %148 = vector.broadcast %cst_45 : f32 to vector<8x32xf32>
    %149 = arith.addf %148, %147 : vector<8x32xf32>
    %150 = arith.divf %148, %149 : vector<8x32xf32>
    %151 = vector.extract_strided_slice %133 {offsets = [0, 64], sizes = [8, 32], strides = [1, 1]} : vector<8x96xf32> to vector<8x32xf32>
    %152 = vector.extract_strided_slice %134 {offsets = [0, 64], sizes = [8, 32], strides = [1, 1]} : vector<8x96xf32> to vector<8x32xf32>
    %153 = arith.addf %152, %11 : vector<8x32xf32>
    %154 = arith.mulf %142, %153 : vector<8x32xf32>
    %155 = arith.addf %151, %154 : vector<8x32xf32>
    %156 = math.tanh %155 : vector<8x32xf32>
    %cst_46 = arith.constant 1.000000e+00 : f32
    %157 = vector.broadcast %cst_46 : f32 to vector<8x32xf32>
    %158 = arith.subf %157, %150 : vector<8x32xf32>
    %159 = arith.mulf %158, %156 : vector<8x32xf32>
    %160 = arith.mulf %150, %131 : vector<8x32xf32>
    %161 = arith.addf %159, %160 : vector<8x32xf32>
    %c32_47 = arith.constant 32 : index
    %c0_48 = arith.constant 0 : index
    %162 = vector.load %arg29[%c32_47, %c0_48] : memref<64x32xf32, #tpu.memory_space<vmem>>, vector<8x32xf32>
    tpu.vector_store %arg29[%c32_47, %c0_48], %161 {strides = array<i32>} : memref<64x32xf32, #tpu.memory_space<vmem>>, vector<8x32xf32>,
    %c40 = arith.constant 40 : index
    %c0_49 = arith.constant 0 : index
    %163 = vector.load %arg27[%c40, %c0_49] : memref<64x96xf32, #tpu.memory_space<vmem>>, vector<8x96xf32>
    %cst_50 = arith.constant dense<0.000000e+00> : vector<8x96xf32>
    %164 = tpu.matmul %161, %8, %cst_50 {dimension_numbers = #tpu.dot_dimension_numbers<[1], [0], [0], [1], [0, 0, 1, 1], [], []>} : vector<8x32xf32>, vector<32x96xf32>, vector<8x96xf32> -> vector<8x96xf32>
    %165 = vector.extract_strided_slice %163 {offsets = [0, 0], sizes = [8, 32], strides = [1, 1]} : vector<8x96xf32> to vector<8x32xf32>
    %166 = vector.extract_strided_slice %164 {offsets = [0, 0], sizes = [8, 32], strides = [1, 1]} : vector<8x96xf32> to vector<8x32xf32>
    %167 = arith.addf %165, %166 : vector<8x32xf32>
    %168 = arith.negf %167 : vector<8x32xf32>
    %169 = math.exp %168 : vector<8x32xf32>
    %cst_51 = arith.constant 1.000000e+00 : f32
    %170 = vector.broadcast %cst_51 : f32 to vector<8x32xf32>
    %171 = arith.addf %170, %169 : vector<8x32xf32>
    %172 = arith.divf %170, %171 : vector<8x32xf32>
    %173 = vector.extract_strided_slice %163 {offsets = [0, 32], sizes = [8, 32], strides = [1, 1]} : vector<8x96xf32> to vector<8x32xf32>
    %174 = vector.extract_strided_slice %164 {offsets = [0, 32], sizes = [8, 32], strides = [1, 1]} : vector<8x96xf32> to vector<8x32xf32>
    %175 = arith.addf %173, %174 : vector<8x32xf32>
    %176 = arith.negf %175 : vector<8x32xf32>
    %177 = math.exp %176 : vector<8x32xf32>
    %cst_52 = arith.constant 1.000000e+00 : f32
    %178 = vector.broadcast %cst_52 : f32 to vector<8x32xf32>
    %179 = arith.addf %178, %177 : vector<8x32xf32>
    %180 = arith.divf %178, %179 : vector<8x32xf32>
    %181 = vector.extract_strided_slice %163 {offsets = [0, 64], sizes = [8, 32], strides = [1, 1]} : vector<8x96xf32> to vector<8x32xf32>
    %182 = vector.extract_strided_slice %164 {offsets = [0, 64], sizes = [8, 32], strides = [1, 1]} : vector<8x96xf32> to vector<8x32xf32>
    %183 = arith.addf %182, %11 : vector<8x32xf32>
    %184 = arith.mulf %172, %183 : vector<8x32xf32>
    %185 = arith.addf %181, %184 : vector<8x32xf32>
    %186 = math.tanh %185 : vector<8x32xf32>
    %cst_53 = arith.constant 1.000000e+00 : f32
    %187 = vector.broadcast %cst_53 : f32 to vector<8x32xf32>
    %188 = arith.subf %187, %180 : vector<8x32xf32>
    %189 = arith.mulf %188, %186 : vector<8x32xf32>
    %190 = arith.mulf %180, %161 : vector<8x32xf32>
    %191 = arith.addf %189, %190 : vector<8x32xf32>
    %c40_54 = arith.constant 40 : index
    %c0_55 = arith.constant 0 : index
    %192 = vector.load %arg29[%c40_54, %c0_55] : memref<64x32xf32, #tpu.memory_space<vmem>>, vector<8x32xf32>
    tpu.vector_store %arg29[%c40_54, %c0_55], %191 {strides = array<i32>} : memref<64x32xf32, #tpu.memory_space<vmem>>, vector<8x32xf32>,
    %c48 = arith.constant 48 : index
    %c0_56 = arith.constant 0 : index
    %193 = vector.load %arg27[%c48, %c0_56] : memref<64x96xf32, #tpu.memory_space<vmem>>, vector<8x96xf32>
    %cst_57 = arith.constant dense<0.000000e+00> : vector<8x96xf32>
    %194 = tpu.matmul %191, %8, %cst_57 {dimension_numbers = #tpu.dot_dimension_numbers<[1], [0], [0], [1], [0, 0, 1, 1], [], []>} : vector<8x32xf32>, vector<32x96xf32>, vector<8x96xf32> -> vector<8x96xf32>
    %195 = vector.extract_strided_slice %193 {offsets = [0, 0], sizes = [8, 32], strides = [1, 1]} : vector<8x96xf32> to vector<8x32xf32>
    %196 = vector.extract_strided_slice %194 {offsets = [0, 0], sizes = [8, 32], strides = [1, 1]} : vector<8x96xf32> to vector<8x32xf32>
    %197 = arith.addf %195, %196 : vector<8x32xf32>
    %198 = arith.negf %197 : vector<8x32xf32>
    %199 = math.exp %198 : vector<8x32xf32>
    %cst_58 = arith.constant 1.000000e+00 : f32
    %200 = vector.broadcast %cst_58 : f32 to vector<8x32xf32>
    %201 = arith.addf %200, %199 : vector<8x32xf32>
    %202 = arith.divf %200, %201 : vector<8x32xf32>
    %203 = vector.extract_strided_slice %193 {offsets = [0, 32], sizes = [8, 32], strides = [1, 1]} : vector<8x96xf32> to vector<8x32xf32>
    %204 = vector.extract_strided_slice %194 {offsets = [0, 32], sizes = [8, 32], strides = [1, 1]} : vector<8x96xf32> to vector<8x32xf32>
    %205 = arith.addf %203, %204 : vector<8x32xf32>
    %206 = arith.negf %205 : vector<8x32xf32>
    %207 = math.exp %206 : vector<8x32xf32>
    %cst_59 = arith.constant 1.000000e+00 : f32
    %208 = vector.broadcast %cst_59 : f32 to vector<8x32xf32>
    %209 = arith.addf %208, %207 : vector<8x32xf32>
    %210 = arith.divf %208, %209 : vector<8x32xf32>
    %211 = vector.extract_strided_slice %193 {offsets = [0, 64], sizes = [8, 32], strides = [1, 1]} : vector<8x96xf32> to vector<8x32xf32>
    %212 = vector.extract_strided_slice %194 {offsets = [0, 64], sizes = [8, 32], strides = [1, 1]} : vector<8x96xf32> to vector<8x32xf32>
    %213 = arith.addf %212, %11 : vector<8x32xf32>
    %214 = arith.mulf %202, %213 : vector<8x32xf32>
    %215 = arith.addf %211, %214 : vector<8x32xf32>
    %216 = math.tanh %215 : vector<8x32xf32>
    %cst_60 = arith.constant 1.000000e+00 : f32
    %217 = vector.broadcast %cst_60 : f32 to vector<8x32xf32>
    %218 = arith.subf %217, %210 : vector<8x32xf32>
    %219 = arith.mulf %218, %216 : vector<8x32xf32>
    %220 = arith.mulf %210, %191 : vector<8x32xf32>
    %221 = arith.addf %219, %220 : vector<8x32xf32>
    %c48_61 = arith.constant 48 : index
    %c0_62 = arith.constant 0 : index
    %222 = vector.load %arg29[%c48_61, %c0_62] : memref<64x32xf32, #tpu.memory_space<vmem>>, vector<8x32xf32>
    tpu.vector_store %arg29[%c48_61, %c0_62], %221 {strides = array<i32>} : memref<64x32xf32, #tpu.memory_space<vmem>>, vector<8x32xf32>,
    %c56 = arith.constant 56 : index
    %c0_63 = arith.constant 0 : index
    %223 = vector.load %arg27[%c56, %c0_63] : memref<64x96xf32, #tpu.memory_space<vmem>>, vector<8x96xf32>
    %cst_64 = arith.constant dense<0.000000e+00> : vector<8x96xf32>
    %224 = tpu.matmul %221, %8, %cst_64 {dimension_numbers = #tpu.dot_dimension_numbers<[1], [0], [0], [1], [0, 0, 1, 1], [], []>} : vector<8x32xf32>, vector<32x96xf32>, vector<8x96xf32> -> vector<8x96xf32>
    %225 = vector.extract_strided_slice %223 {offsets = [0, 0], sizes = [8, 32], strides = [1, 1]} : vector<8x96xf32> to vector<8x32xf32>
    %226 = vector.extract_strided_slice %224 {offsets = [0, 0], sizes = [8, 32], strides = [1, 1]} : vector<8x96xf32> to vector<8x32xf32>
    %227 = arith.addf %225, %226 : vector<8x32xf32>
    %228 = arith.negf %227 : vector<8x32xf32>
    %229 = math.exp %228 : vector<8x32xf32>
    %cst_65 = arith.constant 1.000000e+00 : f32
    %230 = vector.broadcast %cst_65 : f32 to vector<8x32xf32>
    %231 = arith.addf %230, %229 : vector<8x32xf32>
    %232 = arith.divf %230, %231 : vector<8x32xf32>
    %233 = vector.extract_strided_slice %223 {offsets = [0, 32], sizes = [8, 32], strides = [1, 1]} : vector<8x96xf32> to vector<8x32xf32>
    %234 = vector.extract_strided_slice %224 {offsets = [0, 32], sizes = [8, 32], strides = [1, 1]} : vector<8x96xf32> to vector<8x32xf32>
    %235 = arith.addf %233, %234 : vector<8x32xf32>
    %236 = arith.negf %235 : vector<8x32xf32>
    %237 = math.exp %236 : vector<8x32xf32>
    %cst_66 = arith.constant 1.000000e+00 : f32
    %238 = vector.broadcast %cst_66 : f32 to vector<8x32xf32>
    %239 = arith.addf %238, %237 : vector<8x32xf32>
    %240 = arith.divf %238, %239 : vector<8x32xf32>
    %241 = vector.extract_strided_slice %223 {offsets = [0, 64], sizes = [8, 32], strides = [1, 1]} : vector<8x96xf32> to vector<8x32xf32>
    %242 = vector.extract_strided_slice %224 {offsets = [0, 64], sizes = [8, 32], strides = [1, 1]} : vector<8x96xf32> to vector<8x32xf32>
    %243 = arith.addf %242, %11 : vector<8x32xf32>
    %244 = arith.mulf %232, %243 : vector<8x32xf32>
    %245 = arith.addf %241, %244 : vector<8x32xf32>
    %246 = math.tanh %245 : vector<8x32xf32>
    %cst_67 = arith.constant 1.000000e+00 : f32
    %247 = vector.broadcast %cst_67 : f32 to vector<8x32xf32>
    %248 = arith.subf %247, %240 : vector<8x32xf32>
    %249 = arith.mulf %248, %246 : vector<8x32xf32>
    %250 = arith.mulf %240, %221 : vector<8x32xf32>
    %251 = arith.addf %249, %250 : vector<8x32xf32>
    %c56_68 = arith.constant 56 : index
    %c0_69 = arith.constant 0 : index
    %252 = vector.load %arg29[%c56_68, %c0_69] : memref<64x32xf32, #tpu.memory_space<vmem>>, vector<8x32xf32>
    tpu.vector_store %arg29[%c56_68, %c0_69], %251 {strides = array<i32>} : memref<64x32xf32, #tpu.memory_space<vmem>>, vector<8x32xf32>,
    %c0_70 = arith.constant 0 : index
    %c0_71 = arith.constant 0 : index
    %253 = vector.load %arg29[%c0_70, %c0_71] : memref<64x32xf32, #tpu.memory_space<vmem>>, vector<64x32xf32>
    %c0_72 = arith.constant 0 : index
    %c0_73 = arith.constant 0 : index
    %254 = vector.load %arg6[%c0_72, %c0_73] : memref<32x96xf32, #tpu.memory_space<vmem>>, vector<32x96xf32>
    %cst_74 = arith.constant dense<0.000000e+00> : vector<64x96xf32>
    %255 = tpu.matmul %253, %254, %cst_74 {dimension_numbers = #tpu.dot_dimension_numbers<[1], [0], [0], [1], [0, 0, 1, 1], [], []>} : vector<64x32xf32>, vector<32x96xf32>, vector<64x96xf32> -> vector<64x96xf32>
    %c0_75 = arith.constant 0 : index
    %c0_76 = arith.constant 0 : index
    %256 = vector.load %arg8[%c0_75, %c0_76] : memref<1x96xf32, #tpu.memory_space<vmem>>, vector<1x96xf32>
    %257 = vector.broadcast %256 : vector<1x96xf32> to vector<64x96xf32>
    %258 = arith.addf %255, %257 : vector<64x96xf32>
    %c0_77 = arith.constant 0 : index
    %c0_78 = arith.constant 0 : index
    %259 = vector.load %arg27[%c0_77, %c0_78] : memref<64x96xf32, #tpu.memory_space<vmem>>, vector<64x96xf32>
    tpu.vector_store %arg27[%c0_77, %c0_78], %258 {strides = array<i32>} : memref<64x96xf32, #tpu.memory_space<vmem>>, vector<64x96xf32>,
    %c0_79 = arith.constant 0 : index
    %c0_80 = arith.constant 0 : index
    %260 = vector.load %arg7[%c0_79, %c0_80] : memref<32x96xf32, #tpu.memory_space<vmem>>, vector<32x96xf32>
    %c0_81 = arith.constant 0 : index
    %c0_82 = arith.constant 0 : index
    %261 = vector.load %arg9[%c0_81, %c0_82] : memref<1x32xf32, #tpu.memory_space<vmem>>, vector<1x32xf32>
    %262 = vector.shape_cast %261 : vector<1x32xf32> to vector<1x32xf32>
    %263 = vector.broadcast %262 : vector<1x32xf32> to vector<8x32xf32>
    %c0_83 = arith.constant 0 : index
    %c0_84 = arith.constant 0 : index
    %264 = vector.load %arg10[%c0_83, %c0_84] : memref<32x32xf32, #tpu.memory_space<vmem>>, vector<32x32xf32>
    %cst_85 = arith.constant dense<0.000000e+00> : vector<8x32xf32>
    %265 = tpu.matmul %251, %264, %cst_85 {dimension_numbers = #tpu.dot_dimension_numbers<[1], [0], [0], [1], [0, 0, 1, 1], [], []>} : vector<8x32xf32>, vector<32x32xf32>, vector<8x32xf32> -> vector<8x32xf32>
    %c0_86 = arith.constant 0 : index
    %c0_87 = arith.constant 0 : index
    %266 = vector.load %arg11[%c0_86, %c0_87] : memref<1x32xf32, #tpu.memory_space<vmem>>, vector<1x32xf32>
    %267 = vector.broadcast %266 : vector<1x32xf32> to vector<8x32xf32>
    %268 = arith.addf %265, %267 : vector<8x32xf32>
    %cst_88 = arith.constant 0.000000e+00 : f32
    %269 = vector.broadcast %cst_88 : f32 to vector<8x32xf32>
    %270 = arith.cmpf ogt, %268, %269 : vector<8x32xf32>
    %cst_89 = arith.constant 2.000000e-01 : f32
    %271 = vector.broadcast %cst_89 : f32 to vector<8x32xf32>
    %272 = arith.mulf %271, %268 : vector<8x32xf32>
    %273 = arith.select %270, %268, %272 : vector<8x32xi1>, vector<8x32xf32>
    %c0_90 = arith.constant 0 : index
    %c0_91 = arith.constant 0 : index
    %274 = vector.load %arg27[%c0_90, %c0_91] : memref<64x96xf32, #tpu.memory_space<vmem>>, vector<8x96xf32>
    %cst_92 = arith.constant dense<0.000000e+00> : vector<8x96xf32>
    %275 = tpu.matmul %273, %260, %cst_92 {dimension_numbers = #tpu.dot_dimension_numbers<[1], [0], [0], [1], [0, 0, 1, 1], [], []>} : vector<8x32xf32>, vector<32x96xf32>, vector<8x96xf32> -> vector<8x96xf32>
    %276 = vector.extract_strided_slice %274 {offsets = [0, 0], sizes = [8, 32], strides = [1, 1]} : vector<8x96xf32> to vector<8x32xf32>
    %277 = vector.extract_strided_slice %275 {offsets = [0, 0], sizes = [8, 32], strides = [1, 1]} : vector<8x96xf32> to vector<8x32xf32>
    %278 = arith.addf %276, %277 : vector<8x32xf32>
    %279 = arith.negf %278 : vector<8x32xf32>
    %280 = math.exp %279 : vector<8x32xf32>
    %cst_93 = arith.constant 1.000000e+00 : f32
    %281 = vector.broadcast %cst_93 : f32 to vector<8x32xf32>
    %282 = arith.addf %281, %280 : vector<8x32xf32>
    %283 = arith.divf %281, %282 : vector<8x32xf32>
    %284 = vector.extract_strided_slice %274 {offsets = [0, 32], sizes = [8, 32], strides = [1, 1]} : vector<8x96xf32> to vector<8x32xf32>
    %285 = vector.extract_strided_slice %275 {offsets = [0, 32], sizes = [8, 32], strides = [1, 1]} : vector<8x96xf32> to vector<8x32xf32>
    %286 = arith.addf %284, %285 : vector<8x32xf32>
    %287 = arith.negf %286 : vector<8x32xf32>
    %288 = math.exp %287 : vector<8x32xf32>
    %cst_94 = arith.constant 1.000000e+00 : f32
    %289 = vector.broadcast %cst_94 : f32 to vector<8x32xf32>
    %290 = arith.addf %289, %288 : vector<8x32xf32>
    %291 = arith.divf %289, %290 : vector<8x32xf32>
    %292 = vector.extract_strided_slice %274 {offsets = [0, 64], sizes = [8, 32], strides = [1, 1]} : vector<8x96xf32> to vector<8x32xf32>
    %293 = vector.extract_strided_slice %275 {offsets = [0, 64], sizes = [8, 32], strides = [1, 1]} : vector<8x96xf32> to vector<8x32xf32>
    %294 = arith.addf %293, %263 : vector<8x32xf32>
    %295 = arith.mulf %283, %294 : vector<8x32xf32>
    %296 = arith.addf %292, %295 : vector<8x32xf32>
    %297 = math.tanh %296 : vector<8x32xf32>
    %cst_95 = arith.constant 1.000000e+00 : f32
    %298 = vector.broadcast %cst_95 : f32 to vector<8x32xf32>
    %299 = arith.subf %298, %291 : vector<8x32xf32>
    %300 = arith.mulf %299, %297 : vector<8x32xf32>
    %301 = arith.mulf %291, %273 : vector<8x32xf32>
    %302 = arith.addf %300, %301 : vector<8x32xf32>
    %c8_96 = arith.constant 8 : index
    %c0_97 = arith.constant 0 : index
    %303 = vector.load %arg27[%c8_96, %c0_97] : memref<64x96xf32, #tpu.memory_space<vmem>>, vector<8x96xf32>
    %cst_98 = arith.constant dense<0.000000e+00> : vector<8x96xf32>
    %304 = tpu.matmul %302, %260, %cst_98 {dimension_numbers = #tpu.dot_dimension_numbers<[1], [0], [0], [1], [0, 0, 1, 1], [], []>} : vector<8x32xf32>, vector<32x96xf32>, vector<8x96xf32> -> vector<8x96xf32>
    %305 = vector.extract_strided_slice %303 {offsets = [0, 0], sizes = [8, 32], strides = [1, 1]} : vector<8x96xf32> to vector<8x32xf32>
    %306 = vector.extract_strided_slice %304 {offsets = [0, 0], sizes = [8, 32], strides = [1, 1]} : vector<8x96xf32> to vector<8x32xf32>
    %307 = arith.addf %305, %306 : vector<8x32xf32>
    %308 = arith.negf %307 : vector<8x32xf32>
    %309 = math.exp %308 : vector<8x32xf32>
    %cst_99 = arith.constant 1.000000e+00 : f32
    %310 = vector.broadcast %cst_99 : f32 to vector<8x32xf32>
    %311 = arith.addf %310, %309 : vector<8x32xf32>
    %312 = arith.divf %310, %311 : vector<8x32xf32>
    %313 = vector.extract_strided_slice %303 {offsets = [0, 32], sizes = [8, 32], strides = [1, 1]} : vector<8x96xf32> to vector<8x32xf32>
    %314 = vector.extract_strided_slice %304 {offsets = [0, 32], sizes = [8, 32], strides = [1, 1]} : vector<8x96xf32> to vector<8x32xf32>
    %315 = arith.addf %313, %314 : vector<8x32xf32>
    %316 = arith.negf %315 : vector<8x32xf32>
    %317 = math.exp %316 : vector<8x32xf32>
    %cst_100 = arith.constant 1.000000e+00 : f32
    %318 = vector.broadcast %cst_100 : f32 to vector<8x32xf32>
    %319 = arith.addf %318, %317 : vector<8x32xf32>
    %320 = arith.divf %318, %319 : vector<8x32xf32>
    %321 = vector.extract_strided_slice %303 {offsets = [0, 64], sizes = [8, 32], strides = [1, 1]} : vector<8x96xf32> to vector<8x32xf32>
    %322 = vector.extract_strided_slice %304 {offsets = [0, 64], sizes = [8, 32], strides = [1, 1]} : vector<8x96xf32> to vector<8x32xf32>
    %323 = arith.addf %322, %263 : vector<8x32xf32>
    %324 = arith.mulf %312, %323 : vector<8x32xf32>
    %325 = arith.addf %321, %324 : vector<8x32xf32>
    %326 = math.tanh %325 : vector<8x32xf32>
    %cst_101 = arith.constant 1.000000e+00 : f32
    %327 = vector.broadcast %cst_101 : f32 to vector<8x32xf32>
    %328 = arith.subf %327, %320 : vector<8x32xf32>
    %329 = arith.mulf %328, %326 : vector<8x32xf32>
    %330 = arith.mulf %320, %302 : vector<8x32xf32>
    %331 = arith.addf %329, %330 : vector<8x32xf32>
    %c16_102 = arith.constant 16 : index
    %c0_103 = arith.constant 0 : index
    %332 = vector.load %arg27[%c16_102, %c0_103] : memref<64x96xf32, #tpu.memory_space<vmem>>, vector<8x96xf32>
    %cst_104 = arith.constant dense<0.000000e+00> : vector<8x96xf32>
    %333 = tpu.matmul %331, %260, %cst_104 {dimension_numbers = #tpu.dot_dimension_numbers<[1], [0], [0], [1], [0, 0, 1, 1], [], []>} : vector<8x32xf32>, vector<32x96xf32>, vector<8x96xf32> -> vector<8x96xf32>
    %334 = vector.extract_strided_slice %332 {offsets = [0, 0], sizes = [8, 32], strides = [1, 1]} : vector<8x96xf32> to vector<8x32xf32>
    %335 = vector.extract_strided_slice %333 {offsets = [0, 0], sizes = [8, 32], strides = [1, 1]} : vector<8x96xf32> to vector<8x32xf32>
    %336 = arith.addf %334, %335 : vector<8x32xf32>
    %337 = arith.negf %336 : vector<8x32xf32>
    %338 = math.exp %337 : vector<8x32xf32>
    %cst_105 = arith.constant 1.000000e+00 : f32
    %339 = vector.broadcast %cst_105 : f32 to vector<8x32xf32>
    %340 = arith.addf %339, %338 : vector<8x32xf32>
    %341 = arith.divf %339, %340 : vector<8x32xf32>
    %342 = vector.extract_strided_slice %332 {offsets = [0, 32], sizes = [8, 32], strides = [1, 1]} : vector<8x96xf32> to vector<8x32xf32>
    %343 = vector.extract_strided_slice %333 {offsets = [0, 32], sizes = [8, 32], strides = [1, 1]} : vector<8x96xf32> to vector<8x32xf32>
    %344 = arith.addf %342, %343 : vector<8x32xf32>
    %345 = arith.negf %344 : vector<8x32xf32>
    %346 = math.exp %345 : vector<8x32xf32>
    %cst_106 = arith.constant 1.000000e+00 : f32
    %347 = vector.broadcast %cst_106 : f32 to vector<8x32xf32>
    %348 = arith.addf %347, %346 : vector<8x32xf32>
    %349 = arith.divf %347, %348 : vector<8x32xf32>
    %350 = vector.extract_strided_slice %332 {offsets = [0, 64], sizes = [8, 32], strides = [1, 1]} : vector<8x96xf32> to vector<8x32xf32>
    %351 = vector.extract_strided_slice %333 {offsets = [0, 64], sizes = [8, 32], strides = [1, 1]} : vector<8x96xf32> to vector<8x32xf32>
    %352 = arith.addf %351, %263 : vector<8x32xf32>
    %353 = arith.mulf %341, %352 : vector<8x32xf32>
    %354 = arith.addf %350, %353 : vector<8x32xf32>
    %355 = math.tanh %354 : vector<8x32xf32>
    %cst_107 = arith.constant 1.000000e+00 : f32
    %356 = vector.broadcast %cst_107 : f32 to vector<8x32xf32>
    %357 = arith.subf %356, %349 : vector<8x32xf32>
    %358 = arith.mulf %357, %355 : vector<8x32xf32>
    %359 = arith.mulf %349, %331 : vector<8x32xf32>
    %360 = arith.addf %358, %359 : vector<8x32xf32>
    %c24_108 = arith.constant 24 : index
    %c0_109 = arith.constant 0 : index
    %361 = vector.load %arg27[%c24_108, %c0_109] : memref<64x96xf32, #tpu.memory_space<vmem>>, vector<8x96xf32>
    %cst_110 = arith.constant dense<0.000000e+00> : vector<8x96xf32>
    %362 = tpu.matmul %360, %260, %cst_110 {dimension_numbers = #tpu.dot_dimension_numbers<[1], [0], [0], [1], [0, 0, 1, 1], [], []>} : vector<8x32xf32>, vector<32x96xf32>, vector<8x96xf32> -> vector<8x96xf32>
    %363 = vector.extract_strided_slice %361 {offsets = [0, 0], sizes = [8, 32], strides = [1, 1]} : vector<8x96xf32> to vector<8x32xf32>
    %364 = vector.extract_strided_slice %362 {offsets = [0, 0], sizes = [8, 32], strides = [1, 1]} : vector<8x96xf32> to vector<8x32xf32>
    %365 = arith.addf %363, %364 : vector<8x32xf32>
    %366 = arith.negf %365 : vector<8x32xf32>
    %367 = math.exp %366 : vector<8x32xf32>
    %cst_111 = arith.constant 1.000000e+00 : f32
    %368 = vector.broadcast %cst_111 : f32 to vector<8x32xf32>
    %369 = arith.addf %368, %367 : vector<8x32xf32>
    %370 = arith.divf %368, %369 : vector<8x32xf32>
    %371 = vector.extract_strided_slice %361 {offsets = [0, 32], sizes = [8, 32], strides = [1, 1]} : vector<8x96xf32> to vector<8x32xf32>
    %372 = vector.extract_strided_slice %362 {offsets = [0, 32], sizes = [8, 32], strides = [1, 1]} : vector<8x96xf32> to vector<8x32xf32>
    %373 = arith.addf %371, %372 : vector<8x32xf32>
    %374 = arith.negf %373 : vector<8x32xf32>
    %375 = math.exp %374 : vector<8x32xf32>
    %cst_112 = arith.constant 1.000000e+00 : f32
    %376 = vector.broadcast %cst_112 : f32 to vector<8x32xf32>
    %377 = arith.addf %376, %375 : vector<8x32xf32>
    %378 = arith.divf %376, %377 : vector<8x32xf32>
    %379 = vector.extract_strided_slice %361 {offsets = [0, 64], sizes = [8, 32], strides = [1, 1]} : vector<8x96xf32> to vector<8x32xf32>
    %380 = vector.extract_strided_slice %362 {offsets = [0, 64], sizes = [8, 32], strides = [1, 1]} : vector<8x96xf32> to vector<8x32xf32>
    %381 = arith.addf %380, %263 : vector<8x32xf32>
    %382 = arith.mulf %370, %381 : vector<8x32xf32>
    %383 = arith.addf %379, %382 : vector<8x32xf32>
    %384 = math.tanh %383 : vector<8x32xf32>
    %cst_113 = arith.constant 1.000000e+00 : f32
    %385 = vector.broadcast %cst_113 : f32 to vector<8x32xf32>
    %386 = arith.subf %385, %378 : vector<8x32xf32>
    %387 = arith.mulf %386, %384 : vector<8x32xf32>
    %388 = arith.mulf %378, %360 : vector<8x32xf32>
    %389 = arith.addf %387, %388 : vector<8x32xf32>
    %c32_114 = arith.constant 32 : index
    %c0_115 = arith.constant 0 : index
    %390 = vector.load %arg27[%c32_114, %c0_115] : memref<64x96xf32, #tpu.memory_space<vmem>>, vector<8x96xf32>
    %cst_116 = arith.constant dense<0.000000e+00> : vector<8x96xf32>
    %391 = tpu.matmul %389, %260, %cst_116 {dimension_numbers = #tpu.dot_dimension_numbers<[1], [0], [0], [1], [0, 0, 1, 1], [], []>} : vector<8x32xf32>, vector<32x96xf32>, vector<8x96xf32> -> vector<8x96xf32>
    %392 = vector.extract_strided_slice %390 {offsets = [0, 0], sizes = [8, 32], strides = [1, 1]} : vector<8x96xf32> to vector<8x32xf32>
    %393 = vector.extract_strided_slice %391 {offsets = [0, 0], sizes = [8, 32], strides = [1, 1]} : vector<8x96xf32> to vector<8x32xf32>
    %394 = arith.addf %392, %393 : vector<8x32xf32>
    %395 = arith.negf %394 : vector<8x32xf32>
    %396 = math.exp %395 : vector<8x32xf32>
    %cst_117 = arith.constant 1.000000e+00 : f32
    %397 = vector.broadcast %cst_117 : f32 to vector<8x32xf32>
    %398 = arith.addf %397, %396 : vector<8x32xf32>
    %399 = arith.divf %397, %398 : vector<8x32xf32>
    %400 = vector.extract_strided_slice %390 {offsets = [0, 32], sizes = [8, 32], strides = [1, 1]} : vector<8x96xf32> to vector<8x32xf32>
    %401 = vector.extract_strided_slice %391 {offsets = [0, 32], sizes = [8, 32], strides = [1, 1]} : vector<8x96xf32> to vector<8x32xf32>
    %402 = arith.addf %400, %401 : vector<8x32xf32>
    %403 = arith.negf %402 : vector<8x32xf32>
    %404 = math.exp %403 : vector<8x32xf32>
    %cst_118 = arith.constant 1.000000e+00 : f32
    %405 = vector.broadcast %cst_118 : f32 to vector<8x32xf32>
    %406 = arith.addf %405, %404 : vector<8x32xf32>
    %407 = arith.divf %405, %406 : vector<8x32xf32>
    %408 = vector.extract_strided_slice %390 {offsets = [0, 64], sizes = [8, 32], strides = [1, 1]} : vector<8x96xf32> to vector<8x32xf32>
    %409 = vector.extract_strided_slice %391 {offsets = [0, 64], sizes = [8, 32], strides = [1, 1]} : vector<8x96xf32> to vector<8x32xf32>
    %410 = arith.addf %409, %263 : vector<8x32xf32>
    %411 = arith.mulf %399, %410 : vector<8x32xf32>
    %412 = arith.addf %408, %411 : vector<8x32xf32>
    %413 = math.tanh %412 : vector<8x32xf32>
    %cst_119 = arith.constant 1.000000e+00 : f32
    %414 = vector.broadcast %cst_119 : f32 to vector<8x32xf32>
    %415 = arith.subf %414, %407 : vector<8x32xf32>
    %416 = arith.mulf %415, %413 : vector<8x32xf32>
    %417 = arith.mulf %407, %389 : vector<8x32xf32>
    %418 = arith.addf %416, %417 : vector<8x32xf32>
    %c40_120 = arith.constant 40 : index
    %c0_121 = arith.constant 0 : index
    %419 = vector.load %arg27[%c40_120, %c0_121] : memref<64x96xf32, #tpu.memory_space<vmem>>, vector<8x96xf32>
    %cst_122 = arith.constant dense<0.000000e+00> : vector<8x96xf32>
    %420 = tpu.matmul %418, %260, %cst_122 {dimension_numbers = #tpu.dot_dimension_numbers<[1], [0], [0], [1], [0, 0, 1, 1], [], []>} : vector<8x32xf32>, vector<32x96xf32>, vector<8x96xf32> -> vector<8x96xf32>
    %421 = vector.extract_strided_slice %419 {offsets = [0, 0], sizes = [8, 32], strides = [1, 1]} : vector<8x96xf32> to vector<8x32xf32>
    %422 = vector.extract_strided_slice %420 {offsets = [0, 0], sizes = [8, 32], strides = [1, 1]} : vector<8x96xf32> to vector<8x32xf32>
    %423 = arith.addf %421, %422 : vector<8x32xf32>
    %424 = arith.negf %423 : vector<8x32xf32>
    %425 = math.exp %424 : vector<8x32xf32>
    %cst_123 = arith.constant 1.000000e+00 : f32
    %426 = vector.broadcast %cst_123 : f32 to vector<8x32xf32>
    %427 = arith.addf %426, %425 : vector<8x32xf32>
    %428 = arith.divf %426, %427 : vector<8x32xf32>
    %429 = vector.extract_strided_slice %419 {offsets = [0, 32], sizes = [8, 32], strides = [1, 1]} : vector<8x96xf32> to vector<8x32xf32>
    %430 = vector.extract_strided_slice %420 {offsets = [0, 32], sizes = [8, 32], strides = [1, 1]} : vector<8x96xf32> to vector<8x32xf32>
    %431 = arith.addf %429, %430 : vector<8x32xf32>
    %432 = arith.negf %431 : vector<8x32xf32>
    %433 = math.exp %432 : vector<8x32xf32>
    %cst_124 = arith.constant 1.000000e+00 : f32
    %434 = vector.broadcast %cst_124 : f32 to vector<8x32xf32>
    %435 = arith.addf %434, %433 : vector<8x32xf32>
    %436 = arith.divf %434, %435 : vector<8x32xf32>
    %437 = vector.extract_strided_slice %419 {offsets = [0, 64], sizes = [8, 32], strides = [1, 1]} : vector<8x96xf32> to vector<8x32xf32>
    %438 = vector.extract_strided_slice %420 {offsets = [0, 64], sizes = [8, 32], strides = [1, 1]} : vector<8x96xf32> to vector<8x32xf32>
    %439 = arith.addf %438, %263 : vector<8x32xf32>
    %440 = arith.mulf %428, %439 : vector<8x32xf32>
    %441 = arith.addf %437, %440 : vector<8x32xf32>
    %442 = math.tanh %441 : vector<8x32xf32>
    %cst_125 = arith.constant 1.000000e+00 : f32
    %443 = vector.broadcast %cst_125 : f32 to vector<8x32xf32>
    %444 = arith.subf %443, %436 : vector<8x32xf32>
    %445 = arith.mulf %444, %442 : vector<8x32xf32>
    %446 = arith.mulf %436, %418 : vector<8x32xf32>
    %447 = arith.addf %445, %446 : vector<8x32xf32>
    %c48_126 = arith.constant 48 : index
    %c0_127 = arith.constant 0 : index
    %448 = vector.load %arg27[%c48_126, %c0_127] : memref<64x96xf32, #tpu.memory_space<vmem>>, vector<8x96xf32>
    %cst_128 = arith.constant dense<0.000000e+00> : vector<8x96xf32>
    %449 = tpu.matmul %447, %260, %cst_128 {dimension_numbers = #tpu.dot_dimension_numbers<[1], [0], [0], [1], [0, 0, 1, 1], [], []>} : vector<8x32xf32>, vector<32x96xf32>, vector<8x96xf32> -> vector<8x96xf32>
    %450 = vector.extract_strided_slice %448 {offsets = [0, 0], sizes = [8, 32], strides = [1, 1]} : vector<8x96xf32> to vector<8x32xf32>
    %451 = vector.extract_strided_slice %449 {offsets = [0, 0], sizes = [8, 32], strides = [1, 1]} : vector<8x96xf32> to vector<8x32xf32>
    %452 = arith.addf %450, %451 : vector<8x32xf32>
    %453 = arith.negf %452 : vector<8x32xf32>
    %454 = math.exp %453 : vector<8x32xf32>
    %cst_129 = arith.constant 1.000000e+00 : f32
    %455 = vector.broadcast %cst_129 : f32 to vector<8x32xf32>
    %456 = arith.addf %455, %454 : vector<8x32xf32>
    %457 = arith.divf %455, %456 : vector<8x32xf32>
    %458 = vector.extract_strided_slice %448 {offsets = [0, 32], sizes = [8, 32], strides = [1, 1]} : vector<8x96xf32> to vector<8x32xf32>
    %459 = vector.extract_strided_slice %449 {offsets = [0, 32], sizes = [8, 32], strides = [1, 1]} : vector<8x96xf32> to vector<8x32xf32>
    %460 = arith.addf %458, %459 : vector<8x32xf32>
    %461 = arith.negf %460 : vector<8x32xf32>
    %462 = math.exp %461 : vector<8x32xf32>
    %cst_130 = arith.constant 1.000000e+00 : f32
    %463 = vector.broadcast %cst_130 : f32 to vector<8x32xf32>
    %464 = arith.addf %463, %462 : vector<8x32xf32>
    %465 = arith.divf %463, %464 : vector<8x32xf32>
    %466 = vector.extract_strided_slice %448 {offsets = [0, 64], sizes = [8, 32], strides = [1, 1]} : vector<8x96xf32> to vector<8x32xf32>
    %467 = vector.extract_strided_slice %449 {offsets = [0, 64], sizes = [8, 32], strides = [1, 1]} : vector<8x96xf32> to vector<8x32xf32>
    %468 = arith.addf %467, %263 : vector<8x32xf32>
    %469 = arith.mulf %457, %468 : vector<8x32xf32>
    %470 = arith.addf %466, %469 : vector<8x32xf32>
    %471 = math.tanh %470 : vector<8x32xf32>
    %cst_131 = arith.constant 1.000000e+00 : f32
    %472 = vector.broadcast %cst_131 : f32 to vector<8x32xf32>
    %473 = arith.subf %472, %465 : vector<8x32xf32>
    %474 = arith.mulf %473, %471 : vector<8x32xf32>
    %475 = arith.mulf %465, %447 : vector<8x32xf32>
    %476 = arith.addf %474, %475 : vector<8x32xf32>
    %c56_132 = arith.constant 56 : index
    %c0_133 = arith.constant 0 : index
    %477 = vector.load %arg27[%c56_132, %c0_133] : memref<64x96xf32, #tpu.memory_space<vmem>>, vector<8x96xf32>
    %cst_134 = arith.constant dense<0.000000e+00> : vector<8x96xf32>
    %478 = tpu.matmul %476, %260, %cst_134 {dimension_numbers = #tpu.dot_dimension_numbers<[1], [0], [0], [1], [0, 0, 1, 1], [], []>} : vector<8x32xf32>, vector<32x96xf32>, vector<8x96xf32> -> vector<8x96xf32>
    %479 = vector.extract_strided_slice %477 {offsets = [0, 0], sizes = [8, 32], strides = [1, 1]} : vector<8x96xf32> to vector<8x32xf32>
    %480 = vector.extract_strided_slice %478 {offsets = [0, 0], sizes = [8, 32], strides = [1, 1]} : vector<8x96xf32> to vector<8x32xf32>
    %481 = arith.addf %479, %480 : vector<8x32xf32>
    %482 = arith.negf %481 : vector<8x32xf32>
    %483 = math.exp %482 : vector<8x32xf32>
    %cst_135 = arith.constant 1.000000e+00 : f32
    %484 = vector.broadcast %cst_135 : f32 to vector<8x32xf32>
    %485 = arith.addf %484, %483 : vector<8x32xf32>
    %486 = arith.divf %484, %485 : vector<8x32xf32>
    %487 = vector.extract_strided_slice %477 {offsets = [0, 32], sizes = [8, 32], strides = [1, 1]} : vector<8x96xf32> to vector<8x32xf32>
    %488 = vector.extract_strided_slice %478 {offsets = [0, 32], sizes = [8, 32], strides = [1, 1]} : vector<8x96xf32> to vector<8x32xf32>
    %489 = arith.addf %487, %488 : vector<8x32xf32>
    %490 = arith.negf %489 : vector<8x32xf32>
    %491 = math.exp %490 : vector<8x32xf32>
    %cst_136 = arith.constant 1.000000e+00 : f32
    %492 = vector.broadcast %cst_136 : f32 to vector<8x32xf32>
    %493 = arith.addf %492, %491 : vector<8x32xf32>
    %494 = arith.divf %492, %493 : vector<8x32xf32>
    %495 = vector.extract_strided_slice %477 {offsets = [0, 64], sizes = [8, 32], strides = [1, 1]} : vector<8x96xf32> to vector<8x32xf32>
    %496 = vector.extract_strided_slice %478 {offsets = [0, 64], sizes = [8, 32], strides = [1, 1]} : vector<8x96xf32> to vector<8x32xf32>
    %497 = arith.addf %496, %263 : vector<8x32xf32>
    %498 = arith.mulf %486, %497 : vector<8x32xf32>
    %499 = arith.addf %495, %498 : vector<8x32xf32>
    %500 = math.tanh %499 : vector<8x32xf32>
    %cst_137 = arith.constant 1.000000e+00 : f32
    %501 = vector.broadcast %cst_137 : f32 to vector<8x32xf32>
    %502 = arith.subf %501, %494 : vector<8x32xf32>
    %503 = arith.mulf %502, %500 : vector<8x32xf32>
    %504 = arith.mulf %494, %476 : vector<8x32xf32>
    %505 = arith.addf %503, %504 : vector<8x32xf32>
    %506 = arith.addf %505, %251 : vector<8x32xf32>
    %c0_138 = arith.constant 0 : index
    %c0_139 = arith.constant 0 : index
    %507 = vector.load %arg12[%c0_138, %c0_139] : memref<32x96xf32, #tpu.memory_space<vmem>>, vector<32x96xf32>
    %cst_140 = arith.constant dense<0.000000e+00> : vector<8x96xf32>
    %508 = tpu.matmul %506, %507, %cst_140 {dimension_numbers = #tpu.dot_dimension_numbers<[1], [0], [0], [1], [0, 0, 1, 1], [], []>} : vector<8x32xf32>, vector<32x96xf32>, vector<8x96xf32> -> vector<8x96xf32>
    %c0_141 = arith.constant 0 : index
    %c0_142 = arith.constant 0 : index
    %509 = vector.load %arg14[%c0_141, %c0_142] : memref<1x96xf32, #tpu.memory_space<vmem>>, vector<1x96xf32>
    %510 = vector.broadcast %509 : vector<1x96xf32> to vector<8x96xf32>
    %511 = arith.addf %508, %510 : vector<8x96xf32>
    %c0_143 = arith.constant 0 : index
    %c0_144 = arith.constant 0 : index
    %512 = vector.load %arg13[%c0_143, %c0_144] : memref<32x96xf32, #tpu.memory_space<vmem>>, vector<32x96xf32>
    %c0_145 = arith.constant 0 : index
    %c0_146 = arith.constant 0 : index
    %513 = vector.load %arg15[%c0_145, %c0_146] : memref<1x32xf32, #tpu.memory_space<vmem>>, vector<1x32xf32>
    %514 = vector.shape_cast %513 : vector<1x32xf32> to vector<1x32xf32>
    %515 = vector.broadcast %514 : vector<1x32xf32> to vector<8x32xf32>
    %c0_147 = arith.constant 0 : index
    %c0_148 = arith.constant 0 : index
    %516 = vector.load %arg20[%c0_147, %c0_148] : memref<32x32xf32, #tpu.memory_space<vmem>>, vector<32x32xf32>
    %cst_149 = arith.constant dense<0.000000e+00> : vector<8x32xf32>
    %517 = tpu.matmul %506, %516, %cst_149 {dimension_numbers = #tpu.dot_dimension_numbers<[1], [0], [0], [1], [0, 0, 1, 1], [], []>} : vector<8x32xf32>, vector<32x32xf32>, vector<8x32xf32> -> vector<8x32xf32>
    %c0_150 = arith.constant 0 : index
    %c0_151 = arith.constant 0 : index
    %518 = vector.load %arg21[%c0_150, %c0_151] : memref<1x32xf32, #tpu.memory_space<vmem>>, vector<1x32xf32>
    %519 = vector.broadcast %518 : vector<1x32xf32> to vector<8x32xf32>
    %520 = arith.addf %517, %519 : vector<8x32xf32>
    %cst_152 = arith.constant 0.000000e+00 : f32
    %521 = vector.broadcast %cst_152 : f32 to vector<8x32xf32>
    %522 = arith.cmpf ogt, %520, %521 : vector<8x32xf32>
    %cst_153 = arith.constant 2.000000e-01 : f32
    %523 = vector.broadcast %cst_153 : f32 to vector<8x32xf32>
    %524 = arith.mulf %523, %520 : vector<8x32xf32>
    %525 = arith.select %522, %520, %524 : vector<8x32xi1>, vector<8x32xf32>
    %c0_154 = arith.constant 0 : index
    %c0_155 = arith.constant 0 : index
    %526 = vector.load %arg25[%c0_154, %c0_155] : memref<1x256xf32, #tpu.memory_space<vmem>>, vector<1x256xf32>
    %527 = vector.shape_cast %526 : vector<1x256xf32> to vector<1x256xf32>
    %528 = vector.broadcast %527 : vector<1x256xf32> to vector<8x256xf32>
    %c0_156 = arith.constant 0 : index
    %c0_157 = arith.constant 0 : index
    %529 = vector.load %arg30[%c0_156, %c0_157] : memref<8x256xf32, #tpu.memory_space<vmem>>, vector<8x256xf32>
    tpu.vector_store %arg30[%c0_156, %c0_157], %528 {strides = array<i32>} : memref<8x256xf32, #tpu.memory_space<vmem>>, vector<8x256xf32>,
    %cst_158 = arith.constant dense<0.000000e+00> : vector<8x96xf32>
    %530 = tpu.matmul %525, %512, %cst_158 {dimension_numbers = #tpu.dot_dimension_numbers<[1], [0], [0], [1], [0, 0, 1, 1], [], []>} : vector<8x32xf32>, vector<32x96xf32>, vector<8x96xf32> -> vector<8x96xf32>
    %531 = vector.extract_strided_slice %511 {offsets = [0, 0], sizes = [8, 32], strides = [1, 1]} : vector<8x96xf32> to vector<8x32xf32>
    %532 = vector.extract_strided_slice %530 {offsets = [0, 0], sizes = [8, 32], strides = [1, 1]} : vector<8x96xf32> to vector<8x32xf32>
    %533 = arith.addf %531, %532 : vector<8x32xf32>
    %534 = arith.negf %533 : vector<8x32xf32>
    %535 = math.exp %534 : vector<8x32xf32>
    %cst_159 = arith.constant 1.000000e+00 : f32
    %536 = vector.broadcast %cst_159 : f32 to vector<8x32xf32>
    %537 = arith.addf %536, %535 : vector<8x32xf32>
    %538 = arith.divf %536, %537 : vector<8x32xf32>
    %539 = vector.extract_strided_slice %511 {offsets = [0, 32], sizes = [8, 32], strides = [1, 1]} : vector<8x96xf32> to vector<8x32xf32>
    %540 = vector.extract_strided_slice %530 {offsets = [0, 32], sizes = [8, 32], strides = [1, 1]} : vector<8x96xf32> to vector<8x32xf32>
    %541 = arith.addf %539, %540 : vector<8x32xf32>
    %542 = arith.negf %541 : vector<8x32xf32>
    %543 = math.exp %542 : vector<8x32xf32>
    %cst_160 = arith.constant 1.000000e+00 : f32
    %544 = vector.broadcast %cst_160 : f32 to vector<8x32xf32>
    %545 = arith.addf %544, %543 : vector<8x32xf32>
    %546 = arith.divf %544, %545 : vector<8x32xf32>
    %547 = vector.extract_strided_slice %511 {offsets = [0, 64], sizes = [8, 32], strides = [1, 1]} : vector<8x96xf32> to vector<8x32xf32>
    %548 = vector.extract_strided_slice %530 {offsets = [0, 64], sizes = [8, 32], strides = [1, 1]} : vector<8x96xf32> to vector<8x32xf32>
    %549 = arith.addf %548, %515 : vector<8x32xf32>
    %550 = arith.mulf %538, %549 : vector<8x32xf32>
    %551 = arith.addf %547, %550 : vector<8x32xf32>
    %552 = math.tanh %551 : vector<8x32xf32>
    %cst_161 = arith.constant 1.000000e+00 : f32
    %553 = vector.broadcast %cst_161 : f32 to vector<8x32xf32>
    %554 = arith.subf %553, %546 : vector<8x32xf32>
    %555 = arith.mulf %554, %552 : vector<8x32xf32>
    %556 = arith.mulf %546, %525 : vector<8x32xf32>
    %557 = arith.addf %555, %556 : vector<8x32xf32>
    %c0_162 = arith.constant 0 : index
    %c0_163 = arith.constant 0 : index
    %558 = vector.load %arg29[%c0_162, %c0_163] : memref<64x32xf32, #tpu.memory_space<vmem>>, vector<8x32xf32>
    tpu.vector_store %arg29[%c0_162, %c0_163], %557 {strides = array<i32>} : memref<64x32xf32, #tpu.memory_space<vmem>>, vector<8x32xf32>,
    %c0_164 = arith.constant 0 : index
    %c0_165 = arith.constant 0 : index
    %559 = vector.load %arg30[%c0_164, %c0_165] : memref<8x256xf32, #tpu.memory_space<vmem>>, vector<8x256xf32>
    %c0_166 = arith.constant 0 : index
    %c0_167 = arith.constant 0 : index
    %560 = vector.load %arg24[%c0_166, %c0_167] : memref<256x256xf32, #tpu.memory_space<vmem>>, vector<32x256xf32>
    %cst_168 = arith.constant dense<0.000000e+00> : vector<8x256xf32>
    %561 = tpu.matmul %557, %560, %cst_168 {dimension_numbers = #tpu.dot_dimension_numbers<[1], [0], [0], [1], [0, 0, 1, 1], [], []>} : vector<8x32xf32>, vector<32x256xf32>, vector<8x256xf32> -> vector<8x256xf32>
    %562 = arith.addf %559, %561 : vector<8x256xf32>
    %c0_169 = arith.constant 0 : index
    %c0_170 = arith.constant 0 : index
    %563 = vector.load %arg30[%c0_169, %c0_170] : memref<8x256xf32, #tpu.memory_space<vmem>>, vector<8x256xf32>
    tpu.vector_store %arg30[%c0_169, %c0_170], %562 {strides = array<i32>} : memref<8x256xf32, #tpu.memory_space<vmem>>, vector<8x256xf32>,
    %cst_171 = arith.constant dense<0.000000e+00> : vector<8x96xf32>
    %564 = tpu.matmul %557, %512, %cst_171 {dimension_numbers = #tpu.dot_dimension_numbers<[1], [0], [0], [1], [0, 0, 1, 1], [], []>} : vector<8x32xf32>, vector<32x96xf32>, vector<8x96xf32> -> vector<8x96xf32>
    %565 = vector.extract_strided_slice %511 {offsets = [0, 0], sizes = [8, 32], strides = [1, 1]} : vector<8x96xf32> to vector<8x32xf32>
    %566 = vector.extract_strided_slice %564 {offsets = [0, 0], sizes = [8, 32], strides = [1, 1]} : vector<8x96xf32> to vector<8x32xf32>
    %567 = arith.addf %565, %566 : vector<8x32xf32>
    %568 = arith.negf %567 : vector<8x32xf32>
    %569 = math.exp %568 : vector<8x32xf32>
    %cst_172 = arith.constant 1.000000e+00 : f32
    %570 = vector.broadcast %cst_172 : f32 to vector<8x32xf32>
    %571 = arith.addf %570, %569 : vector<8x32xf32>
    %572 = arith.divf %570, %571 : vector<8x32xf32>
    %573 = vector.extract_strided_slice %511 {offsets = [0, 32], sizes = [8, 32], strides = [1, 1]} : vector<8x96xf32> to vector<8x32xf32>
    %574 = vector.extract_strided_slice %564 {offsets = [0, 32], sizes = [8, 32], strides = [1, 1]} : vector<8x96xf32> to vector<8x32xf32>
    %575 = arith.addf %573, %574 : vector<8x32xf32>
    %576 = arith.negf %575 : vector<8x32xf32>
    %577 = math.exp %576 : vector<8x32xf32>
    %cst_173 = arith.constant 1.000000e+00 : f32
    %578 = vector.broadcast %cst_173 : f32 to vector<8x32xf32>
    %579 = arith.addf %578, %577 : vector<8x32xf32>
    %580 = arith.divf %578, %579 : vector<8x32xf32>
    %581 = vector.extract_strided_slice %511 {offsets = [0, 64], sizes = [8, 32], strides = [1, 1]} : vector<8x96xf32> to vector<8x32xf32>
    %582 = vector.extract_strided_slice %564 {offsets = [0, 64], sizes = [8, 32], strides = [1, 1]} : vector<8x96xf32> to vector<8x32xf32>
    %583 = arith.addf %582, %515 : vector<8x32xf32>
    %584 = arith.mulf %572, %583 : vector<8x32xf32>
    %585 = arith.addf %581, %584 : vector<8x32xf32>
    %586 = math.tanh %585 : vector<8x32xf32>
    %cst_174 = arith.constant 1.000000e+00 : f32
    %587 = vector.broadcast %cst_174 : f32 to vector<8x32xf32>
    %588 = arith.subf %587, %580 : vector<8x32xf32>
    %589 = arith.mulf %588, %586 : vector<8x32xf32>
    %590 = arith.mulf %580, %557 : vector<8x32xf32>
    %591 = arith.addf %589, %590 : vector<8x32xf32>
    %c8_175 = arith.constant 8 : index
    %c0_176 = arith.constant 0 : index
    %592 = vector.load %arg29[%c8_175, %c0_176] : memref<64x32xf32, #tpu.memory_space<vmem>>, vector<8x32xf32>
    tpu.vector_store %arg29[%c8_175, %c0_176], %591 {strides = array<i32>} : memref<64x32xf32, #tpu.memory_space<vmem>>, vector<8x32xf32>,
    %c0_177 = arith.constant 0 : index
    %c0_178 = arith.constant 0 : index
    %593 = vector.load %arg30[%c0_177, %c0_178] : memref<8x256xf32, #tpu.memory_space<vmem>>, vector<8x256xf32>
    %c32_179 = arith.constant 32 : index
    %c0_180 = arith.constant 0 : index
    %594 = vector.load %arg24[%c32_179, %c0_180] : memref<256x256xf32, #tpu.memory_space<vmem>>, vector<32x256xf32>
    %cst_181 = arith.constant dense<0.000000e+00> : vector<8x256xf32>
    %595 = tpu.matmul %591, %594, %cst_181 {dimension_numbers = #tpu.dot_dimension_numbers<[1], [0], [0], [1], [0, 0, 1, 1], [], []>} : vector<8x32xf32>, vector<32x256xf32>, vector<8x256xf32> -> vector<8x256xf32>
    %596 = arith.addf %593, %595 : vector<8x256xf32>
    %c0_182 = arith.constant 0 : index
    %c0_183 = arith.constant 0 : index
    %597 = vector.load %arg30[%c0_182, %c0_183] : memref<8x256xf32, #tpu.memory_space<vmem>>, vector<8x256xf32>
    tpu.vector_store %arg30[%c0_182, %c0_183], %596 {strides = array<i32>} : memref<8x256xf32, #tpu.memory_space<vmem>>, vector<8x256xf32>,
    %cst_184 = arith.constant dense<0.000000e+00> : vector<8x96xf32>
    %598 = tpu.matmul %591, %512, %cst_184 {dimension_numbers = #tpu.dot_dimension_numbers<[1], [0], [0], [1], [0, 0, 1, 1], [], []>} : vector<8x32xf32>, vector<32x96xf32>, vector<8x96xf32> -> vector<8x96xf32>
    %599 = vector.extract_strided_slice %511 {offsets = [0, 0], sizes = [8, 32], strides = [1, 1]} : vector<8x96xf32> to vector<8x32xf32>
    %600 = vector.extract_strided_slice %598 {offsets = [0, 0], sizes = [8, 32], strides = [1, 1]} : vector<8x96xf32> to vector<8x32xf32>
    %601 = arith.addf %599, %600 : vector<8x32xf32>
    %602 = arith.negf %601 : vector<8x32xf32>
    %603 = math.exp %602 : vector<8x32xf32>
    %cst_185 = arith.constant 1.000000e+00 : f32
    %604 = vector.broadcast %cst_185 : f32 to vector<8x32xf32>
    %605 = arith.addf %604, %603 : vector<8x32xf32>
    %606 = arith.divf %604, %605 : vector<8x32xf32>
    %607 = vector.extract_strided_slice %511 {offsets = [0, 32], sizes = [8, 32], strides = [1, 1]} : vector<8x96xf32> to vector<8x32xf32>
    %608 = vector.extract_strided_slice %598 {offsets = [0, 32], sizes = [8, 32], strides = [1, 1]} : vector<8x96xf32> to vector<8x32xf32>
    %609 = arith.addf %607, %608 : vector<8x32xf32>
    %610 = arith.negf %609 : vector<8x32xf32>
    %611 = math.exp %610 : vector<8x32xf32>
    %cst_186 = arith.constant 1.000000e+00 : f32
    %612 = vector.broadcast %cst_186 : f32 to vector<8x32xf32>
    %613 = arith.addf %612, %611 : vector<8x32xf32>
    %614 = arith.divf %612, %613 : vector<8x32xf32>
    %615 = vector.extract_strided_slice %511 {offsets = [0, 64], sizes = [8, 32], strides = [1, 1]} : vector<8x96xf32> to vector<8x32xf32>
    %616 = vector.extract_strided_slice %598 {offsets = [0, 64], sizes = [8, 32], strides = [1, 1]} : vector<8x96xf32> to vector<8x32xf32>
    %617 = arith.addf %616, %515 : vector<8x32xf32>
    %618 = arith.mulf %606, %617 : vector<8x32xf32>
    %619 = arith.addf %615, %618 : vector<8x32xf32>
    %620 = math.tanh %619 : vector<8x32xf32>
    %cst_187 = arith.constant 1.000000e+00 : f32
    %621 = vector.broadcast %cst_187 : f32 to vector<8x32xf32>
    %622 = arith.subf %621, %614 : vector<8x32xf32>
    %623 = arith.mulf %622, %620 : vector<8x32xf32>
    %624 = arith.mulf %614, %591 : vector<8x32xf32>
    %625 = arith.addf %623, %624 : vector<8x32xf32>
    %c16_188 = arith.constant 16 : index
    %c0_189 = arith.constant 0 : index
    %626 = vector.load %arg29[%c16_188, %c0_189] : memref<64x32xf32, #tpu.memory_space<vmem>>, vector<8x32xf32>
    tpu.vector_store %arg29[%c16_188, %c0_189], %625 {strides = array<i32>} : memref<64x32xf32, #tpu.memory_space<vmem>>, vector<8x32xf32>,
    %c0_190 = arith.constant 0 : index
    %c0_191 = arith.constant 0 : index
    %627 = vector.load %arg30[%c0_190, %c0_191] : memref<8x256xf32, #tpu.memory_space<vmem>>, vector<8x256xf32>
    %c64 = arith.constant 64 : index
    %c0_192 = arith.constant 0 : index
    %628 = vector.load %arg24[%c64, %c0_192] : memref<256x256xf32, #tpu.memory_space<vmem>>, vector<32x256xf32>
    %cst_193 = arith.constant dense<0.000000e+00> : vector<8x256xf32>
    %629 = tpu.matmul %625, %628, %cst_193 {dimension_numbers = #tpu.dot_dimension_numbers<[1], [0], [0], [1], [0, 0, 1, 1], [], []>} : vector<8x32xf32>, vector<32x256xf32>, vector<8x256xf32> -> vector<8x256xf32>
    %630 = arith.addf %627, %629 : vector<8x256xf32>
    %c0_194 = arith.constant 0 : index
    %c0_195 = arith.constant 0 : index
    %631 = vector.load %arg30[%c0_194, %c0_195] : memref<8x256xf32, #tpu.memory_space<vmem>>, vector<8x256xf32>
    tpu.vector_store %arg30[%c0_194, %c0_195], %630 {strides = array<i32>} : memref<8x256xf32, #tpu.memory_space<vmem>>, vector<8x256xf32>,
    %cst_196 = arith.constant dense<0.000000e+00> : vector<8x96xf32>
    %632 = tpu.matmul %625, %512, %cst_196 {dimension_numbers = #tpu.dot_dimension_numbers<[1], [0], [0], [1], [0, 0, 1, 1], [], []>} : vector<8x32xf32>, vector<32x96xf32>, vector<8x96xf32> -> vector<8x96xf32>
    %633 = vector.extract_strided_slice %511 {offsets = [0, 0], sizes = [8, 32], strides = [1, 1]} : vector<8x96xf32> to vector<8x32xf32>
    %634 = vector.extract_strided_slice %632 {offsets = [0, 0], sizes = [8, 32], strides = [1, 1]} : vector<8x96xf32> to vector<8x32xf32>
    %635 = arith.addf %633, %634 : vector<8x32xf32>
    %636 = arith.negf %635 : vector<8x32xf32>
    %637 = math.exp %636 : vector<8x32xf32>
    %cst_197 = arith.constant 1.000000e+00 : f32
    %638 = vector.broadcast %cst_197 : f32 to vector<8x32xf32>
    %639 = arith.addf %638, %637 : vector<8x32xf32>
    %640 = arith.divf %638, %639 : vector<8x32xf32>
    %641 = vector.extract_strided_slice %511 {offsets = [0, 32], sizes = [8, 32], strides = [1, 1]} : vector<8x96xf32> to vector<8x32xf32>
    %642 = vector.extract_strided_slice %632 {offsets = [0, 32], sizes = [8, 32], strides = [1, 1]} : vector<8x96xf32> to vector<8x32xf32>
    %643 = arith.addf %641, %642 : vector<8x32xf32>
    %644 = arith.negf %643 : vector<8x32xf32>
    %645 = math.exp %644 : vector<8x32xf32>
    %cst_198 = arith.constant 1.000000e+00 : f32
    %646 = vector.broadcast %cst_198 : f32 to vector<8x32xf32>
    %647 = arith.addf %646, %645 : vector<8x32xf32>
    %648 = arith.divf %646, %647 : vector<8x32xf32>
    %649 = vector.extract_strided_slice %511 {offsets = [0, 64], sizes = [8, 32], strides = [1, 1]} : vector<8x96xf32> to vector<8x32xf32>
    %650 = vector.extract_strided_slice %632 {offsets = [0, 64], sizes = [8, 32], strides = [1, 1]} : vector<8x96xf32> to vector<8x32xf32>
    %651 = arith.addf %650, %515 : vector<8x32xf32>
    %652 = arith.mulf %640, %651 : vector<8x32xf32>
    %653 = arith.addf %649, %652 : vector<8x32xf32>
    %654 = math.tanh %653 : vector<8x32xf32>
    %cst_199 = arith.constant 1.000000e+00 : f32
    %655 = vector.broadcast %cst_199 : f32 to vector<8x32xf32>
    %656 = arith.subf %655, %648 : vector<8x32xf32>
    %657 = arith.mulf %656, %654 : vector<8x32xf32>
    %658 = arith.mulf %648, %625 : vector<8x32xf32>
    %659 = arith.addf %657, %658 : vector<8x32xf32>
    %c24_200 = arith.constant 24 : index
    %c0_201 = arith.constant 0 : index
    %660 = vector.load %arg29[%c24_200, %c0_201] : memref<64x32xf32, #tpu.memory_space<vmem>>, vector<8x32xf32>
    tpu.vector_store %arg29[%c24_200, %c0_201], %659 {strides = array<i32>} : memref<64x32xf32, #tpu.memory_space<vmem>>, vector<8x32xf32>,
    %c0_202 = arith.constant 0 : index
    %c0_203 = arith.constant 0 : index
    %661 = vector.load %arg30[%c0_202, %c0_203] : memref<8x256xf32, #tpu.memory_space<vmem>>, vector<8x256xf32>
    %c96 = arith.constant 96 : index
    %c0_204 = arith.constant 0 : index
    %662 = vector.load %arg24[%c96, %c0_204] : memref<256x256xf32, #tpu.memory_space<vmem>>, vector<32x256xf32>
    %cst_205 = arith.constant dense<0.000000e+00> : vector<8x256xf32>
    %663 = tpu.matmul %659, %662, %cst_205 {dimension_numbers = #tpu.dot_dimension_numbers<[1], [0], [0], [1], [0, 0, 1, 1], [], []>} : vector<8x32xf32>, vector<32x256xf32>, vector<8x256xf32> -> vector<8x256xf32>
    %664 = arith.addf %661, %663 : vector<8x256xf32>
    %c0_206 = arith.constant 0 : index
    %c0_207 = arith.constant 0 : index
    %665 = vector.load %arg30[%c0_206, %c0_207] : memref<8x256xf32, #tpu.memory_space<vmem>>, vector<8x256xf32>
    tpu.vector_store %arg30[%c0_206, %c0_207], %664 {strides = array<i32>} : memref<8x256xf32, #tpu.memory_space<vmem>>, vector<8x256xf32>,
    %cst_208 = arith.constant dense<0.000000e+00> : vector<8x96xf32>
    %666 = tpu.matmul %659, %512, %cst_208 {dimension_numbers = #tpu.dot_dimension_numbers<[1], [0], [0], [1], [0, 0, 1, 1], [], []>} : vector<8x32xf32>, vector<32x96xf32>, vector<8x96xf32> -> vector<8x96xf32>
    %667 = vector.extract_strided_slice %511 {offsets = [0, 0], sizes = [8, 32], strides = [1, 1]} : vector<8x96xf32> to vector<8x32xf32>
    %668 = vector.extract_strided_slice %666 {offsets = [0, 0], sizes = [8, 32], strides = [1, 1]} : vector<8x96xf32> to vector<8x32xf32>
    %669 = arith.addf %667, %668 : vector<8x32xf32>
    %670 = arith.negf %669 : vector<8x32xf32>
    %671 = math.exp %670 : vector<8x32xf32>
    %cst_209 = arith.constant 1.000000e+00 : f32
    %672 = vector.broadcast %cst_209 : f32 to vector<8x32xf32>
    %673 = arith.addf %672, %671 : vector<8x32xf32>
    %674 = arith.divf %672, %673 : vector<8x32xf32>
    %675 = vector.extract_strided_slice %511 {offsets = [0, 32], sizes = [8, 32], strides = [1, 1]} : vector<8x96xf32> to vector<8x32xf32>
    %676 = vector.extract_strided_slice %666 {offsets = [0, 32], sizes = [8, 32], strides = [1, 1]} : vector<8x96xf32> to vector<8x32xf32>
    %677 = arith.addf %675, %676 : vector<8x32xf32>
    %678 = arith.negf %677 : vector<8x32xf32>
    %679 = math.exp %678 : vector<8x32xf32>
    %cst_210 = arith.constant 1.000000e+00 : f32
    %680 = vector.broadcast %cst_210 : f32 to vector<8x32xf32>
    %681 = arith.addf %680, %679 : vector<8x32xf32>
    %682 = arith.divf %680, %681 : vector<8x32xf32>
    %683 = vector.extract_strided_slice %511 {offsets = [0, 64], sizes = [8, 32], strides = [1, 1]} : vector<8x96xf32> to vector<8x32xf32>
    %684 = vector.extract_strided_slice %666 {offsets = [0, 64], sizes = [8, 32], strides = [1, 1]} : vector<8x96xf32> to vector<8x32xf32>
    %685 = arith.addf %684, %515 : vector<8x32xf32>
    %686 = arith.mulf %674, %685 : vector<8x32xf32>
    %687 = arith.addf %683, %686 : vector<8x32xf32>
    %688 = math.tanh %687 : vector<8x32xf32>
    %cst_211 = arith.constant 1.000000e+00 : f32
    %689 = vector.broadcast %cst_211 : f32 to vector<8x32xf32>
    %690 = arith.subf %689, %682 : vector<8x32xf32>
    %691 = arith.mulf %690, %688 : vector<8x32xf32>
    %692 = arith.mulf %682, %659 : vector<8x32xf32>
    %693 = arith.addf %691, %692 : vector<8x32xf32>
    %c32_212 = arith.constant 32 : index
    %c0_213 = arith.constant 0 : index
    %694 = vector.load %arg29[%c32_212, %c0_213] : memref<64x32xf32, #tpu.memory_space<vmem>>, vector<8x32xf32>
    tpu.vector_store %arg29[%c32_212, %c0_213], %693 {strides = array<i32>} : memref<64x32xf32, #tpu.memory_space<vmem>>, vector<8x32xf32>,
    %c0_214 = arith.constant 0 : index
    %c0_215 = arith.constant 0 : index
    %695 = vector.load %arg30[%c0_214, %c0_215] : memref<8x256xf32, #tpu.memory_space<vmem>>, vector<8x256xf32>
    %c128 = arith.constant 128 : index
    %c0_216 = arith.constant 0 : index
    %696 = vector.load %arg24[%c128, %c0_216] : memref<256x256xf32, #tpu.memory_space<vmem>>, vector<32x256xf32>
    %cst_217 = arith.constant dense<0.000000e+00> : vector<8x256xf32>
    %697 = tpu.matmul %693, %696, %cst_217 {dimension_numbers = #tpu.dot_dimension_numbers<[1], [0], [0], [1], [0, 0, 1, 1], [], []>} : vector<8x32xf32>, vector<32x256xf32>, vector<8x256xf32> -> vector<8x256xf32>
    %698 = arith.addf %695, %697 : vector<8x256xf32>
    %c0_218 = arith.constant 0 : index
    %c0_219 = arith.constant 0 : index
    %699 = vector.load %arg30[%c0_218, %c0_219] : memref<8x256xf32, #tpu.memory_space<vmem>>, vector<8x256xf32>
    tpu.vector_store %arg30[%c0_218, %c0_219], %698 {strides = array<i32>} : memref<8x256xf32, #tpu.memory_space<vmem>>, vector<8x256xf32>,
    %cst_220 = arith.constant dense<0.000000e+00> : vector<8x96xf32>
    %700 = tpu.matmul %693, %512, %cst_220 {dimension_numbers = #tpu.dot_dimension_numbers<[1], [0], [0], [1], [0, 0, 1, 1], [], []>} : vector<8x32xf32>, vector<32x96xf32>, vector<8x96xf32> -> vector<8x96xf32>
    %701 = vector.extract_strided_slice %511 {offsets = [0, 0], sizes = [8, 32], strides = [1, 1]} : vector<8x96xf32> to vector<8x32xf32>
    %702 = vector.extract_strided_slice %700 {offsets = [0, 0], sizes = [8, 32], strides = [1, 1]} : vector<8x96xf32> to vector<8x32xf32>
    %703 = arith.addf %701, %702 : vector<8x32xf32>
    %704 = arith.negf %703 : vector<8x32xf32>
    %705 = math.exp %704 : vector<8x32xf32>
    %cst_221 = arith.constant 1.000000e+00 : f32
    %706 = vector.broadcast %cst_221 : f32 to vector<8x32xf32>
    %707 = arith.addf %706, %705 : vector<8x32xf32>
    %708 = arith.divf %706, %707 : vector<8x32xf32>
    %709 = vector.extract_strided_slice %511 {offsets = [0, 32], sizes = [8, 32], strides = [1, 1]} : vector<8x96xf32> to vector<8x32xf32>
    %710 = vector.extract_strided_slice %700 {offsets = [0, 32], sizes = [8, 32], strides = [1, 1]} : vector<8x96xf32> to vector<8x32xf32>
    %711 = arith.addf %709, %710 : vector<8x32xf32>
    %712 = arith.negf %711 : vector<8x32xf32>
    %713 = math.exp %712 : vector<8x32xf32>
    %cst_222 = arith.constant 1.000000e+00 : f32
    %714 = vector.broadcast %cst_222 : f32 to vector<8x32xf32>
    %715 = arith.addf %714, %713 : vector<8x32xf32>
    %716 = arith.divf %714, %715 : vector<8x32xf32>
    %717 = vector.extract_strided_slice %511 {offsets = [0, 64], sizes = [8, 32], strides = [1, 1]} : vector<8x96xf32> to vector<8x32xf32>
    %718 = vector.extract_strided_slice %700 {offsets = [0, 64], sizes = [8, 32], strides = [1, 1]} : vector<8x96xf32> to vector<8x32xf32>
    %719 = arith.addf %718, %515 : vector<8x32xf32>
    %720 = arith.mulf %708, %719 : vector<8x32xf32>
    %721 = arith.addf %717, %720 : vector<8x32xf32>
    %722 = math.tanh %721 : vector<8x32xf32>
    %cst_223 = arith.constant 1.000000e+00 : f32
    %723 = vector.broadcast %cst_223 : f32 to vector<8x32xf32>
    %724 = arith.subf %723, %716 : vector<8x32xf32>
    %725 = arith.mulf %724, %722 : vector<8x32xf32>
    %726 = arith.mulf %716, %693 : vector<8x32xf32>
    %727 = arith.addf %725, %726 : vector<8x32xf32>
    %c40_224 = arith.constant 40 : index
    %c0_225 = arith.constant 0 : index
    %728 = vector.load %arg29[%c40_224, %c0_225] : memref<64x32xf32, #tpu.memory_space<vmem>>, vector<8x32xf32>
    tpu.vector_store %arg29[%c40_224, %c0_225], %727 {strides = array<i32>} : memref<64x32xf32, #tpu.memory_space<vmem>>, vector<8x32xf32>,
    %c0_226 = arith.constant 0 : index
    %c0_227 = arith.constant 0 : index
    %729 = vector.load %arg30[%c0_226, %c0_227] : memref<8x256xf32, #tpu.memory_space<vmem>>, vector<8x256xf32>
    %c160 = arith.constant 160 : index
    %c0_228 = arith.constant 0 : index
    %730 = vector.load %arg24[%c160, %c0_228] : memref<256x256xf32, #tpu.memory_space<vmem>>, vector<32x256xf32>
    %cst_229 = arith.constant dense<0.000000e+00> : vector<8x256xf32>
    %731 = tpu.matmul %727, %730, %cst_229 {dimension_numbers = #tpu.dot_dimension_numbers<[1], [0], [0], [1], [0, 0, 1, 1], [], []>} : vector<8x32xf32>, vector<32x256xf32>, vector<8x256xf32> -> vector<8x256xf32>
    %732 = arith.addf %729, %731 : vector<8x256xf32>
    %c0_230 = arith.constant 0 : index
    %c0_231 = arith.constant 0 : index
    %733 = vector.load %arg30[%c0_230, %c0_231] : memref<8x256xf32, #tpu.memory_space<vmem>>, vector<8x256xf32>
    tpu.vector_store %arg30[%c0_230, %c0_231], %732 {strides = array<i32>} : memref<8x256xf32, #tpu.memory_space<vmem>>, vector<8x256xf32>,
    %cst_232 = arith.constant dense<0.000000e+00> : vector<8x96xf32>
    %734 = tpu.matmul %727, %512, %cst_232 {dimension_numbers = #tpu.dot_dimension_numbers<[1], [0], [0], [1], [0, 0, 1, 1], [], []>} : vector<8x32xf32>, vector<32x96xf32>, vector<8x96xf32> -> vector<8x96xf32>
    %735 = vector.extract_strided_slice %511 {offsets = [0, 0], sizes = [8, 32], strides = [1, 1]} : vector<8x96xf32> to vector<8x32xf32>
    %736 = vector.extract_strided_slice %734 {offsets = [0, 0], sizes = [8, 32], strides = [1, 1]} : vector<8x96xf32> to vector<8x32xf32>
    %737 = arith.addf %735, %736 : vector<8x32xf32>
    %738 = arith.negf %737 : vector<8x32xf32>
    %739 = math.exp %738 : vector<8x32xf32>
    %cst_233 = arith.constant 1.000000e+00 : f32
    %740 = vector.broadcast %cst_233 : f32 to vector<8x32xf32>
    %741 = arith.addf %740, %739 : vector<8x32xf32>
    %742 = arith.divf %740, %741 : vector<8x32xf32>
    %743 = vector.extract_strided_slice %511 {offsets = [0, 32], sizes = [8, 32], strides = [1, 1]} : vector<8x96xf32> to vector<8x32xf32>
    %744 = vector.extract_strided_slice %734 {offsets = [0, 32], sizes = [8, 32], strides = [1, 1]} : vector<8x96xf32> to vector<8x32xf32>
    %745 = arith.addf %743, %744 : vector<8x32xf32>
    %746 = arith.negf %745 : vector<8x32xf32>
    %747 = math.exp %746 : vector<8x32xf32>
    %cst_234 = arith.constant 1.000000e+00 : f32
    %748 = vector.broadcast %cst_234 : f32 to vector<8x32xf32>
    %749 = arith.addf %748, %747 : vector<8x32xf32>
    %750 = arith.divf %748, %749 : vector<8x32xf32>
    %751 = vector.extract_strided_slice %511 {offsets = [0, 64], sizes = [8, 32], strides = [1, 1]} : vector<8x96xf32> to vector<8x32xf32>
    %752 = vector.extract_strided_slice %734 {offsets = [0, 64], sizes = [8, 32], strides = [1, 1]} : vector<8x96xf32> to vector<8x32xf32>
    %753 = arith.addf %752, %515 : vector<8x32xf32>
    %754 = arith.mulf %742, %753 : vector<8x32xf32>
    %755 = arith.addf %751, %754 : vector<8x32xf32>
    %756 = math.tanh %755 : vector<8x32xf32>
    %cst_235 = arith.constant 1.000000e+00 : f32
    %757 = vector.broadcast %cst_235 : f32 to vector<8x32xf32>
    %758 = arith.subf %757, %750 : vector<8x32xf32>
    %759 = arith.mulf %758, %756 : vector<8x32xf32>
    %760 = arith.mulf %750, %727 : vector<8x32xf32>
    %761 = arith.addf %759, %760 : vector<8x32xf32>
    %c48_236 = arith.constant 48 : index
    %c0_237 = arith.constant 0 : index
    %762 = vector.load %arg29[%c48_236, %c0_237] : memref<64x32xf32, #tpu.memory_space<vmem>>, vector<8x32xf32>
    tpu.vector_store %arg29[%c48_236, %c0_237], %761 {strides = array<i32>} : memref<64x32xf32, #tpu.memory_space<vmem>>, vector<8x32xf32>,
    %c0_238 = arith.constant 0 : index
    %c0_239 = arith.constant 0 : index
    %763 = vector.load %arg30[%c0_238, %c0_239] : memref<8x256xf32, #tpu.memory_space<vmem>>, vector<8x256xf32>
    %c192 = arith.constant 192 : index
    %c0_240 = arith.constant 0 : index
    %764 = vector.load %arg24[%c192, %c0_240] : memref<256x256xf32, #tpu.memory_space<vmem>>, vector<32x256xf32>
    %cst_241 = arith.constant dense<0.000000e+00> : vector<8x256xf32>
    %765 = tpu.matmul %761, %764, %cst_241 {dimension_numbers = #tpu.dot_dimension_numbers<[1], [0], [0], [1], [0, 0, 1, 1], [], []>} : vector<8x32xf32>, vector<32x256xf32>, vector<8x256xf32> -> vector<8x256xf32>
    %766 = arith.addf %763, %765 : vector<8x256xf32>
    %c0_242 = arith.constant 0 : index
    %c0_243 = arith.constant 0 : index
    %767 = vector.load %arg30[%c0_242, %c0_243] : memref<8x256xf32, #tpu.memory_space<vmem>>, vector<8x256xf32>
    tpu.vector_store %arg30[%c0_242, %c0_243], %766 {strides = array<i32>} : memref<8x256xf32, #tpu.memory_space<vmem>>, vector<8x256xf32>,
    %cst_244 = arith.constant dense<0.000000e+00> : vector<8x96xf32>
    %768 = tpu.matmul %761, %512, %cst_244 {dimension_numbers = #tpu.dot_dimension_numbers<[1], [0], [0], [1], [0, 0, 1, 1], [], []>} : vector<8x32xf32>, vector<32x96xf32>, vector<8x96xf32> -> vector<8x96xf32>
    %769 = vector.extract_strided_slice %511 {offsets = [0, 0], sizes = [8, 32], strides = [1, 1]} : vector<8x96xf32> to vector<8x32xf32>
    %770 = vector.extract_strided_slice %768 {offsets = [0, 0], sizes = [8, 32], strides = [1, 1]} : vector<8x96xf32> to vector<8x32xf32>
    %771 = arith.addf %769, %770 : vector<8x32xf32>
    %772 = arith.negf %771 : vector<8x32xf32>
    %773 = math.exp %772 : vector<8x32xf32>
    %cst_245 = arith.constant 1.000000e+00 : f32
    %774 = vector.broadcast %cst_245 : f32 to vector<8x32xf32>
    %775 = arith.addf %774, %773 : vector<8x32xf32>
    %776 = arith.divf %774, %775 : vector<8x32xf32>
    %777 = vector.extract_strided_slice %511 {offsets = [0, 32], sizes = [8, 32], strides = [1, 1]} : vector<8x96xf32> to vector<8x32xf32>
    %778 = vector.extract_strided_slice %768 {offsets = [0, 32], sizes = [8, 32], strides = [1, 1]} : vector<8x96xf32> to vector<8x32xf32>
    %779 = arith.addf %777, %778 : vector<8x32xf32>
    %780 = arith.negf %779 : vector<8x32xf32>
    %781 = math.exp %780 : vector<8x32xf32>
    %cst_246 = arith.constant 1.000000e+00 : f32
    %782 = vector.broadcast %cst_246 : f32 to vector<8x32xf32>
    %783 = arith.addf %782, %781 : vector<8x32xf32>
    %784 = arith.divf %782, %783 : vector<8x32xf32>
    %785 = vector.extract_strided_slice %511 {offsets = [0, 64], sizes = [8, 32], strides = [1, 1]} : vector<8x96xf32> to vector<8x32xf32>
    %786 = vector.extract_strided_slice %768 {offsets = [0, 64], sizes = [8, 32], strides = [1, 1]} : vector<8x96xf32> to vector<8x32xf32>
    %787 = arith.addf %786, %515 : vector<8x32xf32>
    %788 = arith.mulf %776, %787 : vector<8x32xf32>
    %789 = arith.addf %785, %788 : vector<8x32xf32>
    %790 = math.tanh %789 : vector<8x32xf32>
    %cst_247 = arith.constant 1.000000e+00 : f32
    %791 = vector.broadcast %cst_247 : f32 to vector<8x32xf32>
    %792 = arith.subf %791, %784 : vector<8x32xf32>
    %793 = arith.mulf %792, %790 : vector<8x32xf32>
    %794 = arith.mulf %784, %761 : vector<8x32xf32>
    %795 = arith.addf %793, %794 : vector<8x32xf32>
    %c56_248 = arith.constant 56 : index
    %c0_249 = arith.constant 0 : index
    %796 = vector.load %arg29[%c56_248, %c0_249] : memref<64x32xf32, #tpu.memory_space<vmem>>, vector<8x32xf32>
    tpu.vector_store %arg29[%c56_248, %c0_249], %795 {strides = array<i32>} : memref<64x32xf32, #tpu.memory_space<vmem>>, vector<8x32xf32>,
    %c0_250 = arith.constant 0 : index
    %c0_251 = arith.constant 0 : index
    %797 = vector.load %arg30[%c0_250, %c0_251] : memref<8x256xf32, #tpu.memory_space<vmem>>, vector<8x256xf32>
    %c224 = arith.constant 224 : index
    %c0_252 = arith.constant 0 : index
    %798 = vector.load %arg24[%c224, %c0_252] : memref<256x256xf32, #tpu.memory_space<vmem>>, vector<32x256xf32>
    %cst_253 = arith.constant dense<0.000000e+00> : vector<8x256xf32>
    %799 = tpu.matmul %795, %798, %cst_253 {dimension_numbers = #tpu.dot_dimension_numbers<[1], [0], [0], [1], [0, 0, 1, 1], [], []>} : vector<8x32xf32>, vector<32x256xf32>, vector<8x256xf32> -> vector<8x256xf32>
    %800 = arith.addf %797, %799 : vector<8x256xf32>
    %c0_254 = arith.constant 0 : index
    %c0_255 = arith.constant 0 : index
    %801 = vector.load %arg30[%c0_254, %c0_255] : memref<8x256xf32, #tpu.memory_space<vmem>>, vector<8x256xf32>
    tpu.vector_store %arg30[%c0_254, %c0_255], %800 {strides = array<i32>} : memref<8x256xf32, #tpu.memory_space<vmem>>, vector<8x256xf32>,
    %c0_256 = arith.constant 0 : index
    %c0_257 = arith.constant 0 : index
    %802 = vector.load %arg29[%c0_256, %c0_257] : memref<64x32xf32, #tpu.memory_space<vmem>>, vector<64x32xf32>
    %c0_258 = arith.constant 0 : index
    %c0_259 = arith.constant 0 : index
    %803 = vector.load %arg16[%c0_258, %c0_259] : memref<32x96xf32, #tpu.memory_space<vmem>>, vector<32x96xf32>
    %cst_260 = arith.constant dense<0.000000e+00> : vector<64x96xf32>
    %804 = tpu.matmul %802, %803, %cst_260 {dimension_numbers = #tpu.dot_dimension_numbers<[1], [0], [0], [1], [0, 0, 1, 1], [], []>} : vector<64x32xf32>, vector<32x96xf32>, vector<64x96xf32> -> vector<64x96xf32>
    %c0_261 = arith.constant 0 : index
    %c0_262 = arith.constant 0 : index
    %805 = vector.load %arg18[%c0_261, %c0_262] : memref<1x96xf32, #tpu.memory_space<vmem>>, vector<1x96xf32>
    %806 = vector.broadcast %805 : vector<1x96xf32> to vector<64x96xf32>
    %807 = arith.addf %804, %806 : vector<64x96xf32>
    %c0_263 = arith.constant 0 : index
    %c0_264 = arith.constant 0 : index
    %808 = vector.load %arg28[%c0_263, %c0_264] : memref<64x96xf32, #tpu.memory_space<vmem>>, vector<64x96xf32>
    tpu.vector_store %arg28[%c0_263, %c0_264], %807 {strides = array<i32>} : memref<64x96xf32, #tpu.memory_space<vmem>>, vector<64x96xf32>,
    %c0_265 = arith.constant 0 : index
    %c0_266 = arith.constant 0 : index
    %809 = vector.load %arg17[%c0_265, %c0_266] : memref<32x96xf32, #tpu.memory_space<vmem>>, vector<32x96xf32>
    %c0_267 = arith.constant 0 : index
    %c0_268 = arith.constant 0 : index
    %810 = vector.load %arg19[%c0_267, %c0_268] : memref<1x32xf32, #tpu.memory_space<vmem>>, vector<1x32xf32>
    %811 = vector.shape_cast %810 : vector<1x32xf32> to vector<1x32xf32>
    %812 = vector.broadcast %811 : vector<1x32xf32> to vector<8x32xf32>
    %c0_269 = arith.constant 0 : index
    %c0_270 = arith.constant 0 : index
    %813 = vector.load %arg22[%c0_269, %c0_270] : memref<32x32xf32, #tpu.memory_space<vmem>>, vector<32x32xf32>
    %cst_271 = arith.constant dense<0.000000e+00> : vector<8x32xf32>
    %814 = tpu.matmul %795, %813, %cst_271 {dimension_numbers = #tpu.dot_dimension_numbers<[1], [0], [0], [1], [0, 0, 1, 1], [], []>} : vector<8x32xf32>, vector<32x32xf32>, vector<8x32xf32> -> vector<8x32xf32>
    %c0_272 = arith.constant 0 : index
    %c0_273 = arith.constant 0 : index
    %815 = vector.load %arg23[%c0_272, %c0_273] : memref<1x32xf32, #tpu.memory_space<vmem>>, vector<1x32xf32>
    %816 = vector.broadcast %815 : vector<1x32xf32> to vector<8x32xf32>
    %817 = arith.addf %814, %816 : vector<8x32xf32>
    %cst_274 = arith.constant 0.000000e+00 : f32
    %818 = vector.broadcast %cst_274 : f32 to vector<8x32xf32>
    %819 = arith.cmpf ogt, %817, %818 : vector<8x32xf32>
    %cst_275 = arith.constant 2.000000e-01 : f32
    %820 = vector.broadcast %cst_275 : f32 to vector<8x32xf32>
    %821 = arith.mulf %820, %817 : vector<8x32xf32>
    %822 = arith.select %819, %817, %821 : vector<8x32xi1>, vector<8x32xf32>
    %c0_276 = arith.constant 0 : index
    %c0_277 = arith.constant 0 : index
    %823 = vector.load %arg28[%c0_276, %c0_277] : memref<64x96xf32, #tpu.memory_space<vmem>>, vector<8x96xf32>
    %cst_278 = arith.constant dense<0.000000e+00> : vector<8x96xf32>
    %824 = tpu.matmul %822, %809, %cst_278 {dimension_numbers = #tpu.dot_dimension_numbers<[1], [0], [0], [1], [0, 0, 1, 1], [], []>} : vector<8x32xf32>, vector<32x96xf32>, vector<8x96xf32> -> vector<8x96xf32>
    %825 = vector.extract_strided_slice %823 {offsets = [0, 0], sizes = [8, 32], strides = [1, 1]} : vector<8x96xf32> to vector<8x32xf32>
    %826 = vector.extract_strided_slice %824 {offsets = [0, 0], sizes = [8, 32], strides = [1, 1]} : vector<8x96xf32> to vector<8x32xf32>
    %827 = arith.addf %825, %826 : vector<8x32xf32>
    %828 = arith.negf %827 : vector<8x32xf32>
    %829 = math.exp %828 : vector<8x32xf32>
    %cst_279 = arith.constant 1.000000e+00 : f32
    %830 = vector.broadcast %cst_279 : f32 to vector<8x32xf32>
    %831 = arith.addf %830, %829 : vector<8x32xf32>
    %832 = arith.divf %830, %831 : vector<8x32xf32>
    %833 = vector.extract_strided_slice %823 {offsets = [0, 32], sizes = [8, 32], strides = [1, 1]} : vector<8x96xf32> to vector<8x32xf32>
    %834 = vector.extract_strided_slice %824 {offsets = [0, 32], sizes = [8, 32], strides = [1, 1]} : vector<8x96xf32> to vector<8x32xf32>
    %835 = arith.addf %833, %834 : vector<8x32xf32>
    %836 = arith.negf %835 : vector<8x32xf32>
    %837 = math.exp %836 : vector<8x32xf32>
    %cst_280 = arith.constant 1.000000e+00 : f32
    %838 = vector.broadcast %cst_280 : f32 to vector<8x32xf32>
    %839 = arith.addf %838, %837 : vector<8x32xf32>
    %840 = arith.divf %838, %839 : vector<8x32xf32>
    %841 = vector.extract_strided_slice %823 {offsets = [0, 64], sizes = [8, 32], strides = [1, 1]} : vector<8x96xf32> to vector<8x32xf32>
    %842 = vector.extract_strided_slice %824 {offsets = [0, 64], sizes = [8, 32], strides = [1, 1]} : vector<8x96xf32> to vector<8x32xf32>
    %843 = arith.addf %842, %812 : vector<8x32xf32>
    %844 = arith.mulf %832, %843 : vector<8x32xf32>
    %845 = arith.addf %841, %844 : vector<8x32xf32>
    %846 = math.tanh %845 : vector<8x32xf32>
    %cst_281 = arith.constant 1.000000e+00 : f32
    %847 = vector.broadcast %cst_281 : f32 to vector<8x32xf32>
    %848 = arith.subf %847, %840 : vector<8x32xf32>
    %849 = arith.mulf %848, %846 : vector<8x32xf32>
    %850 = arith.mulf %840, %822 : vector<8x32xf32>
    %851 = arith.addf %849, %850 : vector<8x32xf32>
    %c0_282 = arith.constant 0 : index
    %c0_283 = arith.constant 0 : index
    %852 = vector.load %arg30[%c0_282, %c0_283] : memref<8x256xf32, #tpu.memory_space<vmem>>, vector<8x32xf32>
    %853 = arith.addf %852, %851 : vector<8x32xf32>
    %c0_284 = arith.constant 0 : index
    %c0_285 = arith.constant 0 : index
    %854 = vector.load %arg30[%c0_284, %c0_285] : memref<8x256xf32, #tpu.memory_space<vmem>>, vector<8x32xf32>
    tpu.vector_store %arg30[%c0_284, %c0_285], %853 {strides = array<i32>} : memref<8x256xf32, #tpu.memory_space<vmem>>, vector<8x32xf32>,
    %c8_286 = arith.constant 8 : index
    %c0_287 = arith.constant 0 : index
    %855 = vector.load %arg28[%c8_286, %c0_287] : memref<64x96xf32, #tpu.memory_space<vmem>>, vector<8x96xf32>
    %cst_288 = arith.constant dense<0.000000e+00> : vector<8x96xf32>
    %856 = tpu.matmul %851, %809, %cst_288 {dimension_numbers = #tpu.dot_dimension_numbers<[1], [0], [0], [1], [0, 0, 1, 1], [], []>} : vector<8x32xf32>, vector<32x96xf32>, vector<8x96xf32> -> vector<8x96xf32>
    %857 = vector.extract_strided_slice %855 {offsets = [0, 0], sizes = [8, 32], strides = [1, 1]} : vector<8x96xf32> to vector<8x32xf32>
    %858 = vector.extract_strided_slice %856 {offsets = [0, 0], sizes = [8, 32], strides = [1, 1]} : vector<8x96xf32> to vector<8x32xf32>
    %859 = arith.addf %857, %858 : vector<8x32xf32>
    %860 = arith.negf %859 : vector<8x32xf32>
    %861 = math.exp %860 : vector<8x32xf32>
    %cst_289 = arith.constant 1.000000e+00 : f32
    %862 = vector.broadcast %cst_289 : f32 to vector<8x32xf32>
    %863 = arith.addf %862, %861 : vector<8x32xf32>
    %864 = arith.divf %862, %863 : vector<8x32xf32>
    %865 = vector.extract_strided_slice %855 {offsets = [0, 32], sizes = [8, 32], strides = [1, 1]} : vector<8x96xf32> to vector<8x32xf32>
    %866 = vector.extract_strided_slice %856 {offsets = [0, 32], sizes = [8, 32], strides = [1, 1]} : vector<8x96xf32> to vector<8x32xf32>
    %867 = arith.addf %865, %866 : vector<8x32xf32>
    %868 = arith.negf %867 : vector<8x32xf32>
    %869 = math.exp %868 : vector<8x32xf32>
    %cst_290 = arith.constant 1.000000e+00 : f32
    %870 = vector.broadcast %cst_290 : f32 to vector<8x32xf32>
    %871 = arith.addf %870, %869 : vector<8x32xf32>
    %872 = arith.divf %870, %871 : vector<8x32xf32>
    %873 = vector.extract_strided_slice %855 {offsets = [0, 64], sizes = [8, 32], strides = [1, 1]} : vector<8x96xf32> to vector<8x32xf32>
    %874 = vector.extract_strided_slice %856 {offsets = [0, 64], sizes = [8, 32], strides = [1, 1]} : vector<8x96xf32> to vector<8x32xf32>
    %875 = arith.addf %874, %812 : vector<8x32xf32>
    %876 = arith.mulf %864, %875 : vector<8x32xf32>
    %877 = arith.addf %873, %876 : vector<8x32xf32>
    %878 = math.tanh %877 : vector<8x32xf32>
    %cst_291 = arith.constant 1.000000e+00 : f32
    %879 = vector.broadcast %cst_291 : f32 to vector<8x32xf32>
    %880 = arith.subf %879, %872 : vector<8x32xf32>
    %881 = arith.mulf %880, %878 : vector<8x32xf32>
    %882 = arith.mulf %872, %851 : vector<8x32xf32>
    %883 = arith.addf %881, %882 : vector<8x32xf32>
    %c0_292 = arith.constant 0 : index
    %c32_293 = arith.constant 32 : index
    %884 = vector.load %arg30[%c0_292, %c32_293] : memref<8x256xf32, #tpu.memory_space<vmem>>, vector<8x32xf32>
    %885 = arith.addf %884, %883 : vector<8x32xf32>
    %c0_294 = arith.constant 0 : index
    %c32_295 = arith.constant 32 : index
    %886 = vector.load %arg30[%c0_294, %c32_295] : memref<8x256xf32, #tpu.memory_space<vmem>>, vector<8x32xf32>
    tpu.vector_store %arg30[%c0_294, %c32_295], %885 {strides = array<i32>} : memref<8x256xf32, #tpu.memory_space<vmem>>, vector<8x32xf32>,
    %c16_296 = arith.constant 16 : index
    %c0_297 = arith.constant 0 : index
    %887 = vector.load %arg28[%c16_296, %c0_297] : memref<64x96xf32, #tpu.memory_space<vmem>>, vector<8x96xf32>
    %cst_298 = arith.constant dense<0.000000e+00> : vector<8x96xf32>
    %888 = tpu.matmul %883, %809, %cst_298 {dimension_numbers = #tpu.dot_dimension_numbers<[1], [0], [0], [1], [0, 0, 1, 1], [], []>} : vector<8x32xf32>, vector<32x96xf32>, vector<8x96xf32> -> vector<8x96xf32>
    %889 = vector.extract_strided_slice %887 {offsets = [0, 0], sizes = [8, 32], strides = [1, 1]} : vector<8x96xf32> to vector<8x32xf32>
    %890 = vector.extract_strided_slice %888 {offsets = [0, 0], sizes = [8, 32], strides = [1, 1]} : vector<8x96xf32> to vector<8x32xf32>
    %891 = arith.addf %889, %890 : vector<8x32xf32>
    %892 = arith.negf %891 : vector<8x32xf32>
    %893 = math.exp %892 : vector<8x32xf32>
    %cst_299 = arith.constant 1.000000e+00 : f32
    %894 = vector.broadcast %cst_299 : f32 to vector<8x32xf32>
    %895 = arith.addf %894, %893 : vector<8x32xf32>
    %896 = arith.divf %894, %895 : vector<8x32xf32>
    %897 = vector.extract_strided_slice %887 {offsets = [0, 32], sizes = [8, 32], strides = [1, 1]} : vector<8x96xf32> to vector<8x32xf32>
    %898 = vector.extract_strided_slice %888 {offsets = [0, 32], sizes = [8, 32], strides = [1, 1]} : vector<8x96xf32> to vector<8x32xf32>
    %899 = arith.addf %897, %898 : vector<8x32xf32>
    %900 = arith.negf %899 : vector<8x32xf32>
    %901 = math.exp %900 : vector<8x32xf32>
    %cst_300 = arith.constant 1.000000e+00 : f32
    %902 = vector.broadcast %cst_300 : f32 to vector<8x32xf32>
    %903 = arith.addf %902, %901 : vector<8x32xf32>
    %904 = arith.divf %902, %903 : vector<8x32xf32>
    %905 = vector.extract_strided_slice %887 {offsets = [0, 64], sizes = [8, 32], strides = [1, 1]} : vector<8x96xf32> to vector<8x32xf32>
    %906 = vector.extract_strided_slice %888 {offsets = [0, 64], sizes = [8, 32], strides = [1, 1]} : vector<8x96xf32> to vector<8x32xf32>
    %907 = arith.addf %906, %812 : vector<8x32xf32>
    %908 = arith.mulf %896, %907 : vector<8x32xf32>
    %909 = arith.addf %905, %908 : vector<8x32xf32>
    %910 = math.tanh %909 : vector<8x32xf32>
    %cst_301 = arith.constant 1.000000e+00 : f32
    %911 = vector.broadcast %cst_301 : f32 to vector<8x32xf32>
    %912 = arith.subf %911, %904 : vector<8x32xf32>
    %913 = arith.mulf %912, %910 : vector<8x32xf32>
    %914 = arith.mulf %904, %883 : vector<8x32xf32>
    %915 = arith.addf %913, %914 : vector<8x32xf32>
    %c0_302 = arith.constant 0 : index
    %c64_303 = arith.constant 64 : index
    %916 = vector.load %arg30[%c0_302, %c64_303] : memref<8x256xf32, #tpu.memory_space<vmem>>, vector<8x32xf32>
    %917 = arith.addf %916, %915 : vector<8x32xf32>
    %c0_304 = arith.constant 0 : index
    %c64_305 = arith.constant 64 : index
    %918 = vector.load %arg30[%c0_304, %c64_305] : memref<8x256xf32, #tpu.memory_space<vmem>>, vector<8x32xf32>
    tpu.vector_store %arg30[%c0_304, %c64_305], %917 {strides = array<i32>} : memref<8x256xf32, #tpu.memory_space<vmem>>, vector<8x32xf32>,
    %c24_306 = arith.constant 24 : index
    %c0_307 = arith.constant 0 : index
    %919 = vector.load %arg28[%c24_306, %c0_307] : memref<64x96xf32, #tpu.memory_space<vmem>>, vector<8x96xf32>
    %cst_308 = arith.constant dense<0.000000e+00> : vector<8x96xf32>
    %920 = tpu.matmul %915, %809, %cst_308 {dimension_numbers = #tpu.dot_dimension_numbers<[1], [0], [0], [1], [0, 0, 1, 1], [], []>} : vector<8x32xf32>, vector<32x96xf32>, vector<8x96xf32> -> vector<8x96xf32>
    %921 = vector.extract_strided_slice %919 {offsets = [0, 0], sizes = [8, 32], strides = [1, 1]} : vector<8x96xf32> to vector<8x32xf32>
    %922 = vector.extract_strided_slice %920 {offsets = [0, 0], sizes = [8, 32], strides = [1, 1]} : vector<8x96xf32> to vector<8x32xf32>
    %923 = arith.addf %921, %922 : vector<8x32xf32>
    %924 = arith.negf %923 : vector<8x32xf32>
    %925 = math.exp %924 : vector<8x32xf32>
    %cst_309 = arith.constant 1.000000e+00 : f32
    %926 = vector.broadcast %cst_309 : f32 to vector<8x32xf32>
    %927 = arith.addf %926, %925 : vector<8x32xf32>
    %928 = arith.divf %926, %927 : vector<8x32xf32>
    %929 = vector.extract_strided_slice %919 {offsets = [0, 32], sizes = [8, 32], strides = [1, 1]} : vector<8x96xf32> to vector<8x32xf32>
    %930 = vector.extract_strided_slice %920 {offsets = [0, 32], sizes = [8, 32], strides = [1, 1]} : vector<8x96xf32> to vector<8x32xf32>
    %931 = arith.addf %929, %930 : vector<8x32xf32>
    %932 = arith.negf %931 : vector<8x32xf32>
    %933 = math.exp %932 : vector<8x32xf32>
    %cst_310 = arith.constant 1.000000e+00 : f32
    %934 = vector.broadcast %cst_310 : f32 to vector<8x32xf32>
    %935 = arith.addf %934, %933 : vector<8x32xf32>
    %936 = arith.divf %934, %935 : vector<8x32xf32>
    %937 = vector.extract_strided_slice %919 {offsets = [0, 64], sizes = [8, 32], strides = [1, 1]} : vector<8x96xf32> to vector<8x32xf32>
    %938 = vector.extract_strided_slice %920 {offsets = [0, 64], sizes = [8, 32], strides = [1, 1]} : vector<8x96xf32> to vector<8x32xf32>
    %939 = arith.addf %938, %812 : vector<8x32xf32>
    %940 = arith.mulf %928, %939 : vector<8x32xf32>
    %941 = arith.addf %937, %940 : vector<8x32xf32>
    %942 = math.tanh %941 : vector<8x32xf32>
    %cst_311 = arith.constant 1.000000e+00 : f32
    %943 = vector.broadcast %cst_311 : f32 to vector<8x32xf32>
    %944 = arith.subf %943, %936 : vector<8x32xf32>
    %945 = arith.mulf %944, %942 : vector<8x32xf32>
    %946 = arith.mulf %936, %915 : vector<8x32xf32>
    %947 = arith.addf %945, %946 : vector<8x32xf32>
    %c0_312 = arith.constant 0 : index
    %c96_313 = arith.constant 96 : index
    %948 = vector.load %arg30[%c0_312, %c96_313] : memref<8x256xf32, #tpu.memory_space<vmem>>, vector<8x32xf32>
    %949 = arith.addf %948, %947 : vector<8x32xf32>
    %c0_314 = arith.constant 0 : index
    %c96_315 = arith.constant 96 : index
    %950 = vector.load %arg30[%c0_314, %c96_315] : memref<8x256xf32, #tpu.memory_space<vmem>>, vector<8x32xf32>
    tpu.vector_store %arg30[%c0_314, %c96_315], %949 {strides = array<i32>} : memref<8x256xf32, #tpu.memory_space<vmem>>, vector<8x32xf32>,
    %c32_316 = arith.constant 32 : index
    %c0_317 = arith.constant 0 : index
    %951 = vector.load %arg28[%c32_316, %c0_317] : memref<64x96xf32, #tpu.memory_space<vmem>>, vector<8x96xf32>
    %cst_318 = arith.constant dense<0.000000e+00> : vector<8x96xf32>
    %952 = tpu.matmul %947, %809, %cst_318 {dimension_numbers = #tpu.dot_dimension_numbers<[1], [0], [0], [1], [0, 0, 1, 1], [], []>} : vector<8x32xf32>, vector<32x96xf32>, vector<8x96xf32> -> vector<8x96xf32>
    %953 = vector.extract_strided_slice %951 {offsets = [0, 0], sizes = [8, 32], strides = [1, 1]} : vector<8x96xf32> to vector<8x32xf32>
    %954 = vector.extract_strided_slice %952 {offsets = [0, 0], sizes = [8, 32], strides = [1, 1]} : vector<8x96xf32> to vector<8x32xf32>
    %955 = arith.addf %953, %954 : vector<8x32xf32>
    %956 = arith.negf %955 : vector<8x32xf32>
    %957 = math.exp %956 : vector<8x32xf32>
    %cst_319 = arith.constant 1.000000e+00 : f32
    %958 = vector.broadcast %cst_319 : f32 to vector<8x32xf32>
    %959 = arith.addf %958, %957 : vector<8x32xf32>
    %960 = arith.divf %958, %959 : vector<8x32xf32>
    %961 = vector.extract_strided_slice %951 {offsets = [0, 32], sizes = [8, 32], strides = [1, 1]} : vector<8x96xf32> to vector<8x32xf32>
    %962 = vector.extract_strided_slice %952 {offsets = [0, 32], sizes = [8, 32], strides = [1, 1]} : vector<8x96xf32> to vector<8x32xf32>
    %963 = arith.addf %961, %962 : vector<8x32xf32>
    %964 = arith.negf %963 : vector<8x32xf32>
    %965 = math.exp %964 : vector<8x32xf32>
    %cst_320 = arith.constant 1.000000e+00 : f32
    %966 = vector.broadcast %cst_320 : f32 to vector<8x32xf32>
    %967 = arith.addf %966, %965 : vector<8x32xf32>
    %968 = arith.divf %966, %967 : vector<8x32xf32>
    %969 = vector.extract_strided_slice %951 {offsets = [0, 64], sizes = [8, 32], strides = [1, 1]} : vector<8x96xf32> to vector<8x32xf32>
    %970 = vector.extract_strided_slice %952 {offsets = [0, 64], sizes = [8, 32], strides = [1, 1]} : vector<8x96xf32> to vector<8x32xf32>
    %971 = arith.addf %970, %812 : vector<8x32xf32>
    %972 = arith.mulf %960, %971 : vector<8x32xf32>
    %973 = arith.addf %969, %972 : vector<8x32xf32>
    %974 = math.tanh %973 : vector<8x32xf32>
    %cst_321 = arith.constant 1.000000e+00 : f32
    %975 = vector.broadcast %cst_321 : f32 to vector<8x32xf32>
    %976 = arith.subf %975, %968 : vector<8x32xf32>
    %977 = arith.mulf %976, %974 : vector<8x32xf32>
    %978 = arith.mulf %968, %947 : vector<8x32xf32>
    %979 = arith.addf %977, %978 : vector<8x32xf32>
    %c0_322 = arith.constant 0 : index
    %c128_323 = arith.constant 128 : index
    %980 = vector.load %arg30[%c0_322, %c128_323] : memref<8x256xf32, #tpu.memory_space<vmem>>, vector<8x32xf32>
    %981 = arith.addf %980, %979 : vector<8x32xf32>
    %c0_324 = arith.constant 0 : index
    %c128_325 = arith.constant 128 : index
    %982 = vector.load %arg30[%c0_324, %c128_325] : memref<8x256xf32, #tpu.memory_space<vmem>>, vector<8x32xf32>
    tpu.vector_store %arg30[%c0_324, %c128_325], %981 {strides = array<i32>} : memref<8x256xf32, #tpu.memory_space<vmem>>, vector<8x32xf32>,
    %c40_326 = arith.constant 40 : index
    %c0_327 = arith.constant 0 : index
    %983 = vector.load %arg28[%c40_326, %c0_327] : memref<64x96xf32, #tpu.memory_space<vmem>>, vector<8x96xf32>
    %cst_328 = arith.constant dense<0.000000e+00> : vector<8x96xf32>
    %984 = tpu.matmul %979, %809, %cst_328 {dimension_numbers = #tpu.dot_dimension_numbers<[1], [0], [0], [1], [0, 0, 1, 1], [], []>} : vector<8x32xf32>, vector<32x96xf32>, vector<8x96xf32> -> vector<8x96xf32>
    %985 = vector.extract_strided_slice %983 {offsets = [0, 0], sizes = [8, 32], strides = [1, 1]} : vector<8x96xf32> to vector<8x32xf32>
    %986 = vector.extract_strided_slice %984 {offsets = [0, 0], sizes = [8, 32], strides = [1, 1]} : vector<8x96xf32> to vector<8x32xf32>
    %987 = arith.addf %985, %986 : vector<8x32xf32>
    %988 = arith.negf %987 : vector<8x32xf32>
    %989 = math.exp %988 : vector<8x32xf32>
    %cst_329 = arith.constant 1.000000e+00 : f32
    %990 = vector.broadcast %cst_329 : f32 to vector<8x32xf32>
    %991 = arith.addf %990, %989 : vector<8x32xf32>
    %992 = arith.divf %990, %991 : vector<8x32xf32>
    %993 = vector.extract_strided_slice %983 {offsets = [0, 32], sizes = [8, 32], strides = [1, 1]} : vector<8x96xf32> to vector<8x32xf32>
    %994 = vector.extract_strided_slice %984 {offsets = [0, 32], sizes = [8, 32], strides = [1, 1]} : vector<8x96xf32> to vector<8x32xf32>
    %995 = arith.addf %993, %994 : vector<8x32xf32>
    %996 = arith.negf %995 : vector<8x32xf32>
    %997 = math.exp %996 : vector<8x32xf32>
    %cst_330 = arith.constant 1.000000e+00 : f32
    %998 = vector.broadcast %cst_330 : f32 to vector<8x32xf32>
    %999 = arith.addf %998, %997 : vector<8x32xf32>
    %1000 = arith.divf %998, %999 : vector<8x32xf32>
    %1001 = vector.extract_strided_slice %983 {offsets = [0, 64], sizes = [8, 32], strides = [1, 1]} : vector<8x96xf32> to vector<8x32xf32>
    %1002 = vector.extract_strided_slice %984 {offsets = [0, 64], sizes = [8, 32], strides = [1, 1]} : vector<8x96xf32> to vector<8x32xf32>
    %1003 = arith.addf %1002, %812 : vector<8x32xf32>
    %1004 = arith.mulf %992, %1003 : vector<8x32xf32>
    %1005 = arith.addf %1001, %1004 : vector<8x32xf32>
    %1006 = math.tanh %1005 : vector<8x32xf32>
    %cst_331 = arith.constant 1.000000e+00 : f32
    %1007 = vector.broadcast %cst_331 : f32 to vector<8x32xf32>
    %1008 = arith.subf %1007, %1000 : vector<8x32xf32>
    %1009 = arith.mulf %1008, %1006 : vector<8x32xf32>
    %1010 = arith.mulf %1000, %979 : vector<8x32xf32>
    %1011 = arith.addf %1009, %1010 : vector<8x32xf32>
    %c0_332 = arith.constant 0 : index
    %c160_333 = arith.constant 160 : index
    %1012 = vector.load %arg30[%c0_332, %c160_333] : memref<8x256xf32, #tpu.memory_space<vmem>>, vector<8x32xf32>
    %1013 = arith.addf %1012, %1011 : vector<8x32xf32>
    %c0_334 = arith.constant 0 : index
    %c160_335 = arith.constant 160 : index
    %1014 = vector.load %arg30[%c0_334, %c160_335] : memref<8x256xf32, #tpu.memory_space<vmem>>, vector<8x32xf32>
    tpu.vector_store %arg30[%c0_334, %c160_335], %1013 {strides = array<i32>} : memref<8x256xf32, #tpu.memory_space<vmem>>, vector<8x32xf32>,
    %c48_336 = arith.constant 48 : index
    %c0_337 = arith.constant 0 : index
    %1015 = vector.load %arg28[%c48_336, %c0_337] : memref<64x96xf32, #tpu.memory_space<vmem>>, vector<8x96xf32>
    %cst_338 = arith.constant dense<0.000000e+00> : vector<8x96xf32>
    %1016 = tpu.matmul %1011, %809, %cst_338 {dimension_numbers = #tpu.dot_dimension_numbers<[1], [0], [0], [1], [0, 0, 1, 1], [], []>} : vector<8x32xf32>, vector<32x96xf32>, vector<8x96xf32> -> vector<8x96xf32>
    %1017 = vector.extract_strided_slice %1015 {offsets = [0, 0], sizes = [8, 32], strides = [1, 1]} : vector<8x96xf32> to vector<8x32xf32>
    %1018 = vector.extract_strided_slice %1016 {offsets = [0, 0], sizes = [8, 32], strides = [1, 1]} : vector<8x96xf32> to vector<8x32xf32>
    %1019 = arith.addf %1017, %1018 : vector<8x32xf32>
    %1020 = arith.negf %1019 : vector<8x32xf32>
    %1021 = math.exp %1020 : vector<8x32xf32>
    %cst_339 = arith.constant 1.000000e+00 : f32
    %1022 = vector.broadcast %cst_339 : f32 to vector<8x32xf32>
    %1023 = arith.addf %1022, %1021 : vector<8x32xf32>
    %1024 = arith.divf %1022, %1023 : vector<8x32xf32>
    %1025 = vector.extract_strided_slice %1015 {offsets = [0, 32], sizes = [8, 32], strides = [1, 1]} : vector<8x96xf32> to vector<8x32xf32>
    %1026 = vector.extract_strided_slice %1016 {offsets = [0, 32], sizes = [8, 32], strides = [1, 1]} : vector<8x96xf32> to vector<8x32xf32>
    %1027 = arith.addf %1025, %1026 : vector<8x32xf32>
    %1028 = arith.negf %1027 : vector<8x32xf32>
    %1029 = math.exp %1028 : vector<8x32xf32>
    %cst_340 = arith.constant 1.000000e+00 : f32
    %1030 = vector.broadcast %cst_340 : f32 to vector<8x32xf32>
    %1031 = arith.addf %1030, %1029 : vector<8x32xf32>
    %1032 = arith.divf %1030, %1031 : vector<8x32xf32>
    %1033 = vector.extract_strided_slice %1015 {offsets = [0, 64], sizes = [8, 32], strides = [1, 1]} : vector<8x96xf32> to vector<8x32xf32>
    %1034 = vector.extract_strided_slice %1016 {offsets = [0, 64], sizes = [8, 32], strides = [1, 1]} : vector<8x96xf32> to vector<8x32xf32>
    %1035 = arith.addf %1034, %812 : vector<8x32xf32>
    %1036 = arith.mulf %1024, %1035 : vector<8x32xf32>
    %1037 = arith.addf %1033, %1036 : vector<8x32xf32>
    %1038 = math.tanh %1037 : vector<8x32xf32>
    %cst_341 = arith.constant 1.000000e+00 : f32
    %1039 = vector.broadcast %cst_341 : f32 to vector<8x32xf32>
    %1040 = arith.subf %1039, %1032 : vector<8x32xf32>
    %1041 = arith.mulf %1040, %1038 : vector<8x32xf32>
    %1042 = arith.mulf %1032, %1011 : vector<8x32xf32>
    %1043 = arith.addf %1041, %1042 : vector<8x32xf32>
    %c0_342 = arith.constant 0 : index
    %c192_343 = arith.constant 192 : index
    %1044 = vector.load %arg30[%c0_342, %c192_343] : memref<8x256xf32, #tpu.memory_space<vmem>>, vector<8x32xf32>
    %1045 = arith.addf %1044, %1043 : vector<8x32xf32>
    %c0_344 = arith.constant 0 : index
    %c192_345 = arith.constant 192 : index
    %1046 = vector.load %arg30[%c0_344, %c192_345] : memref<8x256xf32, #tpu.memory_space<vmem>>, vector<8x32xf32>
    tpu.vector_store %arg30[%c0_344, %c192_345], %1045 {strides = array<i32>} : memref<8x256xf32, #tpu.memory_space<vmem>>, vector<8x32xf32>,
    %c56_346 = arith.constant 56 : index
    %c0_347 = arith.constant 0 : index
    %1047 = vector.load %arg28[%c56_346, %c0_347] : memref<64x96xf32, #tpu.memory_space<vmem>>, vector<8x96xf32>
    %cst_348 = arith.constant dense<0.000000e+00> : vector<8x96xf32>
    %1048 = tpu.matmul %1043, %809, %cst_348 {dimension_numbers = #tpu.dot_dimension_numbers<[1], [0], [0], [1], [0, 0, 1, 1], [], []>} : vector<8x32xf32>, vector<32x96xf32>, vector<8x96xf32> -> vector<8x96xf32>
    %1049 = vector.extract_strided_slice %1047 {offsets = [0, 0], sizes = [8, 32], strides = [1, 1]} : vector<8x96xf32> to vector<8x32xf32>
    %1050 = vector.extract_strided_slice %1048 {offsets = [0, 0], sizes = [8, 32], strides = [1, 1]} : vector<8x96xf32> to vector<8x32xf32>
    %1051 = arith.addf %1049, %1050 : vector<8x32xf32>
    %1052 = arith.negf %1051 : vector<8x32xf32>
    %1053 = math.exp %1052 : vector<8x32xf32>
    %cst_349 = arith.constant 1.000000e+00 : f32
    %1054 = vector.broadcast %cst_349 : f32 to vector<8x32xf32>
    %1055 = arith.addf %1054, %1053 : vector<8x32xf32>
    %1056 = arith.divf %1054, %1055 : vector<8x32xf32>
    %1057 = vector.extract_strided_slice %1047 {offsets = [0, 32], sizes = [8, 32], strides = [1, 1]} : vector<8x96xf32> to vector<8x32xf32>
    %1058 = vector.extract_strided_slice %1048 {offsets = [0, 32], sizes = [8, 32], strides = [1, 1]} : vector<8x96xf32> to vector<8x32xf32>
    %1059 = arith.addf %1057, %1058 : vector<8x32xf32>
    %1060 = arith.negf %1059 : vector<8x32xf32>
    %1061 = math.exp %1060 : vector<8x32xf32>
    %cst_350 = arith.constant 1.000000e+00 : f32
    %1062 = vector.broadcast %cst_350 : f32 to vector<8x32xf32>
    %1063 = arith.addf %1062, %1061 : vector<8x32xf32>
    %1064 = arith.divf %1062, %1063 : vector<8x32xf32>
    %1065 = vector.extract_strided_slice %1047 {offsets = [0, 64], sizes = [8, 32], strides = [1, 1]} : vector<8x96xf32> to vector<8x32xf32>
    %1066 = vector.extract_strided_slice %1048 {offsets = [0, 64], sizes = [8, 32], strides = [1, 1]} : vector<8x96xf32> to vector<8x32xf32>
    %1067 = arith.addf %1066, %812 : vector<8x32xf32>
    %1068 = arith.mulf %1056, %1067 : vector<8x32xf32>
    %1069 = arith.addf %1065, %1068 : vector<8x32xf32>
    %1070 = math.tanh %1069 : vector<8x32xf32>
    %cst_351 = arith.constant 1.000000e+00 : f32
    %1071 = vector.broadcast %cst_351 : f32 to vector<8x32xf32>
    %1072 = arith.subf %1071, %1064 : vector<8x32xf32>
    %1073 = arith.mulf %1072, %1070 : vector<8x32xf32>
    %1074 = arith.mulf %1064, %1043 : vector<8x32xf32>
    %1075 = arith.addf %1073, %1074 : vector<8x32xf32>
    %c0_352 = arith.constant 0 : index
    %c224_353 = arith.constant 224 : index
    %1076 = vector.load %arg30[%c0_352, %c224_353] : memref<8x256xf32, #tpu.memory_space<vmem>>, vector<8x32xf32>
    %1077 = arith.addf %1076, %1075 : vector<8x32xf32>
    %c0_354 = arith.constant 0 : index
    %c224_355 = arith.constant 224 : index
    %1078 = vector.load %arg30[%c0_354, %c224_355] : memref<8x256xf32, #tpu.memory_space<vmem>>, vector<8x32xf32>
    tpu.vector_store %arg30[%c0_354, %c224_355], %1077 {strides = array<i32>} : memref<8x256xf32, #tpu.memory_space<vmem>>, vector<8x32xf32>,
    %c0_356 = arith.constant 0 : index
    %c0_357 = arith.constant 0 : index
    %1079 = vector.load %arg30[%c0_356, %c0_357] : memref<8x256xf32, #tpu.memory_space<vmem>>, vector<8x256xf32>
    %c0_358 = arith.constant 0 : index
    %c0_359 = arith.constant 0 : index
    %1080 = vector.load %arg26[%c0_358, %c0_359] : memref<8x256xf32, #tpu.memory_space<vmem>>, vector<8x256xf32>
    tpu.vector_store %arg26[%c0_358, %c0_359], %1079 {strides = array<i32>} : memref<8x256xf32, #tpu.memory_space<vmem>>, vector<8x256xf32>,
    return
  }
  func.func @transform_0(%arg0: i32) -> (i32, i32, i32) {
    %c0_i32 = arith.constant 0 : i32
    %c0_i32_0 = arith.constant 0 : i32
    %c0_i32_1 = arith.constant 0 : i32
    return %c0_i32, %arg0, %c0_i32_0 : i32, i32, i32
  }
  func.func @transform_1(%arg0: i32) -> (i32, i32) {
    %c0_i32 = arith.constant 0 : i32
    %c0_i32_0 = arith.constant 0 : i32
    %c0_i32_1 = arith.constant 0 : i32
    return %c0_i32, %c0_i32_0 : i32, i32
  }
  func.func @transform_2(%arg0: i32) -> (i32, i32) {
    %c0_i32 = arith.constant 0 : i32
    %c0_i32_0 = arith.constant 0 : i32
    %c0_i32_1 = arith.constant 0 : i32
    return %c0_i32, %c0_i32_0 : i32, i32
  }
  func.func @transform_3(%arg0: i32) -> (i32, i32) {
    %c0_i32 = arith.constant 0 : i32
    %c0_i32_0 = arith.constant 0 : i32
    %c0_i32_1 = arith.constant 0 : i32
    return %c0_i32, %c0_i32_0 : i32, i32
  }
  func.func @transform_4(%arg0: i32) -> (i32, i32) {
    %c0_i32 = arith.constant 0 : i32
    %c0_i32_0 = arith.constant 0 : i32
    %c0_i32_1 = arith.constant 0 : i32
    return %c0_i32, %c0_i32_0 : i32, i32
  }
  func.func @transform_5(%arg0: i32) -> (i32, i32) {
    %c0_i32 = arith.constant 0 : i32
    %c0_i32_0 = arith.constant 0 : i32
    %c0_i32_1 = arith.constant 0 : i32
    return %c0_i32, %c0_i32_0 : i32, i32
  }
  func.func @transform_6(%arg0: i32) -> (i32, i32) {
    %c0_i32 = arith.constant 0 : i32
    %c0_i32_0 = arith.constant 0 : i32
    %c0_i32_1 = arith.constant 0 : i32
    return %c0_i32, %c0_i32_0 : i32, i32
  }
  func.func @transform_7(%arg0: i32) -> (i32, i32) {
    %c0_i32 = arith.constant 0 : i32
    %c0_i32_0 = arith.constant 0 : i32
    %c0_i32_1 = arith.constant 0 : i32
    return %c0_i32, %c0_i32_0 : i32, i32
  }
  func.func @transform_8(%arg0: i32) -> (i32, i32) {
    %c0_i32 = arith.constant 0 : i32
    %c0_i32_0 = arith.constant 0 : i32
    %c0_i32_1 = arith.constant 0 : i32
    return %c0_i32, %c0_i32_0 : i32, i32
  }
  func.func @transform_9(%arg0: i32) -> (i32, i32) {
    %c0_i32 = arith.constant 0 : i32
    %c0_i32_0 = arith.constant 0 : i32
    %c0_i32_1 = arith.constant 0 : i32
    return %c0_i32, %c0_i32_0 : i32, i32
  }
  func.func @transform_10(%arg0: i32) -> (i32, i32) {
    %c0_i32 = arith.constant 0 : i32
    %c0_i32_0 = arith.constant 0 : i32
    %c0_i32_1 = arith.constant 0 : i32
    return %c0_i32, %c0_i32_0 : i32, i32
  }
  func.func @transform_11(%arg0: i32) -> (i32, i32) {
    %c0_i32 = arith.constant 0 : i32
    %c0_i32_0 = arith.constant 0 : i32
    %c0_i32_1 = arith.constant 0 : i32
    return %c0_i32, %c0_i32_0 : i32, i32
  }
  func.func @transform_12(%arg0: i32) -> (i32, i32) {
    %c0_i32 = arith.constant 0 : i32
    %c0_i32_0 = arith.constant 0 : i32
    %c0_i32_1 = arith.constant 0 : i32
    return %c0_i32, %c0_i32_0 : i32, i32
  }
  func.func @transform_13(%arg0: i32) -> (i32, i32) {
    %c0_i32 = arith.constant 0 : i32
    %c0_i32_0 = arith.constant 0 : i32
    %c0_i32_1 = arith.constant 0 : i32
    return %c0_i32, %c0_i32_0 : i32, i32
  }
  func.func @transform_14(%arg0: i32) -> (i32, i32) {
    %c0_i32 = arith.constant 0 : i32
    %c0_i32_0 = arith.constant 0 : i32
    %c0_i32_1 = arith.constant 0 : i32
    return %c0_i32, %c0_i32_0 : i32, i32
  }
  func.func @transform_15(%arg0: i32) -> (i32, i32) {
    %c0_i32 = arith.constant 0 : i32
    %c0_i32_0 = arith.constant 0 : i32
    %c0_i32_1 = arith.constant 0 : i32
    return %c0_i32, %c0_i32_0 : i32, i32
  }
  func.func @transform_16(%arg0: i32) -> (i32, i32) {
    %c0_i32 = arith.constant 0 : i32
    %c0_i32_0 = arith.constant 0 : i32
    %c0_i32_1 = arith.constant 0 : i32
    return %c0_i32, %c0_i32_0 : i32, i32
  }
  func.func @transform_17(%arg0: i32) -> (i32, i32) {
    %c0_i32 = arith.constant 0 : i32
    %c0_i32_0 = arith.constant 0 : i32
    %c0_i32_1 = arith.constant 0 : i32
    return %c0_i32, %c0_i32_0 : i32, i32
  }
  func.func @transform_18(%arg0: i32) -> (i32, i32) {
    %c0_i32 = arith.constant 0 : i32
    %c0_i32_0 = arith.constant 0 : i32
    %c0_i32_1 = arith.constant 0 : i32
    return %c0_i32, %c0_i32_0 : i32, i32
  }
  func.func @transform_19(%arg0: i32) -> (i32, i32) {
    %c0_i32 = arith.constant 0 : i32
    %c0_i32_0 = arith.constant 0 : i32
    %c0_i32_1 = arith.constant 0 : i32
    return %c0_i32, %c0_i32_0 : i32, i32
  }
  func.func @transform_20(%arg0: i32) -> (i32, i32) {
    %c0_i32 = arith.constant 0 : i32
    %c0_i32_0 = arith.constant 0 : i32
    %c0_i32_1 = arith.constant 0 : i32
    return %c0_i32, %c0_i32_0 : i32, i32
  }
  func.func @transform_21(%arg0: i32) -> (i32, i32) {
    %c0_i32 = arith.constant 0 : i32
    %c0_i32_0 = arith.constant 0 : i32
    %c0_i32_1 = arith.constant 0 : i32
    return %c0_i32, %c0_i32_0 : i32, i32
  }
  func.func @transform_22(%arg0: i32) -> (i32, i32) {
    %c0_i32 = arith.constant 0 : i32
    %c0_i32_0 = arith.constant 0 : i32
    %c0_i32_1 = arith.constant 0 : i32
    return %c0_i32, %c0_i32_0 : i32, i32
  }
  func.func @transform_23(%arg0: i32) -> (i32, i32) {
    %c0_i32 = arith.constant 0 : i32
    %c0_i32_0 = arith.constant 0 : i32
    %c0_i32_1 = arith.constant 0 : i32
    return %c0_i32, %c0_i32_0 : i32, i32
  }
  func.func @transform_24(%arg0: i32) -> (i32, i32) {
    %c0_i32 = arith.constant 0 : i32
    %c0_i32_0 = arith.constant 0 : i32
    %c0_i32_1 = arith.constant 0 : i32
    return %c0_i32, %c0_i32_0 : i32, i32
  }
  func.func @transform_25(%arg0: i32) -> (i32, i32) {
    %c0_i32 = arith.constant 0 : i32
    %c0_i32_0 = arith.constant 0 : i32
    return %arg0, %c0_i32 : i32, i32
  }
}

</mosaic_0001>

<bundles_post_ra>
// kernel: tpu_custom_call.1
= control target key start
LH: loop header
LB: loop body
LE: loop exit
PB: predicated region body
PF: predicated region fallthrough
CT: control target
= control target key end

     0   :  { %s7806_s0 = inlined_call_operand.hbm [shape: f32[8,8,32], index: 0, kind: input, shape index: {}]   ;;  %s7807_s1 = inlined_call_operand.hbm [shape: f32[32,96], index: 1, kind: input, shape index: {}]   ;;  %s7808_s2 = inlined_call_operand.hbm [shape: f32[32,96], index: 2, kind: input, shape index: {}]   ;;  %s7809_s3 = inlined_call_operand.hbm [shape: f32[1,96], index: 3, kind: input, shape index: {}]   ;;  %s7810_s4 = inlined_call_operand.hbm [shape: f32[1,32], index: 4, kind: input, shape index: {}]   ;;  %s7811_s5 = inlined_call_operand.hbm [shape: f32[32,96], index: 5, kind: input, shape index: {}]   ;;  %s7812_s6 = inlined_call_operand.hbm [shape: f32[32,96], index: 6, kind: input, shape index: {}]   ;;  %s7813_s7 = inlined_call_operand.hbm [shape: f32[1,96], index: 7, kind: input, shape index: {}]   ;;  %s7814_s8 = inlined_call_operand.hbm [shape: f32[1,32], index: 8, kind: input, shape index: {}]   ;;  %s7815_s9 = inlined_call_operand.hbm [shape: f32[32,32], index: 9, kind: input, shape index: {}]   ;;  %s7816_s10 = inlined_call_operand.hbm [shape: f32[1,32], index: 10, kind: input, shape index: {}]   ;;  %s7817_s11 = inlined_call_operand.hbm [shape: f32[32,96], index: 11, kind: input, shape index: {}]   ;;  %s7818_s12 = inlined_call_operand.hbm [shape: f32[32,96], index: 12, kind: input, shape index: {}]   ;;  %s7819_s13 = inlined_call_operand.hbm [shape: f32[1,96], index: 13, kind: input, shape index: {}]   ;;  %s7820_s14 = inlined_call_operand.hbm [shape: f32[1,32], index: 14, kind: input, shape index: {}]   ;;  %s7821_s15 = inlined_call_operand.hbm [shape: f32[32,96], index: 15, kind: input, shape index: {}]   ;;  %s7822_s16 = inlined_call_operand.hbm [shape: f32[32,96], index: 16, kind: input, shape index: {}]   ;;  %s7823_s17 = inlined_call_operand.hbm [shape: f32[1,96], index: 17, kind: input, shape index: {}]   ;;  %s7824_s18 = inlined_call_operand.hbm [shape: f32[1,32], index: 18, kind: input, shape index: {}]   ;;  %s7825_s19 = inlined_call_operand.vmem [shape: f32[32,32], index: 19, kind: input, shape index: {}]   ;;  %s7826_s20 = inlined_call_operand.vmem [shape: f32[1,32], index: 20, kind: input, shape index: {}]   ;;  %s7827_s21 = inlined_call_operand.hbm [shape: f32[32,32], index: 21, kind: input, shape index: {}]   ;;  %s7828_s22 = inlined_call_operand.vmem [shape: f32[1,32], index: 22, kind: input, shape index: {}]   ;;  %s7829_s23 = inlined_call_operand.hbm [shape: f32[256,256], index: 23, kind: input, shape index: {}]   ;;  %s7830_s24 = inlined_call_operand.vmem [shape: f32[1,256], index: 24, kind: input, shape index: {}]   ;;  %s7831_s25 = inlined_call_operand.hbm [shape: f32[8,256], index: 25, kind: output, shape index: {}]  }
   0x1   :  { %7832 = sst [smem:[#allocation52_spill]] %s7806_s0 }
   0x2   :  { %7833 = sst [smem:[#allocation53_spill]] %s7807_s1 }
   0x3   :  { %7834 = sst [smem:[#allocation54_spill]] %s7808_s2 }
   0x4   :  { %7835 = sst [smem:[#allocation55_spill]] %s7809_s3 }
   0x5   :  { %7836 = sst [smem:[#allocation56_spill]] %s7810_s4 }
   0x6   :  { %7837 = sst [smem:[#allocation57_spill]] %s7811_s5 }
   0x7   :  { %7838 = sst [smem:[#allocation58_spill]] %s7812_s6 }
   0x8   :  { %7839 = sst [smem:[#allocation59_spill]] %s7813_s7 }
   0x9   :  { %7840 = sst [smem:[#allocation60_spill]] %s7814_s8 }
   0xa   :  { %7841 = sst [smem:[#allocation61_spill]] %s7815_s9 }
   0xb   :  { %7842 = sst [smem:[#allocation62_spill]] %s7831_s25 }
   0xc   :  { %30 = vsyncpa [#allocation7], 0 }
   0xd   :  { %31 = vsyncpa [#allocation10], 0 }
   0xe   :  { %32 = vsyncpa [#allocation13], 0 }
   0xf   :  { %33 = vsyncpa [#allocation16], 0 }
  0x10   :  { %34 = vsyncpa [#allocation19], 0 }
  0x11   :  { %35 = vsyncpa [#allocation22], 0 }
  0x12   :  { %36 = vsyncpa [#allocation25], 0 }
  0x13   :  { %37 = vsyncpa [#allocation28], 0 }
  0x14   :  { %38 = vsyncpa [#allocation31], 0 }
  0x15   :  { %39 = vsyncpa [#allocation34], 0 }
  0x16   :  { %40 = vsyncpa [#allocation37], 0 }
  0x17   :  { %41 = vsyncpa [#allocation8], 0  ;;  %s6773_s29 = smov [#allocation9]   ;;  %s6774_s6 = smov [#allocation12]  }
  0x18   :  { %s59_s2 = sshll.u32 %s6773_s29, 4  ;;  %s84_s30 = sshll.u32 %s6774_s6, 4  ;;  %s60_s2 = int_to_ptr.vmem [resolvable:$true] %s59_s2  ;;  %s85_s30 = int_to_ptr.vmem [resolvable:$true] %s84_s30 }
  0x19   :  { %s6317_s7 = scalar_lea.vmem %s60_s2, 512  ;;  %p6322_p1 = scmp.lt.s32.totalorder %s60_s2, %s60_s2 }
  0x1a   :  { %p6318_p0 = scmp.ne.s32.totalorder %s60_s2, %s6317_s7  ;;  %p6323_p2 = scmp.lt.s32.totalorder %s6317_s7, %s6317_s7 }
  0x1c   :  { %p6324_p3 = por %p6323_p2, %p6322_p1 }
  0x1e   :  { %p6325_p4 = pnand %p6324_p3, %p6318_p0 }
  0x20   :  { %6328 = shalt.err (!%p6325_p4)
}
  0x21   :  { %s6775_s3 = smov 128   ;;  %s6776_s26 = smov 8  }
  0x22   :  { %s7843_s27 = sld [smem:[#allocation53_spill]]  ;;  %s6337_s4 = scalar_lea.vmem %s85_s30, 16 }
  0x23   :  { %p6338_p5 = scmp.ne.s32.totalorder %s85_s30, %s6337_s4  ;;  %s6341_s28 = scalar_lea.vmem %s85_s30, 32 }
  0x24   :  { %p6342_p6 = scmp.lt.s32.totalorder %s85_s30, %s85_s30  ;;  %p6343_p7 = scmp.lt.s32.totalorder %s6341_s28, %s6337_s4 }
  0x26   :  { %p6344_p8 = por %p6343_p7, %p6342_p6 }
  0x28   :  { %65 = dma.hbm_to_vmem [thread:$0]  %s7843_s27, 512, %s60_s2, [#allocation10], %s6775_s3, %s6775_s3, %s6776_s26  }
  0x29   :  { %p6345_p9 = pnand %p6344_p8, %p6338_p5 }
  0x2b   :  { %6348 = shalt.err (!%p6345_p9)
}
  0x2c   :  { %s7844_s0 = sld [smem:[#allocation55_spill]]  ;;  %s6777_s29 = smov [#allocation15]  }
  0x2d   :  { %s103_s6 = sshll.u32 %s6777_s29, 4  ;;  %s6778_s7 = smov [#allocation18]   ;;  %s104_s6 = int_to_ptr.vmem [resolvable:$true] %s103_s6 }
  0x2e   :  { %s128_s25 = sshll.u32 %s6778_s7, 4  ;;  %s6357_s1 = scalar_lea.vmem %s104_s6, 512  ;;  %s129_s25 = int_to_ptr.vmem [resolvable:$true] %s128_s25 }
  0x2f   :  { %p6358_p10 = scmp.ne.s32.totalorder %s104_s6, %s6357_s1  ;;  %p6362_p11 = scmp.lt.s32.totalorder %s104_s6, %s104_s6 }
  0x30   :  { %p6363_p12 = scmp.lt.s32.totalorder %s6357_s1, %s6357_s1 }
  0x32   :  { %87 = dma.hbm_to_vmem [thread:$0]  %s7844_s0, 16, %s85_s30, [#allocation13]  }
  0x33   :  { %p6364_p13 = por %p6363_p12, %p6362_p11 }
  0x35   :  { %p6365_p0 = pnand %p6364_p13, %p6358_p10 }
  0x37   :  { %6368 = shalt.err (!%p6365_p0)
}
  0x38   :  { %s7845_s27 = sld [smem:[#allocation57_spill]]  ;;  %s6377_s30 = scalar_lea.vmem %s129_s25, 16 }
  0x39   :  { %p6378_p1 = scmp.ne.s32.totalorder %s129_s25, %s6377_s30  ;;  %s6381_s4 = scalar_lea.vmem %s129_s25, 32 }
  0x3a   :  { %p6382_p2 = scmp.lt.s32.totalorder %s129_s25, %s129_s25  ;;  %p6383_p3 = scmp.lt.s32.totalorder %s6381_s4, %s6377_s30 }
  0x3c   :  { %p6384_p4 = por %p6383_p3, %p6382_p2 }
  0x3e   :  { %109 = dma.hbm_to_vmem [thread:$0]  %s7845_s27, 512, %s104_s6, [#allocation16], %s6775_s3, %s6775_s3, %s6776_s26  }
  0x3f   :  { %p6385_p5 = pnand %p6384_p4, %p6378_p1 }
  0x41   :  { %6388 = shalt.err (!%p6385_p5)
}
  0x42   :  { %s7846_s5 = sld [smem:[#allocation59_spill]]  ;;  %s6779_s0 = smov [#allocation21]  }
  0x43   :  { %s147_s29 = sshll.u32 %s6779_s0, 4  ;;  %s6780_s7 = smov [#allocation24]   ;;  %s148_s29 = int_to_ptr.vmem [resolvable:$true] %s147_s29 }
  0x44   :  { %s169_s1 = sshll.u32 %s6780_s7, 4  ;;  %s6397_s2 = scalar_lea.vmem %s148_s29, 512  ;;  %s170_s1 = int_to_ptr.vmem [resolvable:$true] %s169_s1 }
  0x45   :  { %p6398_p6 = scmp.ne.s32.totalorder %s148_s29, %s6397_s2  ;;  %p6402_p7 = scmp.lt.s32.totalorder %s148_s29, %s148_s29 }
  0x46   :  { %p6403_p8 = scmp.lt.s32.totalorder %s6397_s2, %s6397_s2 }
  0x48   :  { %131 = dma.hbm_to_vmem [thread:$0]  %s7846_s5, 16, %s129_s25, [#allocation19]  }
  0x49   :  { %p6404_p9 = por %p6403_p8, %p6402_p7 }
  0x4b   :  { %p6405_p10 = pnand %p6404_p9, %p6398_p6 }
  0x4d   :  { %6408 = shalt.err (!%p6405_p10)
}
  0x4e   :  { %s7847_s27 = sld [smem:[#allocation61_spill]]  ;;  %s6417_s25 = scalar_lea.vmem %s170_s1, 512 }
  0x4f   :  { %p6418_p11 = scmp.ne.s32.totalorder %s170_s1, %s6417_s25  ;;  %p6422_p12 = scmp.lt.s32.totalorder %s170_s1, %s170_s1 }
  0x50   :  { %p6423_p13 = scmp.lt.s32.totalorder %s6417_s25, %s6417_s25 }
  0x52   :  { %p6424_p0 = por %p6423_p13, %p6422_p12 }
  0x54   :  { %153 = dma.hbm_to_vmem [thread:$0]  %s7847_s27, 512, %s148_s29, [#allocation22], %s6775_s3, %s6775_s3, %s6776_s26  }
  0x55   :  { %p6425_p1 = pnand %p6424_p0, %p6418_p11 }
  0x57   :  { %6428 = shalt.err (!%p6425_p1)
}
  0x58   :  { %175 = dma.hbm_to_vmem [thread:$0]  %s7817_s11, 512, %s170_s1, [#allocation25], %s6775_s3, %s6775_s3, %s6776_s26  }
  0x59   :  { %s6781_s28 = smov [#allocation27]   ;;  %s6782_s5 = smov [#allocation30]  }
  0x5a   :  { %s194_s9 = sshll.u32 %s6781_s28, 4  ;;  %s213_s0 = sshll.u32 %s6782_s5, 4  ;;  %s195_s9 = int_to_ptr.vmem [resolvable:$true] %s194_s9  ;;  %s214_s0 = int_to_ptr.vmem [resolvable:$true] %s213_s0 }
  0x5b   :  { %s6437_s29 = scalar_lea.vmem %s195_s9, 16  ;;  %s6441_s7 = scalar_lea.vmem %s195_s9, 32 }
  0x5c   :  { %p6438_p2 = scmp.ne.s32.totalorder %s195_s9, %s6437_s29  ;;  %p6442_p3 = scmp.lt.s32.totalorder %s195_s9, %s195_s9 }
  0x5d   :  { %p6443_p4 = scmp.lt.s32.totalorder %s6441_s7, %s6437_s29 }
  0x5f   :  { %p6444_p5 = por %p6443_p4, %p6442_p3 }
  0x61   :  { %p6445_p6 = pnand %p6444_p5, %p6438_p2 }
  0x63   :  { %6448 = shalt.err (!%p6445_p6)
}
  0x64   :  { %197 = dma.hbm_to_vmem [thread:$0]  %s7819_s13, 16, %s195_s9, [#allocation28]  }
  0x65   :  { %s6457_s8 = scalar_lea.vmem %s214_s0, 512  ;;  %p6462_p8 = scmp.lt.s32.totalorder %s214_s0, %s214_s0 }
  0x66   :  { %p6458_p7 = scmp.ne.s32.totalorder %s214_s0, %s6457_s8  ;;  %p6463_p9 = scmp.lt.s32.totalorder %s6457_s8, %s6457_s8 }
  0x68   :  { %p6464_p10 = por %p6463_p9, %p6462_p8 }
  0x6a   :  { %p6465_p11 = pnand %p6464_p10, %p6458_p7 }
  0x6c   :  { %6468 = shalt.err (!%p6465_p11)
}
  0x6d   :  { %219 = dma.hbm_to_vmem [thread:$0]  %s7821_s15, 512, %s214_s0, [#allocation31], %s6775_s3, %s6775_s3, %s6776_s26  }
  0x6e   :  { %s6783_s27 = smov [#allocation33]   ;;  %s6784_s30 = smov [#allocation36]  }
  0x6f   :  { %s238_s25 = sshll.u32 %s6783_s27, 4  ;;  %s261_s4 = sshll.u32 %s6784_s30, 4  ;;  %s239_s25 = int_to_ptr.vmem [resolvable:$true] %s238_s25  ;;  %s262_s4 = int_to_ptr.vmem [resolvable:$true] %s261_s4 }
  0x70   :  { %s6477_s13 = scalar_lea.vmem %s239_s25, 16  ;;  %s6481_s28 = scalar_lea.vmem %s239_s25, 32 }
  0x71   :  { %p6478_p12 = scmp.ne.s32.totalorder %s239_s25, %s6477_s13  ;;  %p6482_p13 = scmp.lt.s32.totalorder %s239_s25, %s239_s25 }
  0x72   :  { %p6483_p0 = scmp.lt.s32.totalorder %s6481_s28, %s6477_s13 }
  0x74   :  { %p6484_p1 = por %p6483_p0, %p6482_p13 }
  0x76   :  { %p6485_p2 = pnand %p6484_p1, %p6478_p12 }
  0x78   :  { %6488 = shalt.err (!%p6485_p2)
}
  0x79   :  { %241 = dma.hbm_to_vmem [thread:$0]  %s7823_s17, 16, %s239_s25, [#allocation34]  }
  0x7a   :  { %s6497_s29 = scalar_lea.vmem %s262_s4, 512  ;;  %p6502_p4 = scmp.lt.s32.totalorder %s262_s4, %s262_s4 }
  0x7b   :  { %p6498_p3 = scmp.ne.s32.totalorder %s262_s4, %s6497_s29  ;;  %p6503_p5 = scmp.lt.s32.totalorder %s6497_s29, %s6497_s29 }
  0x7d   :  { %p6504_p6 = por %p6503_p5, %p6502_p4 }
  0x7f   :  { %p6505_p7 = pnand %p6504_p6, %p6498_p3 }
  0x81   :  { %6508 = shalt.err (!%p6505_p7)
}
  0x82   :  { %267 = dma.hbm_to_vmem [thread:$0]  %s7827_s21, 512, %s262_s4, [#allocation37], %s6775_s3, %s6775_s3, %s6776_s26  }
  0x83   :  { %s6785_s7 = smov [#allocation6]   ;;  %s6786_s6 = smov [#allocation11]  }
  0x84   :  { %s47_s2 = sshll.u32 %s6785_s7, 4  ;;  %s71_s8 = sshll.u32 %s6786_s6, 4  ;;  %s48_s2 = int_to_ptr.vmem [resolvable:$true] %s47_s2  ;;  %s72_s8 = int_to_ptr.vmem [resolvable:$true] %s71_s8 }
  0x85   :  { %s6517_s17 = scalar_lea.vmem %s48_s2, 1024  ;;  %p6522_p9 = scmp.lt.s32.totalorder %s48_s2, %s48_s2 }
  0x86   :  { %p6518_p8 = scmp.ne.s32.totalorder %s48_s2, %s6517_s17  ;;  %p6523_p10 = scmp.lt.s32.totalorder %s6517_s17, %s6517_s17 }
  0x88   :  { %p6524_p11 = por %p6523_p10, %p6522_p9 }
  0x8a   :  { %p6525_p12 = pnand %p6524_p11, %p6518_p8 }
  0x8c   :  { %6528 = shalt.err (!%p6525_p12)
}
  0x8d   :  { %s7848_s27 = sld [smem:[#allocation52_spill]]  ;;  %s6537_s21 = scalar_lea.vmem %s72_s8, 512 }
  0x8e   :  { %p6538_p13 = scmp.ne.s32.totalorder %s72_s8, %s6537_s21  ;;  %p6542_p0 = scmp.lt.s32.totalorder %s72_s8, %s72_s8 }
  0x8f   :  { %p6543_p1 = scmp.lt.s32.totalorder %s6537_s21, %s6537_s21 }
  0x91   :  { %p6544_p2 = por %p6543_p1, %p6542_p0 }
  0x93   :  { %53 = dma.hbm_to_vmem [thread:$0]  %s7848_s27, 1024, %s48_s2, [#allocation7], %s6775_s3, %s6775_s3, %s6776_s26  }
  0x94   :  { %p6545_p3 = pnand %p6544_p2, %p6538_p13 }
  0x96   :  { %6548 = shalt.err (!%p6545_p3)
}
  0x97   :  { %s7849_s4 = sld [smem:[#allocation54_spill]]  ;;  %s6787_s13 = smov [#allocation14]  }
  0x98   :  { %s94_s28 = sshll.u32 %s6787_s13, 4  ;;  %s6788_s9 = smov [#allocation17]   ;;  %s95_s28 = int_to_ptr.vmem [resolvable:$true] %s94_s28 }
  0x99   :  { %s115_s5 = sshll.u32 %s6788_s9, 4  ;;  %s6557_s29 = scalar_lea.vmem %s95_s28, 16  ;;  %s116_s5 = int_to_ptr.vmem [resolvable:$true] %s115_s5 }
  0x9a   :  { %p6558_p4 = scmp.ne.s32.totalorder %s95_s28, %s6557_s29  ;;  %s6561_s15 = scalar_lea.vmem %s95_s28, 32 }
  0x9b   :  { %p6562_p5 = scmp.lt.s32.totalorder %s95_s28, %s95_s28  ;;  %p6563_p6 = scmp.lt.s32.totalorder %s6561_s15, %s6557_s29 }
  0x9d   :  { %77 = dma.hbm_to_vmem [thread:$0]  %s7849_s4, 512, %s72_s8, [#allocation10], %s6775_s3, %s6775_s3, %s6776_s26  }
  0x9e   :  { %p6564_p7 = por %p6563_p6, %p6562_p5 }
  0xa0   :  { %p6565_p8 = pnand %p6564_p7, %p6558_p4 }
  0xa2   :  { %6568 = shalt.err (!%p6565_p8)
}
  0xa3   :  { %s7850_s2 = sld [smem:[#allocation56_spill]]  ;;  %s6577_s6 = scalar_lea.vmem %s116_s5, 512 }
  0xa4   :  { %p6578_p9 = scmp.ne.s32.totalorder %s116_s5, %s6577_s6  ;;  %p6582_p10 = scmp.lt.s32.totalorder %s116_s5, %s116_s5 }
  0xa5   :  { %p6583_p11 = scmp.lt.s32.totalorder %s6577_s6, %s6577_s6 }
  0xa7   :  { %p6584_p12 = por %p6583_p11, %p6582_p10 }
  0xa9   :  { %97 = dma.hbm_to_vmem [thread:$0]  %s7850_s2, 16, %s95_s28, [#allocation13]  }
  0xaa   :  { %p6585_p13 = pnand %p6584_p12, %p6578_p9 }
  0xac   :  { %6588 = shalt.err (!%p6585_p13)
}
  0xad   :  { %s7851_s11 = sld [smem:[#allocation58_spill]]  ;;  %s6789_s1 = smov [#allocation20]  }
  0xae   :  { %s138_s27 = sshll.u32 %s6789_s1, 4  ;;  %s6790_s21 = smov [#allocation23]   ;;  %s139_s27 = int_to_ptr.vmem [resolvable:$true] %s138_s27 }
  0xaf   :  { %s160_s25 = sshll.u32 %s6790_s21, 4  ;;  %s6597_s30 = scalar_lea.vmem %s139_s27, 16  ;;  %s161_s25 = int_to_ptr.vmem [resolvable:$true] %s160_s25 }
  0xb0   :  { %p6598_p0 = scmp.ne.s32.totalorder %s139_s27, %s6597_s30  ;;  %s6601_s4 = scalar_lea.vmem %s139_s27, 32 }
  0xb1   :  { %p6602_p1 = scmp.lt.s32.totalorder %s139_s27, %s139_s27  ;;  %p6603_p2 = scmp.lt.s32.totalorder %s6601_s4, %s6597_s30 }
  0xb3   :  { %121 = dma.hbm_to_vmem [thread:$0]  %s7851_s11, 512, %s116_s5, [#allocation16], %s6775_s3, %s6775_s3, %s6776_s26  }
  0xb4   :  { %p6604_p3 = por %p6603_p2, %p6602_p1 }
  0xb6   :  { %p6605_p4 = pnand %p6604_p3, %p6598_p0 }
  0xb8   :  { %6608 = shalt.err (!%p6605_p4)
}
  0xb9   :  { %s7852_s9 = sld [smem:[#allocation60_spill]]  ;;  %s6617_s29 = scalar_lea.vmem %s161_s25, 16 }
  0xba   :  { %p6618_p5 = scmp.ne.s32.totalorder %s161_s25, %s6617_s29  ;;  %s6621_s5 = scalar_lea.vmem %s161_s25, 32 }
  0xbb   :  { %p6622_p6 = scmp.lt.s32.totalorder %s161_s25, %s161_s25  ;;  %p6623_p7 = scmp.lt.s32.totalorder %s6621_s5, %s6617_s29 }
  0xbd   :  { %p6624_p8 = por %p6623_p7, %p6622_p6 }
  0xbf   :  { %141 = dma.hbm_to_vmem [thread:$0]  %s7852_s9, 16, %s139_s27, [#allocation19]  }
  0xc0   :  { %p6625_p9 = pnand %p6624_p8, %p6618_p5 }
  0xc2   :  { %6628 = shalt.err (!%p6625_p9)
}
  0xc3   :  { %163 = dma.hbm_to_vmem [thread:$0]  %s7816_s10, 16, %s161_s25, [#allocation22]  }
  0xc4   :  { %s6791_s7 = smov [#allocation26]   ;;  %s6792_s6 = smov [#allocation29]  }
  0xc5   :  { %s181_s2 = sshll.u32 %s6791_s7, 4  ;;  %s204_s8 = sshll.u32 %s6792_s6, 4  ;;  %s182_s2 = int_to_ptr.vmem [resolvable:$true] %s181_s2  ;;  %s205_s8 = int_to_ptr.vmem [resolvable:$true] %s204_s8 }
  0xc6   :  { %s6637_s17 = scalar_lea.vmem %s182_s2, 512  ;;  %p6642_p11 = scmp.lt.s32.totalorder %s182_s2, %s182_s2 }
  0xc7   :  { %p6638_p10 = scmp.ne.s32.totalorder %s182_s2, %s6637_s17  ;;  %p6643_p12 = scmp.lt.s32.totalorder %s6637_s17, %s6637_s17 }
  0xc9   :  { %p6644_p13 = por %p6643_p12, %p6642_p11 }
  0xcb   :  { %p6645_p0 = pnand %p6644_p13, %p6638_p10 }
  0xcd   :  { %6648 = shalt.err (!%p6645_p0)
}
  0xce   :  { %187 = dma.hbm_to_vmem [thread:$0]  %s7818_s12, 512, %s182_s2, [#allocation25], %s6775_s3, %s6775_s3, %s6776_s26  }
  0xcf   :  { %s6657_s10 = scalar_lea.vmem %s205_s8, 16  ;;  %s6661_s27 = scalar_lea.vmem %s205_s8, 32 }
  0xd0   :  { %p6658_p1 = scmp.ne.s32.totalorder %s205_s8, %s6657_s10  ;;  %p6662_p2 = scmp.lt.s32.totalorder %s205_s8, %s205_s8 }
  0xd1   :  { %p6663_p3 = scmp.lt.s32.totalorder %s6661_s27, %s6657_s10 }
  0xd3   :  { %p6664_p4 = por %p6663_p3, %p6662_p2 }
  0xd5   :  { %p6665_p5 = pnand %p6664_p4, %p6658_p1 }
  0xd7   :  { %6668 = shalt.err (!%p6665_p5)
}
  0xd8   :  { %207 = dma.hbm_to_vmem [thread:$0]  %s7820_s14, 16, %s205_s8, [#allocation28]  }
  0xd9   :  { %s6793_s30 = smov [#allocation32]   ;;  %s6794_s13 = smov [#allocation35]  }
  0xda   :  { %s225_s4 = sshll.u32 %s6793_s30, 4  ;;  %s248_s28 = sshll.u32 %s6794_s13, 4  ;;  %s226_s4 = int_to_ptr.vmem [resolvable:$true] %s225_s4  ;;  %s249_s28 = int_to_ptr.vmem [resolvable:$true] %s248_s28 }
  0xdb   :  { %s6677_s9 = scalar_lea.vmem %s226_s4, 512  ;;  %p6682_p7 = scmp.lt.s32.totalorder %s226_s4, %s226_s4 }
  0xdc   :  { %p6678_p6 = scmp.ne.s32.totalorder %s226_s4, %s6677_s9  ;;  %p6683_p8 = scmp.lt.s32.totalorder %s6677_s9, %s6677_s9 }
  0xde   :  { %p6684_p9 = por %p6683_p8, %p6682_p7 }
  0xe0   :  { %p6685_p10 = pnand %p6684_p9, %p6678_p6 }
  0xe2   :  { %6688 = shalt.err (!%p6685_p10)
}
  0xe3   :  { %231 = dma.hbm_to_vmem [thread:$0]  %s7822_s16, 512, %s226_s4, [#allocation31], %s6775_s3, %s6775_s3, %s6776_s26  }
  0xe4   :  { %s6697_s14 = scalar_lea.vmem %s249_s28, 16  ;;  %s6701_s5 = scalar_lea.vmem %s249_s28, 32 }
  0xe5   :  { %p6698_p11 = scmp.ne.s32.totalorder %s249_s28, %s6697_s14  ;;  %p6702_p12 = scmp.lt.s32.totalorder %s249_s28, %s249_s28 }
  0xe6   :  { %p6703_p13 = scmp.lt.s32.totalorder %s6701_s5, %s6697_s14 }
  0xe8   :  { %p6704_p0 = por %p6703_p13, %p6702_p12 }
  0xea   :  { %p6705_p1 = pnand %p6704_p0, %p6698_p11 }
  0xec   :  { %6708 = shalt.err (!%p6705_p1)
}
  0xed   :  { %251 = dma.hbm_to_vmem [thread:$0]  %s7824_s18, 16, %s249_s28, [#allocation34]  }
  0xee   :  { %s6795_s7 = smov [#allocation38]  }
  0xef   :  { %s275_s2 = sshll.u32 %s6795_s7, 4  ;;  %s276_s2 = int_to_ptr.vmem [resolvable:$true] %s275_s2 }
  0xf0   :  { %s6717_s6 = scalar_lea.vmem %s276_s2, 8192  ;;  %p6722_p3 = scmp.lt.s32.totalorder %s276_s2, %s276_s2 }
  0xf1   :  { %p6718_p2 = scmp.ne.s32.totalorder %s276_s2, %s6717_s6  ;;  %p6723_p4 = scmp.lt.s32.totalorder %s6717_s6, %s6717_s6 }
  0xf3   :  { %p6724_p5 = por %p6723_p4, %p6722_p3 }
  0xf5   :  { %p6725_p6 = pnand %p6724_p5, %p6718_p2 }
  0xf7   :  { %6728 = shalt.err (!%p6725_p6)
}
  0xf8   :  { %s6796_s16 = smov 256   ;;  %s6797_s3 = smov 16  }
  0xf9   :  { %281 = dma.hbm_to_vmem [thread:$0]  %s7829_s23, 8192, %s276_s2, [#allocation37], %s6796_s16, %s6796_s16, %s6797_s3  }
  0xfa   :  { %6749 = dma.done.wait [#allocation7], 1024  }
  0xfb   :  { %6750 = vsyncadd [#allocation7], 4294966272 }
  0xfc   :  { %6751 = dma.done.wait [#allocation10], 1024  }
  0xfd   :  { %6752 = vsyncadd [#allocation10], 4294966272 }
  0xfe   :  { %6753 = dma.done.wait [#allocation13], 32  }
  0xff   :  { %6754 = vsyncadd [#allocation13], 4294967264 }
 0x100   :  { %6755 = dma.done.wait [#allocation16], 1024  }
 0x101   :  { %6756 = vsyncadd [#allocation16], 4294966272 }
 0x102   :  { %6757 = dma.done.wait [#allocation19], 32  }
 0x103   :  { %6758 = vsyncadd [#allocation19], 4294967264 }
 0x104   :  { %6759 = dma.done.wait [#allocation22], 528  }
 0x105   :  { %6760 = vsyncadd [#allocation22], 4294966768 }
 0x106   :  { %6761 = dma.done.wait [#allocation25], 1024  }
 0x107   :  { %6762 = vsyncadd [#allocation25], 4294966272 }
 0x108   :  { %6763 = dma.done.wait [#allocation28], 32  }
 0x109   :  { %6764 = vsyncadd [#allocation28], 4294967264 }
 0x10a   :  { %6765 = dma.done.wait [#allocation31], 1024  }
 0x10b   :  { %6766 = vsyncadd [#allocation31], 4294966272 }
 0x10c   :  { %6767 = dma.done.wait [#allocation34], 32  }
 0x10d   :  { %6768 = vsyncadd [#allocation34], 4294967264 }
 0x10e   :  { %6769 = dma.done.wait [#allocation37], 8704  }
 0x10f   :  { %6770 = vsyncadd [#allocation37], 4294958592  ;;  %v6798_v0 = vmov 0.0   ;;  %vm6799_vm0 = vmmov 0   ;;  %v358_v1 = vld [vmem:[#allocation9 + $0x18] sm:$0xff]  ;;  %v357_v3 = vld [vmem:[#allocation9 + $0x10] sm:$0xff] }
 0x110   :  { %5650 = vmatprep.subr.mxu1 %v6798_v0  ;;  %5658 = vmatprep.mubr.msk.f32.mxu1 %vm6799_vm0, %v6798_v0  ;;  %v7033_v2 = vld [vmem:[#allocation11 + $0x18] sm:$0xff]  ;;  %v7036_v4 = vld [vmem:[#allocation11 + $0x10] sm:$0xff]  ;;  %v356_v5 = vld [vmem:[#allocation9 + $0x8] sm:$0xff]  ;;  %vm366_vm1 = vcmask 261120   ;;  %s6800_s18 = smov 64   ;;  %vm496_vm2 = vcmask 785408  }
 0x111   :  { %5630 = vmatprep.subr.mxu0 %v358_v1  ;;  %5651 = vmatpush3.msra.mxu1 %v7033_v2  ;;  %v7039_v6 = vld [vmem:[#allocation11 + $0x8] sm:$0xff]  ;;  %v355_v7 = vld [vmem:[#allocation9] sm:$0xff]  ;;  %s6801_s23 = smov 96   ;;  %v349_v51 = vld [vmem:[#allocation6 + $0x10] sm:$0xff]  ;;  %s6802_s17 = smov 32   ;;  %vm4621_vm6 = vcmask 523520  }
 0x112   :  { %5631 = vmatpush3.msra.mxu0 %v358_v1  ;;  %5652 = vmatprep.subr.mxu1 %v6798_v0  ;;  %v7043_v8 = vld [vmem:[#allocation11] sm:$0xff]  ;;  %v348_v10 = vld [vmem:[#allocation6 + $0x8] sm:$0xff]  ;;  %v350_v52 = vld [vmem:[#allocation6 + $0x18] sm:$0xff]  ;;  %vm4732_vm7 = vcmask 785920   ;;  %vm4842_vm8 = vcmask 1048320  }
 0x113   :  { %5632 = vmatprep.subr.mxu0 %v357_v3  ;;  %5653 = vmatpush3.msra.mxu1 %v7036_v4  ;;  %v347_v9 = vld [vmem:[#allocation6] sm:$0xff]  ;;  %v352_v54 = vld [vmem:[#allocation6 + $0x28] sm:$0xff]  ;;  %v353_v55 = vld [vmem:[#allocation6 + $0x30] sm:$0xff] }
 0x114   :  { %5633 = vmatpush3.msra.mxu0 %v357_v3  ;;  %5654 = vmatprep.subr.mxu1 %v6798_v0  ;;  %v5313_v11 = vld [vmem:[#allocation14] ss:$0 sm:$0xff]  ;;  %v7074_v15 = vld [vmem:[#allocation12] ss:$0 sm:$0xff]  ;;  %v354_v56 = vld [vmem:[#allocation6 + $0x38] sm:$0xff] }
 0x115   :  { %5634 = vmatprep.subr.mxu0 %v356_v5  ;;  %5655 = vmatpush3.msra.mxu1 %v7039_v6  ;;  %v351_v53 = vld [vmem:[#allocation6 + $0x20] sm:$0xff] }
 0x116   :  { %5635 = vmatpush3.msra.mxu0 %v356_v5  ;;  %5656 = vmatprep.subr.mxu1 %v6798_v0 }
 0x117   :  { %5636 = vmatprep.subr.mxu0 %v355_v7  ;;  %5657 = vmatpush3.msra.mxu1 %v7043_v8 }
 0x118   :  { %5637 = vmatpush3.msra.mxu0 %v355_v7  ;;  %5638 = vmatprep.mubr.msk.f32.mxu0 %vm366_vm1, %v347_v9 }
 0x119   :  { %5659 = vmatmul.mubr.f32.vlgmr.msra.gmra.mxu1 %v6798_v0  ;;  %5639 = vmatmul.mubr.msk.f32.vlgmr.msra.gmra.mxu0 %vm366_vm1, %v348_v10 }
 0x11a   :  { %596 = vrot.lane.b32.xlu0 %v5313_v11, %s6800_s18  ;;  %5661 = vmatprep.subr.mxu1 %v6798_v0 }
 0x11b   :  { %5662 = vmatpush3.msra.mxu1 %v7033_v2  ;;  %5669 = vmatprep.mubr.msk.f32.mxu1 %vm6799_vm0, %v6798_v0 }
 0x11c   :  { %5663 = vmatprep.subr.mxu1 %v6798_v0  ;;  %5672 = vmatprep.subr.mxu0 %v6798_v0 }
 0x11d   :  { %5664 = vmatpush3.msra.mxu1 %v7036_v4  ;;  %5673 = vmatpush3.msra.mxu0 %v7033_v2 }
 0x11e   :  { %5665 = vmatprep.subr.mxu1 %v6798_v0  ;;  %5674 = vmatprep.subr.mxu0 %v6798_v0 }
 0x11f   :  { %5666 = vmatpush3.msra.mxu1 %v7039_v6  ;;  %5675 = vmatpush3.msra.mxu0 %v7036_v4 }
 0x120   :  { %5667 = vmatprep.subr.mxu1 %v6798_v0  ;;  %5676 = vmatprep.subr.mxu0 %v6798_v0 }
 0x121   :  { %5668 = vmatpush3.msra.mxu1 %v7043_v8  ;;  %5677 = vmatpush3.msra.mxu0 %v7039_v6 }
 0x122   :  { %5678 = vmatprep.subr.mxu0 %v6798_v0  ;;  %5683 = vmatprep.subr.mxu1 %v6798_v0 }
 0x123   :  { %5679 = vmatpush3.msra.mxu0 %v7043_v8  ;;  %5641 = vmatprep.mubr.msk.f32.mxu0 %vm366_vm1, %v349_v51 }
 0x124   :  { %5694 = vmatprep.subr.mxu0 %v6798_v0  ;;  %5642 = vmatmul.mubr.msk.f32.gmra.mxu0 %vm366_vm1, %v350_v52 }
 0x125   :  { %5644 = vmatprep.mubr.msk.f32.mxu0 %vm366_vm1, %v351_v53 }
 0x128   :  { %5645 = vmatmul.mubr.msk.f32.gmra.mxu0 %vm366_vm1, %v352_v54 }
 0x129   :  { %5647 = vmatprep.mubr.msk.f32.mxu0 %vm366_vm1, %v353_v55 }
 0x12c   :  { %5648 = vmatmul.mubr.msk.f32.gmra.mxu0 %vm366_vm1, %v354_v56 }
 0x12d   :  { %5680 = vmatprep.mubr.msk.f32.mxu0 %vm6799_vm0, %v6798_v0 }
 0x18c   :  { %v7072_v12 = vpop.permute.xlu0 %596 }
 0x1d9   :  { %v585_v13 = vpop.f32.mrf.mxu1  ;;  %v5640_v14 = vpop.f32.mrf.mxu0 }
 0x1da   :  { %v599_v16 = vadd.f32 %v7072_v12, %v585_v13  ;;  %v463_v17 = vadd.f32 %v5640_v14, %v7074_v15 }
 0x1db   :  { %v5660_v18 = vpop.f32.mrf.mxu1  ;;  %v457_v19 = vpop.f32.mrf.mxu0 }
 0x1dc   :  { %498 = vst.msk [vmem:[#allocation2 + $0x8] sm:$0xff] %vm496_vm2, %v463_v17  ;;  %601 = vrot.lane.b32.xlu0 %v599_v16, %s6800_s18  ;;  %v458_v20 = vadd.f32 %v7074_v15, %v457_v19 }
 0x1de   :  { %497 = vst.msk [vmem:[#allocation2] sm:$0xff] %vm496_vm2, %v458_v20 }
 0x1e3   :  { %v624_v41 = vld [vmem:[#allocation2 + $0x8] sm:$0xff] }
 0x1e4   :  { %v5643_v63 = vpop.f32.mrf.mxu0 }
 0x1e5   :  { %v515_v21 = vld [vmem:[#allocation2] sm:$0xff]  ;;  %v473_v1 = vadd.f32 %v5643_v63, %v7074_v15 }
 0x1e6   :  { %v589_v22 = vadd.f32 %v585_v13, %v515_v21  ;;  %v467_v3 = vpop.f32.mrf.mxu0 }
 0x1e7   :  { %500 = vst.msk [vmem:[#allocation2 + $0x18] sm:$0xff] %vm496_vm2, %v473_v1  ;;  %v468_v5 = vadd.f32 %v7074_v15, %v467_v3 }
 0x1e8   :  { %v5314_v23 = vmul.f32 -1.442695, %v589_v22  ;;  %v5646_v7 = vpop.f32.mrf.mxu0 }
 0x1e9   :  { %499 = vst.msk [vmem:[#allocation2 + $0x10] sm:$0xff] %vm496_vm2, %v468_v5  ;;  %v483_v9 = vadd.f32 %v5646_v7, %v7074_v15 }
 0x1ea   :  { %6117 = vpow2.f32 %v5314_v23  ;;  %v477_v10 = vpop.f32.mrf.mxu0 }
 0x1eb   :  { %502 = vst.msk [vmem:[#allocation2 + $0x28] sm:$0xff] %vm496_vm2, %v483_v9  ;;  %v478_v11 = vadd.f32 %v7074_v15, %v477_v10 }
 0x1ec   :  { %v5649_v13 = vpop.f32.mrf.mxu0 }
 0x1ed   :  { %501 = vst.msk [vmem:[#allocation2 + $0x20] sm:$0xff] %vm496_vm2, %v478_v11  ;;  %v493_v14 = vadd.f32 %v5649_v13, %v7074_v15 }
 0x1ee   :  { %v487_v16 = vpop.f32.mrf.mxu0 }
 0x1ef   :  { %504 = vst.msk [vmem:[#allocation2 + $0x38] sm:$0xff] %vm496_vm2, %v493_v14  ;;  %v488_v17 = vadd.f32 %v7074_v15, %v487_v16 }
 0x1f1   :  { %503 = vst.msk [vmem:[#allocation2 + $0x30] sm:$0xff] %vm496_vm2, %v488_v17 }
 0x1f7   :  { %v6118_v24 = vpop.eup %6117 }
 0x1f8   :  { %v593_v25 = vadd.f32 1.0, %v6118_v24 }
 0x1fa   :  { %6119 = vrcp.f32 %v593_v25 }
 0x207   :  { %v6120_v26 = vpop.eup %6119 }
 0x208   :  { %v611_v32 = vsub.f32 1.0, %v6120_v26  ;;  %v617_v34 = vmul.f32 0.0, %v6120_v26 }
 0x24e   :  { %v602_v27 = vpop.permute.xlu0 %601 }
 0x24f   :  { %v604_v28 = vmul.f32 %v6120_v26, %v602_v27 }
 0x251   :  { %606 = vrot.lane.b32.xlu1 %v604_v28, %s6800_s18 }
 0x2c3   :  { %v607_v29 = vpop.permute.xlu1 %606 }
 0x2c4   :  { %v609_v30 = vadd.f32 %v607_v29, %v515_v21  ;;  %v729_v21 = vld [vmem:[#allocation2 + $0x10] sm:$0xff] }
 0x2c6   :  { %6121 = vtanh.f32 %v609_v30 }
 0x2d3   :  { %v6122_v31 = vpop.eup %6121 }
 0x2d4   :  { %613 = vrot.lane.b32.xlu1 %v6122_v31, %s6801_s23 }
 0x346   :  { %v614_v33 = vpop.permute.xlu1 %613 }
 0x347   :  { %v616_v35 = vmul.f32 %v614_v33, %v611_v32 }
 0x349   :  { %v618_v36 = vadd.f32 %v617_v34, %v616_v35 }
 0x34b   :  { %620 = vrot.lane.b32.xlu0 %v618_v36, %s6801_s23 }
 0x3bd   :  { %v621_v37 = vpop.permute.xlu0 %620 }
 0x3be   :  { %623 = vst.msk [vmem:[#allocation4] sm:$0xff] %vm366_vm1, %v621_v37  ;;  %5670 = vmatmul.mubr.msk.f32.vlgmr.msra.gmra.mxu1 %vm366_vm1, %v621_v37 }
 0x3bf   :  { %5684 = vmatpush3.msra.mxu1 %v7033_v2  ;;  %5691 = vmatprep.mubr.msk.f32.mxu1 %vm6799_vm0, %v6798_v0 }
 0x3c0   :  { %5685 = vmatprep.subr.mxu1 %v6798_v0 }
 0x3c1   :  { %5686 = vmatpush3.msra.mxu1 %v7036_v4 }
 0x3c2   :  { %5687 = vmatprep.subr.mxu1 %v6798_v0 }
 0x3c3   :  { %5688 = vmatpush3.msra.mxu1 %v7039_v6 }
 0x3c4   :  { %5689 = vmatprep.subr.mxu1 %v6798_v0 }
 0x3c5   :  { %5690 = vmatpush3.msra.mxu1 %v7043_v8 }
 0x3c6   :  { %5705 = vmatprep.subr.mxu1 %v6798_v0 }
 0x47e   :  { %v693_v38 = vpop.f32.mrf.mxu1 }
 0x47f   :  { %v704_v39 = vadd.f32 %v693_v38, %v7072_v12  ;;  %v697_v42 = vadd.f32 %v693_v38, %v624_v41 }
 0x480   :  { %v5671_v40 = vpop.f32.mrf.mxu1 }
 0x481   :  { %706 = vrot.lane.b32.xlu1 %v704_v39, %s6800_s18  ;;  %v5316_v43 = vmul.f32 -1.442695, %v697_v42 }
 0x483   :  { %6123 = vpow2.f32 %v5316_v43 }
 0x490   :  { %v6124_v44 = vpop.eup %6123 }
 0x491   :  { %v701_v45 = vadd.f32 1.0, %v6124_v44 }
 0x493   :  { %6125 = vrcp.f32 %v701_v45 }
 0x4a0   :  { %v6126_v46 = vpop.eup %6125 }
 0x4a1   :  { %v716_v58 = vsub.f32 1.0, %v6126_v46  ;;  %v722_v60 = vmul.f32 %v6126_v46, %v618_v36 }
 0x4f3   :  { %v707_v47 = vpop.permute.xlu1 %706 }
 0x4f4   :  { %v709_v48 = vmul.f32 %v6126_v46, %v707_v47 }
 0x4f6   :  { %711 = vrot.lane.b32.xlu0 %v709_v48, %s6800_s18 }
 0x568   :  { %v712_v49 = vpop.permute.xlu0 %711 }
 0x569   :  { %v714_v50 = vadd.f32 %v712_v49, %v624_v41  ;;  %v834_v41 = vld [vmem:[#allocation2 + $0x18] sm:$0xff] }
 0x56b   :  { %6127 = vtanh.f32 %v714_v50 }
 0x578   :  { %v6128_v57 = vpop.eup %6127 }
 0x579   :  { %718 = vrot.lane.b32.xlu1 %v6128_v57, %s6801_s23 }
 0x5eb   :  { %v719_v59 = vpop.permute.xlu1 %718 }
 0x5ec   :  { %v721_v61 = vmul.f32 %v719_v59, %v716_v58 }
 0x5ee   :  { %v723_v62 = vadd.f32 %v722_v60, %v721_v61  ;;  %v939_v61 = vld [vmem:[#allocation2 + $0x20] sm:$0xff] }
 0x5f0   :  { %725 = vrot.lane.b32.xlu0 %v723_v62, %s6801_s23 }
 0x662   :  { %v726_v18 = vpop.permute.xlu0 %725 }
 0x663   :  { %728 = vst.msk [vmem:[#allocation4 + $0x8] sm:$0xff] %vm366_vm1, %v726_v18  ;;  %5681 = vmatmul.mubr.msk.f32.vlgmr.msra.gmra.mxu0 %vm366_vm1, %v726_v18 }
 0x664   :  { %5695 = vmatpush3.msra.mxu0 %v7033_v2  ;;  %5702 = vmatprep.mubr.msk.f32.mxu0 %vm6799_vm0, %v6798_v0 }
 0x665   :  { %5696 = vmatprep.subr.mxu0 %v6798_v0 }
 0x666   :  { %5697 = vmatpush3.msra.mxu0 %v7036_v4 }
 0x667   :  { %5698 = vmatprep.subr.mxu0 %v6798_v0 }
 0x668   :  { %5699 = vmatpush3.msra.mxu0 %v7039_v6 }
 0x669   :  { %5700 = vmatprep.subr.mxu0 %v6798_v0 }
 0x66a   :  { %5701 = vmatpush3.msra.mxu0 %v7043_v8 }
 0x66b   :  { %5716 = vmatprep.subr.mxu0 %v6798_v0 }
 0x723   :  { %v798_v15 = vpop.f32.mrf.mxu0 }
 0x724   :  { %v809_v19 = vadd.f32 %v798_v15, %v7072_v12  ;;  %v802_v22 = vadd.f32 %v798_v15, %v729_v21 }
 0x725   :  { %v5682_v20 = vpop.f32.mrf.mxu0 }
 0x726   :  { %811 = vrot.lane.b32.xlu1 %v809_v19, %s6800_s18  ;;  %v5318_v23 = vmul.f32 -1.442695, %v802_v22  ;;  %v1044_v22 = vld [vmem:[#allocation2 + $0x28] sm:$0xff] }
 0x728   :  { %6129 = vpow2.f32 %v5318_v23 }
 0x735   :  { %v6130_v24 = vpop.eup %6129 }
 0x736   :  { %v806_v25 = vadd.f32 1.0, %v6130_v24 }
 0x738   :  { %6131 = vrcp.f32 %v806_v25 }
 0x745   :  { %v6132_v26 = vpop.eup %6131 }
 0x746   :  { %v821_v32 = vsub.f32 1.0, %v6132_v26  ;;  %v827_v34 = vmul.f32 %v6132_v26, %v723_v62 }
 0x798   :  { %v812_v27 = vpop.permute.xlu1 %811 }
 0x799   :  { %v814_v28 = vmul.f32 %v6132_v26, %v812_v27 }
 0x79b   :  { %816 = vrot.lane.b32.xlu0 %v814_v28, %s6800_s18 }
 0x80d   :  { %v817_v29 = vpop.permute.xlu0 %816 }
 0x80e   :  { %v819_v30 = vadd.f32 %v817_v29, %v729_v21  ;;  %v1370_v29 = vld [vmem:[#allocation15 + $0x18] sm:$0xff] }
 0x810   :  { %6133 = vtanh.f32 %v819_v30 }
 0x81d   :  { %v6134_v31 = vpop.eup %6133 }
 0x81e   :  { %823 = vrot.lane.b32.xlu1 %v6134_v31, %s6801_s23 }
 0x890   :  { %v824_v33 = vpop.permute.xlu1 %823 }
 0x891   :  { %v826_v35 = vmul.f32 %v824_v33, %v821_v32 }
 0x893   :  { %v828_v36 = vadd.f32 %v827_v34, %v826_v35 }
 0x895   :  { %830 = vrot.lane.b32.xlu0 %v828_v36, %s6801_s23 }
 0x907   :  { %v831_v37 = vpop.permute.xlu0 %830 }
 0x908   :  { %833 = vst.msk [vmem:[#allocation4 + $0x10] sm:$0xff] %vm366_vm1, %v831_v37  ;;  %5692 = vmatmul.mubr.msk.f32.vlgmr.msra.gmra.mxu1 %vm366_vm1, %v831_v37  ;;  %v1369_v37 = vld [vmem:[#allocation15 + $0x10] sm:$0xff] }
 0x909   :  { %5706 = vmatpush3.msra.mxu1 %v7033_v2  ;;  %5713 = vmatprep.mubr.msk.f32.mxu1 %vm6799_vm0, %v6798_v0 }
 0x90a   :  { %5707 = vmatprep.subr.mxu1 %v6798_v0 }
 0x90b   :  { %5708 = vmatpush3.msra.mxu1 %v7036_v4 }
 0x90c   :  { %5709 = vmatprep.subr.mxu1 %v6798_v0 }
 0x90d   :  { %5710 = vmatpush3.msra.mxu1 %v7039_v6 }
 0x90e   :  { %5711 = vmatprep.subr.mxu1 %v6798_v0 }
 0x90f   :  { %5712 = vmatpush3.msra.mxu1 %v7043_v8 }
 0x910   :  { %5727 = vmatprep.subr.mxu1 %v6798_v0 }
 0x9c8   :  { %v903_v38 = vpop.f32.mrf.mxu1 }
 0x9c9   :  { %v914_v39 = vadd.f32 %v903_v38, %v7072_v12  ;;  %v907_v42 = vadd.f32 %v903_v38, %v834_v41  ;;  %v1359_v38 = vld [vmem:[#allocation4] sm:$0xff] }
 0x9ca   :  { %v5693_v40 = vpop.f32.mrf.mxu1 }
 0x9cb   :  { %916 = vrot.lane.b32.xlu1 %v914_v39, %s6800_s18  ;;  %v5320_v43 = vmul.f32 -1.442695, %v907_v42  ;;  %v1368_v39 = vld [vmem:[#allocation15 + $0x8] sm:$0xff]  ;;  %v1367_v40 = vld [vmem:[#allocation15] sm:$0xff] }
 0x9cc   :  { %v1361_v42 = vld [vmem:[#allocation4 + $0x10] sm:$0xff] }
 0x9cd   :  { %6135 = vpow2.f32 %v5320_v43 }
 0x9da   :  { %v6136_v44 = vpop.eup %6135 }
 0x9db   :  { %v911_v45 = vadd.f32 1.0, %v6136_v44 }
 0x9dd   :  { %6137 = vrcp.f32 %v911_v45 }
 0x9ea   :  { %v6138_v46 = vpop.eup %6137 }
 0x9eb   :  { %v926_v52 = vsub.f32 1.0, %v6138_v46  ;;  %v932_v54 = vmul.f32 %v6138_v46, %v828_v36 }
 0xa3d   :  { %v917_v47 = vpop.permute.xlu1 %916 }
 0xa3e   :  { %v919_v48 = vmul.f32 %v6138_v46, %v917_v47 }
 0xa40   :  { %921 = vrot.lane.b32.xlu0 %v919_v48, %s6800_s18 }
 0xab2   :  { %v922_v49 = vpop.permute.xlu0 %921 }
 0xab3   :  { %v924_v50 = vadd.f32 %v922_v49, %v834_v41  ;;  %v1360_v41 = vld [vmem:[#allocation4 + $0x8] sm:$0xff]  ;;  %v7203_v49 = vld [vmem:[#allocation18] ss:$0 sm:$0xff] }
 0xab5   :  { %6139 = vtanh.f32 %v924_v50 }
 0xac2   :  { %v6140_v51 = vpop.eup %6139 }
 0xac3   :  { %928 = vrot.lane.b32.xlu1 %v6140_v51, %s6801_s23 }
 0xb35   :  { %v929_v53 = vpop.permute.xlu1 %928 }
 0xb36   :  { %v931_v55 = vmul.f32 %v929_v53, %v926_v52 }
 0xb38   :  { %v933_v56 = vadd.f32 %v932_v54, %v931_v55 }
 0xb3a   :  { %935 = vrot.lane.b32.xlu0 %v933_v56, %s6801_s23 }
 0xbac   :  { %v936_v57 = vpop.permute.xlu0 %935 }
 0xbad   :  { %938 = vst.msk [vmem:[#allocation4 + $0x18] sm:$0xff] %vm366_vm1, %v936_v57  ;;  %5703 = vmatmul.mubr.msk.f32.vlgmr.msra.gmra.mxu0 %vm366_vm1, %v936_v57 }
 0xbae   :  { %5717 = vmatpush3.msra.mxu0 %v7033_v2  ;;  %5724 = vmatprep.mubr.msk.f32.mxu0 %vm6799_vm0, %v6798_v0 }
 0xbaf   :  { %5718 = vmatprep.subr.mxu0 %v6798_v0 }
 0xbb0   :  { %5719 = vmatpush3.msra.mxu0 %v7036_v4 }
 0xbb1   :  { %5720 = vmatprep.subr.mxu0 %v6798_v0 }
 0xbb2   :  { %5721 = vmatpush3.msra.mxu0 %v7039_v6 }
 0xbb3   :  { %5722 = vmatprep.subr.mxu0 %v6798_v0 }
 0xbb4   :  { %5723 = vmatpush3.msra.mxu0 %v7043_v8  ;;  %v1362_v43 = vld [vmem:[#allocation4 + $0x18] sm:$0xff] }
 0xbb5   :  { %5738 = vmatprep.subr.mxu0 %v1370_v29 }
 0xc6d   :  { %v1008_v58 = vpop.f32.mrf.mxu0 }
 0xc6e   :  { %v1019_v59 = vadd.f32 %v1008_v58, %v7072_v12  ;;  %v1012_v62 = vadd.f32 %v1008_v58, %v939_v61 }
 0xc6f   :  { %v5704_v60 = vpop.f32.mrf.mxu0 }
 0xc70   :  { %1021 = vrot.lane.b32.xlu1 %v1019_v59, %s6800_s18  ;;  %v5322_v63 = vmul.f32 -1.442695, %v1012_v62  ;;  %v1149_v62 = vld [vmem:[#allocation2 + $0x30] sm:$0xff] }
 0xc72   :  { %6141 = vpow2.f32 %v5322_v63 }
 0xc7f   :  { %v6142_v1 = vpop.eup %6141 }
 0xc80   :  { %v1016_v3 = vadd.f32 1.0, %v6142_v1 }
 0xc82   :  { %6143 = vrcp.f32 %v1016_v3 }
 0xc8f   :  { %v6144_v5 = vpop.eup %6143 }
 0xc90   :  { %v1031_v14 = vsub.f32 1.0, %v6144_v5  ;;  %v1037_v17 = vmul.f32 %v6144_v5, %v933_v56 }
 0xce2   :  { %v1022_v7 = vpop.permute.xlu1 %1021 }
 0xce3   :  { %v1024_v9 = vmul.f32 %v6144_v5, %v1022_v7 }
 0xce5   :  { %1026 = vrot.lane.b32.xlu0 %v1024_v9, %s6800_s18 }
 0xd57   :  { %v1027_v10 = vpop.permute.xlu0 %1026 }
 0xd58   :  { %v1029_v11 = vadd.f32 %v1027_v10, %v939_v61 }
 0xd5a   :  { %6145 = vtanh.f32 %v1029_v11 }
 0xd67   :  { %v6146_v13 = vpop.eup %6145 }
 0xd68   :  { %1033 = vrot.lane.b32.xlu1 %v6146_v13, %s6801_s23 }
 0xdda   :  { %v1034_v16 = vpop.permute.xlu1 %1033 }
 0xddb   :  { %v1036_v18 = vmul.f32 %v1034_v16, %v1031_v14 }
 0xddd   :  { %v1038_v15 = vadd.f32 %v1037_v17, %v1036_v18 }
 0xddf   :  { %1040 = vrot.lane.b32.xlu0 %v1038_v15, %s6801_s23 }
 0xe51   :  { %v1041_v19 = vpop.permute.xlu0 %1040 }
 0xe52   :  { %1043 = vst.msk [vmem:[#allocation4 + $0x20] sm:$0xff] %vm366_vm1, %v1041_v19  ;;  %5714 = vmatmul.mubr.msk.f32.vlgmr.msra.gmra.mxu1 %vm366_vm1, %v1041_v19 }
 0xe53   :  { %5728 = vmatpush3.msra.mxu1 %v7033_v2  ;;  %5735 = vmatprep.mubr.msk.f32.mxu1 %vm6799_vm0, %v6798_v0 }
 0xe54   :  { %5729 = vmatprep.subr.mxu1 %v6798_v0 }
 0xe55   :  { %5730 = vmatpush3.msra.mxu1 %v7036_v4 }
 0xe56   :  { %5731 = vmatprep.subr.mxu1 %v6798_v0 }
 0xe57   :  { %5732 = vmatpush3.msra.mxu1 %v7039_v6 }
 0xe58   :  { %5733 = vmatprep.subr.mxu1 %v6798_v0 }
 0xe59   :  { %5734 = vmatpush3.msra.mxu1 %v7043_v8  ;;  %v1363_v44 = vld [vmem:[#allocation4 + $0x20] sm:$0xff] }
 0xe5a   :  { %5758 = vmatprep.subr.mxu1 %v6798_v0 }
 0xf12   :  { %v1113_v20 = vpop.f32.mrf.mxu1 }
 0xf13   :  { %v1124_v2 = vadd.f32 %v1113_v20, %v7072_v12  ;;  %v1117_v23 = vadd.f32 %v1113_v20, %v1044_v22 }
 0xf14   :  { %v5715_v21 = vpop.f32.mrf.mxu1 }
 0xf15   :  { %1126 = vrot.lane.b32.xlu1 %v1124_v2, %s6800_s18  ;;  %v5324_v24 = vmul.f32 -1.442695, %v1117_v23 }
 0xf17   :  { %6147 = vpow2.f32 %v5324_v24  ;;  %v1254_v24 = vld [vmem:[#allocation2 + $0x38] sm:$0xff] }
 0xf24   :  { %v6148_v4 = vpop.eup %6147 }
 0xf25   :  { %v1121_v25 = vadd.f32 1.0, %v6148_v4 }
 0xf27   :  { %6149 = vrcp.f32 %v1121_v25 }
 0xf34   :  { %v6150_v6 = vpop.eup %6149 }
 0xf35   :  { %v1136_v31 = vsub.f32 1.0, %v6150_v6  ;;  %v1142_v33 = vmul.f32 %v6150_v6, %v1038_v15 }
 0xf87   :  { %v1127_v26 = vpop.permute.xlu1 %1126 }
 0xf88   :  { %v1129_v27 = vmul.f32 %v6150_v6, %v1127_v26 }
 0xf8a   :  { %1131 = vrot.lane.b32.xlu0 %v1129_v27, %s6800_s18 }
 0xffc   :  { %v1132_v8 = vpop.permute.xlu0 %1131 }
 0xffd   :  { %v1134_v28 = vadd.f32 %v1132_v8, %v1044_v22 }
 0xfff   :  { %6151 = vtanh.f32 %v1134_v28 }
0x100c   :  { %v6152_v30 = vpop.eup %6151 }
0x100d   :  { %1138 = vrot.lane.b32.xlu1 %v6152_v30, %s6801_s23 }
0x107f   :  { %v1139_v32 = vpop.permute.xlu1 %1138 }
0x1080   :  { %v1141_v34 = vmul.f32 %v1139_v32, %v1136_v31  ;;  %v1528_v31 = vld [vmem:[#allocation21 + $0x18] sm:$0xff]  ;;  %v1526_v32 = vld [vmem:[#allocation21 + $0x8] sm:$0xff] }
0x1082   :  { %v7188_v35 = vadd.f32 %v1142_v33, %v1141_v34  ;;  %v1525_v33 = vld [vmem:[#allocation21] sm:$0xff] }
0x1084   :  { %1145 = vrot.lane.b32.xlu0 %v7188_v35, %s6801_s23 }
0x10f6   :  { %v1146_v36 = vpop.permute.xlu0 %1145 }
0x10f7   :  { %1148 = vst.msk [vmem:[#allocation4 + $0x28] sm:$0xff] %vm366_vm1, %v1146_v36  ;;  %5725 = vmatmul.mubr.msk.f32.vlgmr.msra.gmra.mxu0 %vm366_vm1, %v1146_v36 }
0x10f8   :  { %5739 = vmatpush3.msra.mxu0 %v1370_v29  ;;  %5746 = vmatprep.mubr.msk.f32.mxu0 %vm366_vm1, %v1359_v38 }
0x10f9   :  { %5740 = vmatprep.subr.mxu0 %v1369_v37 }
0x10fa   :  { %5741 = vmatpush3.msra.mxu0 %v1369_v37  ;;  %v7234_v37 = vld [vmem:[#allocation17 + $0x18] sm:$0xff] }
0x10fb   :  { %5742 = vmatprep.subr.mxu0 %v1368_v39 }
0x10fc   :  { %5743 = vmatpush3.msra.mxu0 %v1368_v39 }
0x10fd   :  { %5744 = vmatprep.subr.mxu0 %v1367_v40 }
0x10fe   :  { %5745 = vmatpush3.msra.mxu0 %v1367_v40  ;;  %v1364_v45 = vld [vmem:[#allocation4 + $0x28] sm:$0xff] }
0x10ff   :  { %5747 = vmatmul.mubr.msk.f32.vlgmr.msra.gmra.mxu0 %vm366_vm1, %v1360_v41  ;;  %5780 = vmatprep.subr.mxu0 %v6798_v0 }
0x1100   :  { %5749 = vmatprep.mubr.msk.f32.mxu0 %vm366_vm1, %v1361_v42  ;;  %5781 = vmatpush3.msra.mxu0 %v7234_v37 }
0x1101   :  { %5782 = vmatprep.subr.mxu0 %v6798_v0 }
0x1103   :  { %5750 = vmatmul.mubr.msk.f32.gmra.mxu0 %vm366_vm1, %v1362_v43  ;;  %v7251_v43 = vld [vmem:[#allocation17 + $0x10] sm:$0xff] }
0x1104   :  { %5752 = vmatprep.mubr.msk.f32.mxu0 %vm366_vm1, %v1363_v44  ;;  %5783 = vmatpush3.msra.mxu0 %v7251_v43  ;;  %v7256_v44 = vld [vmem:[#allocation17 + $0x8] sm:$0xff] }
0x1105   :  { %5784 = vmatprep.subr.mxu0 %v6798_v0 }
0x1106   :  { %5785 = vmatpush3.msra.mxu0 %v7256_v44 }
0x1107   :  { %5753 = vmatmul.mubr.msk.f32.gmra.mxu0 %vm366_vm1, %v1364_v45  ;;  %v7262_v45 = vld [vmem:[#allocation17] sm:$0xff]  ;;  %5786 = vmatprep.subr.mxu0 %v6798_v0 }
0x1108   :  { %5787 = vmatpush3.msra.mxu0 %v7262_v45 }
0x1109   :  { %5802 = vmatprep.subr.mxu0 %v6798_v0 }
0x11b7   :  { %v1218_v46 = vpop.f32.mrf.mxu0 }
0x11b8   :  { %v1229_v47 = vadd.f32 %v1218_v46, %v7072_v12  ;;  %v1222_v63 = vadd.f32 %v1218_v46, %v1149_v62  ;;  %v5338_v46 = vld [vmem:[#allocation20] ss:$0 sm:$0xff] }
0x11b9   :  { %v5726_v48 = vpop.f32.mrf.mxu0 }
0x11ba   :  { %1231 = vrot.lane.b32.xlu1 %v1229_v47, %s6800_s18  ;;  %v5326_v1 = vmul.f32 -1.442695, %v1222_v63  ;;  %v5339_v47 = vld [vmem:[#allocation23] ss:$0 sm:$0xff] }
0x11bc   :  { %6153 = vpow2.f32 %v5326_v1 }
0x11bf   :  { %v5748_v50 = vpop.f32.mrf.mxu0 }
0x11c0   :  { %v1474_v51 = vadd.f32 %v5748_v50, %v7203_v49 }
0x11c1   :  { %v1468_v52 = vpop.f32.mrf.mxu0 }
0x11c2   :  { %1508 = vst.msk [vmem:[#allocation2 + $0x8] sm:$0xff] %vm496_vm2, %v1474_v51  ;;  %v1469_v53 = vadd.f32 %v7203_v49, %v1468_v52 }
0x11c3   :  { %v5751_v54 = vpop.f32.mrf.mxu0 }
0x11c4   :  { %1507 = vst.msk [vmem:[#allocation2] sm:$0xff] %vm496_vm2, %v1469_v53  ;;  %v1484_v55 = vadd.f32 %v5751_v54, %v7203_v49 }
0x11c5   :  { %v1478_v56 = vpop.f32.mrf.mxu0 }
0x11c6   :  { %1510 = vst.msk [vmem:[#allocation2 + $0x18] sm:$0xff] %vm496_vm2, %v1484_v55  ;;  %v1479_v57 = vadd.f32 %v7203_v49, %v1478_v56 }
0x11c7   :  { %v5754_v58 = vpop.f32.mrf.mxu0 }
0x11c8   :  { %1509 = vst.msk [vmem:[#allocation2 + $0x10] sm:$0xff] %vm496_vm2, %v1479_v57  ;;  %v1494_v59 = vadd.f32 %v5754_v58, %v7203_v49 }
0x11c9   :  { %v1488_v60 = vpop.f32.mrf.mxu0  ;;  %v6154_v3 = vpop.eup %6153 }
0x11ca   :  { %1512 = vst.msk [vmem:[#allocation2 + $0x28] sm:$0xff] %vm496_vm2, %v1494_v59  ;;  %v1489_v61 = vadd.f32 %v7203_v49, %v1488_v60  ;;  %v1226_v5 = vadd.f32 1.0, %v6154_v3 }
0x11cc   :  { %1511 = vst.msk [vmem:[#allocation2 + $0x20] sm:$0xff] %vm496_vm2, %v1489_v61  ;;  %6155 = vrcp.f32 %v1226_v5 }
0x11d9   :  { %v6156_v7 = vpop.eup %6155 }
0x11da   :  { %v1241_v16 = vsub.f32 1.0, %v6156_v7  ;;  %v1247_v18 = vmul.f32 %v6156_v7, %v7188_v35 }
0x122c   :  { %v1232_v9 = vpop.permute.xlu1 %1231 }
0x122d   :  { %v1234_v10 = vmul.f32 %v6156_v7, %v1232_v9 }
0x122f   :  { %1236 = vrot.lane.b32.xlu0 %v1234_v10, %s6800_s18 }
0x12a1   :  { %v1237_v11 = vpop.permute.xlu0 %1236 }
0x12a2   :  { %v1239_v13 = vadd.f32 %v1237_v11, %v1149_v62  ;;  %v1611_v62 = vld [vmem:[#allocation2] sm:$0xff] }
0x12a4   :  { %6157 = vtanh.f32 %v1239_v13 }
0x12b1   :  { %v6158_v14 = vpop.eup %6157 }
0x12b2   :  { %1243 = vrot.lane.b32.xlu1 %v6158_v14, %s6801_s23 }
0x1324   :  { %v1244_v17 = vpop.permute.xlu1 %1243 }
0x1325   :  { %v1246_v15 = vmul.f32 %v1244_v17, %v1241_v16 }
0x1327   :  { %v1248_v19 = vadd.f32 %v1247_v18, %v1246_v15 }
0x1329   :  { %1250 = vrot.lane.b32.xlu0 %v1248_v19, %s6801_s23 }
0x139b   :  { %v1251_v20 = vpop.permute.xlu0 %1250 }
0x139c   :  { %1253 = vst.msk [vmem:[#allocation4 + $0x30] sm:$0xff] %vm366_vm1, %v1251_v20  ;;  %5736 = vmatmul.mubr.msk.f32.vlgmr.msra.gmra.mxu1 %vm366_vm1, %v1251_v20 }
0x139d   :  { %5766 = vmatprep.mubr.msk.f32.mxu1 %vm6799_vm0, %v6798_v0  ;;  %5759 = vmatpush3.msra.mxu1 %v1528_v31 }
0x139e   :  { %5760 = vmatprep.subr.mxu1 %v6798_v0 }
0x13a3   :  { %v1365_v2 = vld [vmem:[#allocation4 + $0x30] sm:$0xff] }
0x13a4   :  { %5755 = vmatprep.mubr.msk.f32.mxu0 %vm366_vm1, %v1365_v2 }
0x145c   :  { %v1323_v21 = vpop.f32.mrf.mxu1 }
0x145d   :  { %v1334_v22 = vadd.f32 %v1323_v21, %v7072_v12  ;;  %v1327_v4 = vadd.f32 %v1323_v21, %v1254_v24  ;;  %v1527_v12 = vld [vmem:[#allocation21 + $0x10] sm:$0xff] }
0x145e   :  { %v5737_v23 = vpop.f32.mrf.mxu1  ;;  %5761 = vmatpush3.msra.mxu1 %v1527_v12 }
0x145f   :  { %1336 = vrot.lane.b32.xlu1 %v1334_v22, %s6800_s18  ;;  %v5328_v25 = vmul.f32 -1.442695, %v1327_v4  ;;  %5762 = vmatprep.subr.mxu1 %v6798_v0  ;;  %v1718_v23 = vld [vmem:[#allocation2 + $0x8] sm:$0xff] }
0x1460   :  { %5763 = vmatpush3.msra.mxu1 %v1526_v32 }
0x1461   :  { %6159 = vpow2.f32 %v5328_v25  ;;  %5764 = vmatprep.subr.mxu1 %v6798_v0 }
0x1462   :  { %5765 = vmatpush3.msra.mxu1 %v1525_v33 }
0x1463   :  { %5769 = vmatprep.subr.mxu1 %v6798_v0 }
0x146e   :  { %v6160_v6 = vpop.eup %6159 }
0x146f   :  { %v1331_v26 = vadd.f32 1.0, %v6160_v6 }
0x1471   :  { %6161 = vrcp.f32 %v1331_v26 }
0x147e   :  { %v6162_v27 = vpop.eup %6161 }
0x147f   :  { %v1346_v35 = vsub.f32 1.0, %v6162_v27  ;;  %v1352_v38 = vmul.f32 %v6162_v27, %v1248_v19 }
0x14d1   :  { %v1337_v8 = vpop.permute.xlu1 %1336 }
0x14d2   :  { %v1339_v28 = vmul.f32 %v6162_v27, %v1337_v8 }
0x14d4   :  { %1341 = vrot.lane.b32.xlu0 %v1339_v28, %s6800_s18 }
0x1546   :  { %v1342_v29 = vpop.permute.xlu0 %1341 }
0x1547   :  { %v1344_v30 = vadd.f32 %v1342_v29, %v1254_v24 }
0x1549   :  { %6163 = vtanh.f32 %v1344_v30 }
0x1556   :  { %v6164_v34 = vpop.eup %6163 }
0x1557   :  { %1348 = vrot.lane.b32.xlu1 %v6164_v34, %s6801_s23 }
0x155b   :  { %1692 = vrot.lane.b32.xlu1 %v5338_v46, %s6800_s18 }
0x15c9   :  { %v1349_v36 = vpop.permute.xlu1 %1348 }
0x15ca   :  { %v1351_v39 = vmul.f32 %v1349_v36, %v1346_v35 }
0x15cc   :  { %v7238_v40 = vadd.f32 %v1352_v38, %v1351_v39 }
0x15cd   :  { %v7285_v58 = vpop.permute.xlu1 %1692 }
0x15ce   :  { %1355 = vrot.lane.b32.xlu0 %v7238_v40, %s6801_s23 }
0x1640   :  { %v1356_v41 = vpop.permute.xlu0 %1355 }
0x1641   :  { %1358 = vst.msk [vmem:[#allocation4 + $0x38] sm:$0xff] %vm366_vm1, %v1356_v41  ;;  %5767 = vmatmul.mubr.msk.f32.vlgmr.msra.gmra.mxu1 %vm366_vm1, %v1356_v41  ;;  %v1821_v41 = vld [vmem:[#allocation2 + $0x10] sm:$0xff] }
0x1642   :  { %5770 = vmatpush3.msra.mxu1 %v7234_v37  ;;  %5777 = vmatprep.mubr.msk.f32.mxu1 %vm6799_vm0, %v6798_v0 }
0x1643   :  { %5771 = vmatprep.subr.mxu1 %v6798_v0 }
0x1644   :  { %5772 = vmatpush3.msra.mxu1 %v7251_v43 }
0x1645   :  { %5773 = vmatprep.subr.mxu1 %v6798_v0 }
0x1646   :  { %5774 = vmatpush3.msra.mxu1 %v7256_v44 }
0x1647   :  { %5775 = vmatprep.subr.mxu1 %v6798_v0 }
0x1648   :  { %v1366_v42 = vld [vmem:[#allocation4 + $0x38] sm:$0xff]  ;;  %5776 = vmatpush3.msra.mxu1 %v7262_v45 }
0x1649   :  { %5756 = vmatmul.mubr.msk.f32.gmra.mxu0 %vm366_vm1, %v1366_v42  ;;  %5791 = vmatprep.subr.mxu1 %v6798_v0 }
0x164a   :  { %5788 = vmatprep.mubr.msk.f32.mxu0 %vm6799_vm0, %v6798_v0 }
0x1701   :  { %v1604_v48 = vpop.f32.mrf.mxu1 }
0x1702   :  { %v1605_v50 = vadd.f32 %v5339_v47, %v1604_v48 }
0x1703   :  { %v5768_v51 = vpop.f32.mrf.mxu1 }
0x1704   :  { %vm1608_vm3 = vcmp.gt.f32.partialorder %v1605_v50, 0.0  ;;  %v1609_v52 = vmul.f32 0.2, %v1605_v50 }
0x1706   :  { %v1610_v53 = vsel %vm1608_vm3, %v1605_v50, %v1609_v52 }
0x1707   :  { %5778 = vmatmul.mubr.msk.f32.vlgmr.msra.gmra.mxu1 %vm366_vm1, %v1610_v53 }
0x1708   :  { %5792 = vmatpush3.msra.mxu1 %v7234_v37  ;;  %5799 = vmatprep.mubr.msk.f32.mxu1 %vm6799_vm0, %v6798_v0 }
0x1709   :  { %v5757_v54 = vpop.f32.mrf.mxu0  ;;  %5793 = vmatprep.subr.mxu1 %v6798_v0 }
0x170a   :  { %v1504_v55 = vadd.f32 %v5757_v54, %v7203_v49  ;;  %5794 = vmatpush3.msra.mxu1 %v7251_v43 }
0x170b   :  { %v1498_v56 = vpop.f32.mrf.mxu0  ;;  %5795 = vmatprep.subr.mxu1 %v6798_v0 }
0x170c   :  { %1514 = vst.msk [vmem:[#allocation2 + $0x38] sm:$0xff] %vm496_vm2, %v1504_v55  ;;  %v1499_v57 = vadd.f32 %v7203_v49, %v1498_v56  ;;  %5796 = vmatpush3.msra.mxu1 %v7256_v44 }
0x170d   :  { %5797 = vmatprep.subr.mxu1 %v6798_v0 }
0x170e   :  { %1513 = vst.msk [vmem:[#allocation2 + $0x30] sm:$0xff] %vm496_vm2, %v1499_v57  ;;  %5798 = vmatpush3.msra.mxu1 %v7262_v45 }
0x170f   :  { %5813 = vmatprep.subr.mxu1 %v6798_v0 }
0x17c7   :  { %v1681_v59 = vpop.f32.mrf.mxu1 }
0x17c8   :  { %v1695_v60 = vadd.f32 %v7285_v58, %v1681_v59  ;;  %v1685_v49 = vadd.f32 %v1681_v59, %v1611_v62 }
0x17c9   :  { %v5779_v61 = vpop.f32.mrf.mxu1 }
0x17ca   :  { %1697 = vrot.lane.b32.xlu0 %v1695_v60, %s6800_s18  ;;  %v5342_v63 = vmul.f32 -1.442695, %v1685_v49 }
0x17cc   :  { %6165 = vpow2.f32 %v5342_v63 }
0x17d9   :  { %v6166_v1 = vpop.eup %6165 }
0x17da   :  { %v1689_v3 = vadd.f32 1.0, %v6166_v1 }
0x17dc   :  { %6167 = vrcp.f32 %v1689_v3  ;;  %v1924_v3 = vld [vmem:[#allocation2 + $0x18] sm:$0xff] }
0x17e9   :  { %v6168_v5 = vpop.eup %6167 }
0x17ea   :  { %v1707_v16 = vsub.f32 1.0, %v6168_v5 }
0x183c   :  { %v1698_v7 = vpop.permute.xlu0 %1697 }
0x183d   :  { %v1700_v9 = vmul.f32 %v6168_v5, %v1698_v7 }
0x183f   :  { %1702 = vrot.lane.b32.xlu1 %v1700_v9, %s6800_s18 }
0x1843   :  { %1713 = vrot.lane.b32.xlu1 %v1610_v53, %s6802_s17 }
0x18b1   :  { %v1703_v10 = vpop.permute.xlu1 %1702 }
0x18b2   :  { %v1705_v11 = vadd.f32 %v1703_v10, %v1611_v62 }
0x18b4   :  { %6169 = vtanh.f32 %v1705_v11 }
0x18b5   :  { %v1714_v14 = vpop.permute.xlu1 %1713 }
0x18b6   :  { %v1716_v18 = vmul.f32 %v6168_v5, %v1714_v14 }
0x18c1   :  { %v6170_v13 = vpop.eup %6169 }
0x18c2   :  { %1709 = vrot.lane.b32.xlu0 %v6170_v13, %s6801_s23 }
0x1934   :  { %v1710_v17 = vpop.permute.xlu0 %1709 }
0x1935   :  { %v1712_v15 = vmul.f32 %v1710_v17, %v1707_v16 }
0x1937   :  { %v1717_v19 = vadd.f32 %v1716_v18, %v1712_v15 }
0x1939   :  { %1720 = vrot.lane.b32.xlu0 %v1717_v19, %s6801_s23 }
0x19ab   :  { %v1721_v20 = vpop.permute.xlu0 %1720 }
0x19ac   :  { %5789 = vmatmul.mubr.msk.f32.vlgmr.msra.gmra.mxu0 %vm366_vm1, %v1721_v20 }
0x19ad   :  { %5803 = vmatpush3.msra.mxu0 %v7234_v37  ;;  %5810 = vmatprep.mubr.msk.f32.mxu0 %vm6799_vm0, %v6798_v0 }
0x19ae   :  { %5804 = vmatprep.subr.mxu0 %v6798_v0 }
0x19af   :  { %5805 = vmatpush3.msra.mxu0 %v7251_v43 }
0x19b0   :  { %5806 = vmatprep.subr.mxu0 %v6798_v0 }
0x19b1   :  { %5807 = vmatpush3.msra.mxu0 %v7256_v44 }
0x19b2   :  { %5808 = vmatprep.subr.mxu0 %v6798_v0 }
0x19b3   :  { %5809 = vmatpush3.msra.mxu0 %v7262_v45 }
0x19b4   :  { %5824 = vmatprep.subr.mxu0 %v6798_v0 }
0x1a6c   :  { %v1790_v2 = vpop.f32.mrf.mxu0 }
0x1a6d   :  { %v1801_v21 = vadd.f32 %v1790_v2, %v7285_v58  ;;  %v1794_v24 = vadd.f32 %v1790_v2, %v1718_v23 }
0x1a6e   :  { %v5790_v22 = vpop.f32.mrf.mxu0 }
0x1a6f   :  { %1803 = vrot.lane.b32.xlu1 %v1801_v21, %s6800_s18  ;;  %v5344_v4 = vmul.f32 -1.442695, %v1794_v24 }
0x1a71   :  { %6171 = vpow2.f32 %v5344_v4 }
0x1a7e   :  { %v6172_v25 = vpop.eup %6171 }
0x1a7f   :  { %v1798_v6 = vadd.f32 1.0, %v6172_v25  ;;  %v2027_v25 = vld [vmem:[#allocation2 + $0x20] sm:$0xff] }
0x1a81   :  { %6173 = vrcp.f32 %v1798_v6 }
0x1a8e   :  { %v6174_v26 = vpop.eup %6173 }
0x1a8f   :  { %v1813_v31 = vsub.f32 1.0, %v6174_v26  ;;  %v1819_v32 = vmul.f32 %v6174_v26, %v1717_v19 }
0x1ae1   :  { %v1804_v27 = vpop.permute.xlu1 %1803 }
0x1ae2   :  { %v1806_v8 = vmul.f32 %v6174_v26, %v1804_v27 }
0x1ae4   :  { %1808 = vrot.lane.b32.xlu0 %v1806_v8, %s6800_s18 }
0x1b56   :  { %v1809_v28 = vpop.permute.xlu0 %1808 }
0x1b57   :  { %v1811_v29 = vadd.f32 %v1809_v28, %v1718_v23 }
0x1b59   :  { %6175 = vtanh.f32 %v1811_v29 }
0x1b66   :  { %v6176_v30 = vpop.eup %6175 }
0x1b67   :  { %1815 = vrot.lane.b32.xlu1 %v6176_v30, %s6801_s23 }
0x1bd9   :  { %v1816_v12 = vpop.permute.xlu1 %1815 }
0x1bda   :  { %v1818_v33 = vmul.f32 %v1816_v12, %v1813_v31 }
0x1bdc   :  { %v1820_v34 = vadd.f32 %v1819_v32, %v1818_v33 }
0x1bde   :  { %1823 = vrot.lane.b32.xlu0 %v1820_v34, %s6801_s23 }
0x1c50   :  { %v1824_v35 = vpop.permute.xlu0 %1823 }
0x1c51   :  { %5800 = vmatmul.mubr.msk.f32.vlgmr.msra.gmra.mxu1 %vm366_vm1, %v1824_v35 }
0x1c52   :  { %5814 = vmatpush3.msra.mxu1 %v7234_v37  ;;  %5821 = vmatprep.mubr.msk.f32.mxu1 %vm6799_vm0, %v6798_v0 }
0x1c53   :  { %5815 = vmatprep.subr.mxu1 %v6798_v0 }
0x1c54   :  { %5816 = vmatpush3.msra.mxu1 %v7251_v43 }
0x1c55   :  { %5817 = vmatprep.subr.mxu1 %v6798_v0 }
0x1c56   :  { %5818 = vmatpush3.msra.mxu1 %v7256_v44 }
0x1c57   :  { %5819 = vmatprep.subr.mxu1 %v6798_v0 }
0x1c58   :  { %5820 = vmatpush3.msra.mxu1 %v7262_v45 }
0x1c59   :  { %5835 = vmatprep.subr.mxu1 %v6798_v0 }
0x1d11   :  { %v1893_v36 = vpop.f32.mrf.mxu1 }
0x1d12   :  { %v1904_v38 = vadd.f32 %v1893_v36, %v7285_v58  ;;  %v1897_v42 = vadd.f32 %v1893_v36, %v1821_v41 }
0x1d13   :  { %v5801_v39 = vpop.f32.mrf.mxu1 }
0x1d14   :  { %1906 = vrot.lane.b32.xlu1 %v1904_v38, %s6800_s18  ;;  %v5346_v46 = vmul.f32 -1.442695, %v1897_v42 }
0x1d16   :  { %6177 = vpow2.f32 %v5346_v46  ;;  %v2130_v46 = vld [vmem:[#allocation2 + $0x28] sm:$0xff] }
0x1d23   :  { %v6178_v47 = vpop.eup %6177 }
0x1d24   :  { %v1901_v48 = vadd.f32 1.0, %v6178_v47 }
0x1d26   :  { %6179 = vrcp.f32 %v1901_v48 }
0x1d33   :  { %v6180_v50 = vpop.eup %6179 }
0x1d34   :  { %v1916_v56 = vsub.f32 1.0, %v6180_v50  ;;  %v1922_v59 = vmul.f32 %v6180_v50, %v1820_v34 }
0x1d86   :  { %v1907_v51 = vpop.permute.xlu1 %1906 }
0x1d87   :  { %v1909_v52 = vmul.f32 %v6180_v50, %v1907_v51 }
0x1d89   :  { %1911 = vrot.lane.b32.xlu0 %v1909_v52, %s6800_s18 }
0x1dfb   :  { %v1912_v53 = vpop.permute.xlu0 %1911 }
0x1dfc   :  { %v1914_v54 = vadd.f32 %v1912_v53, %v1821_v41 }
0x1dfe   :  { %6181 = vtanh.f32 %v1914_v54 }
0x1e0b   :  { %v6182_v55 = vpop.eup %6181 }
0x1e0c   :  { %1918 = vrot.lane.b32.xlu1 %v6182_v55, %s6801_s23 }
0x1e7e   :  { %v1919_v57 = vpop.permute.xlu1 %1918 }
0x1e7f   :  { %v1921_v60 = vmul.f32 %v1919_v57, %v1916_v56 }
0x1e81   :  { %v1923_v61 = vadd.f32 %v1922_v59, %v1921_v60 }
0x1e83   :  { %1926 = vrot.lane.b32.xlu0 %v1923_v61, %s6801_s23 }
0x1ef5   :  { %v1927_v62 = vpop.permute.xlu0 %1926 }
0x1ef6   :  { %5811 = vmatmul.mubr.msk.f32.vlgmr.msra.gmra.mxu0 %vm366_vm1, %v1927_v62 }
0x1ef7   :  { %5825 = vmatpush3.msra.mxu0 %v7234_v37  ;;  %5832 = vmatprep.mubr.msk.f32.mxu0 %vm6799_vm0, %v6798_v0 }
0x1ef8   :  { %5826 = vmatprep.subr.mxu0 %v6798_v0 }
0x1ef9   :  { %5827 = vmatpush3.msra.mxu0 %v7251_v43 }
0x1efa   :  { %5828 = vmatprep.subr.mxu0 %v6798_v0 }
0x1efb   :  { %5829 = vmatpush3.msra.mxu0 %v7256_v44 }
0x1efc   :  { %5830 = vmatprep.subr.mxu0 %v6798_v0 }
0x1efd   :  { %5831 = vmatpush3.msra.mxu0 %v7262_v45 }
0x1efe   :  { %5846 = vmatprep.subr.mxu0 %v6798_v0 }
0x1fb6   :  { %v1996_v49 = vpop.f32.mrf.mxu0 }
0x1fb7   :  { %v2007_v63 = vadd.f32 %v1996_v49, %v7285_v58  ;;  %v2000_v5 = vadd.f32 %v1996_v49, %v1924_v3 }
0x1fb8   :  { %v5812_v1 = vpop.f32.mrf.mxu0 }
0x1fb9   :  { %2009 = vrot.lane.b32.xlu1 %v2007_v63, %s6800_s18  ;;  %v5348_v7 = vmul.f32 -1.442695, %v2000_v5  ;;  %v2233_v1 = vld [vmem:[#allocation2 + $0x30] sm:$0xff] }
0x1fbb   :  { %6183 = vpow2.f32 %v5348_v7 }
0x1fc8   :  { %v6184_v9 = vpop.eup %6183 }
0x1fc9   :  { %v2004_v10 = vadd.f32 1.0, %v6184_v9 }
0x1fcb   :  { %6185 = vrcp.f32 %v2004_v10 }
0x1fd8   :  { %v6186_v11 = vpop.eup %6185 }
0x1fd9   :  { %v2019_v15 = vsub.f32 1.0, %v6186_v11  ;;  %v2025_v20 = vmul.f32 %v6186_v11, %v1923_v61 }
0x202b   :  { %v2010_v13 = vpop.permute.xlu1 %2009 }
0x202c   :  { %v2012_v14 = vmul.f32 %v6186_v11, %v2010_v13 }
0x202e   :  { %2014 = vrot.lane.b32.xlu0 %v2012_v14, %s6800_s18 }
0x20a0   :  { %v2015_v16 = vpop.permute.xlu0 %2014 }
0x20a1   :  { %v2017_v17 = vadd.f32 %v2015_v16, %v1924_v3 }
0x20a3   :  { %6187 = vtanh.f32 %v2017_v17 }
0x20b0   :  { %v6188_v18 = vpop.eup %6187 }
0x20b1   :  { %2021 = vrot.lane.b32.xlu1 %v6188_v18, %s6801_s23 }
0x2123   :  { %v2022_v19 = vpop.permute.xlu1 %2021 }
0x2124   :  { %v2024_v2 = vmul.f32 %v2022_v19, %v2019_v15 }
0x2126   :  { %v2026_v21 = vadd.f32 %v2025_v20, %v2024_v2 }
0x2128   :  { %2029 = vrot.lane.b32.xlu0 %v2026_v21, %s6801_s23 }
0x219a   :  { %v2030_v22 = vpop.permute.xlu0 %2029 }
0x219b   :  { %5822 = vmatmul.mubr.msk.f32.vlgmr.msra.gmra.mxu1 %vm366_vm1, %v2030_v22 }
0x219c   :  { %5836 = vmatpush3.msra.mxu1 %v7234_v37  ;;  %5843 = vmatprep.mubr.msk.f32.mxu1 %vm6799_vm0, %v6798_v0 }
0x219d   :  { %5837 = vmatprep.subr.mxu1 %v6798_v0 }
0x219e   :  { %5838 = vmatpush3.msra.mxu1 %v7251_v43 }
0x219f   :  { %5839 = vmatprep.subr.mxu1 %v6798_v0 }
0x21a0   :  { %5840 = vmatpush3.msra.mxu1 %v7256_v44 }
0x21a1   :  { %5841 = vmatprep.subr.mxu1 %v6798_v0 }
0x21a2   :  { %5842 = vmatpush3.msra.mxu1 %v7262_v45 }
0x21a3   :  { %5857 = vmatprep.subr.mxu1 %v6798_v0 }
0x225b   :  { %v2099_v23 = vpop.f32.mrf.mxu1 }
0x225c   :  { %v2110_v24 = vadd.f32 %v2099_v23, %v7285_v58  ;;  %v2103_v6 = vadd.f32 %v2099_v23, %v2027_v25 }
0x225d   :  { %v5823_v4 = vpop.f32.mrf.mxu1 }
0x225e   :  { %2112 = vrot.lane.b32.xlu1 %v2110_v24, %s6800_s18  ;;  %v5350_v26 = vmul.f32 -1.442695, %v2103_v6  ;;  %v2336_v4 = vld [vmem:[#allocation2 + $0x38] sm:$0xff] }
0x2260   :  { %6189 = vpow2.f32 %v5350_v26 }
0x226d   :  { %v6190_v27 = vpop.eup %6189 }
0x226e   :  { %v2107_v8 = vadd.f32 1.0, %v6190_v27 }
0x2270   :  { %6191 = vrcp.f32 %v2107_v8 }
0x227d   :  { %v6192_v28 = vpop.eup %6191 }
0x227e   :  { %v2122_v33 = vsub.f32 1.0, %v6192_v28  ;;  %v2128_v35 = vmul.f32 %v6192_v28, %v2026_v21 }
0x22d0   :  { %v2113_v29 = vpop.permute.xlu1 %2112 }
0x22d1   :  { %v2115_v30 = vmul.f32 %v6192_v28, %v2113_v29 }
0x22d3   :  { %2117 = vrot.lane.b32.xlu0 %v2115_v30, %s6800_s18 }
0x2345   :  { %v2118_v31 = vpop.permute.xlu0 %2117 }
0x2346   :  { %v2120_v12 = vadd.f32 %v2118_v31, %v2027_v25 }
0x2348   :  { %6193 = vtanh.f32 %v2120_v12  ;;  %v2443_v12 = vld [vmem:[#allocation24 + $0x18] sm:$0xff] }
0x2355   :  { %v6194_v32 = vpop.eup %6193 }
0x2356   :  { %2124 = vrot.lane.b32.xlu1 %v6194_v32, %s6801_s23  ;;  %v2442_v32 = vld [vmem:[#allocation24 + $0x10] sm:$0xff] }
0x23c8   :  { %v2125_v34 = vpop.permute.xlu1 %2124 }
0x23c9   :  { %v2127_v36 = vmul.f32 %v2125_v34, %v2122_v33  ;;  %v2538_v33 = vld [vmem:[%s7825_s19 + $0x10] sm:$0xff]  ;;  %v2441_v34 = vld [vmem:[#allocation24 + $0x8] sm:$0xff] }
0x23cb   :  { %v2129_v38 = vadd.f32 %v2128_v35, %v2127_v36  ;;  %v2537_v35 = vld [vmem:[%s7825_s19 + $0x8] sm:$0xff]  ;;  %v2440_v36 = vld [vmem:[#allocation24] sm:$0xff] }
0x23cd   :  { %2132 = vrot.lane.b32.xlu0 %v2129_v38, %s6801_s23 }
0x243f   :  { %v2133_v39 = vpop.permute.xlu0 %2132 }
0x2440   :  { %5833 = vmatmul.mubr.msk.f32.vlgmr.msra.gmra.mxu0 %vm366_vm1, %v2133_v39 }
0x2441   :  { %5847 = vmatpush3.msra.mxu0 %v7234_v37  ;;  %5854 = vmatprep.mubr.msk.f32.mxu0 %vm6799_vm0, %v6798_v0 }
0x2442   :  { %5848 = vmatprep.subr.mxu0 %v6798_v0 }
0x2443   :  { %5849 = vmatpush3.msra.mxu0 %v7251_v43 }
0x2444   :  { %5850 = vmatprep.subr.mxu0 %v6798_v0 }
0x2445   :  { %5851 = vmatpush3.msra.mxu0 %v7256_v44 }
0x2446   :  { %5852 = vmatprep.subr.mxu0 %v6798_v0 }
0x2447   :  { %5853 = vmatpush3.msra.mxu0 %v7262_v45 }
0x2448   :  { %5868 = vmatprep.subr.mxu0 %v6798_v0 }
0x2500   :  { %v2202_v41 = vpop.f32.mrf.mxu0 }
0x2501   :  { %v2213_v37 = vadd.f32 %v2202_v41, %v7285_v58  ;;  %v2206_v47 = vadd.f32 %v2202_v41, %v2130_v46 }
0x2502   :  { %v5834_v42 = vpop.f32.mrf.mxu0 }
0x2503   :  { %2215 = vrot.lane.b32.xlu1 %v2213_v37, %s6800_s18  ;;  %v5352_v48 = vmul.f32 -1.442695, %v2206_v47 }
0x2505   :  { %6195 = vpow2.f32 %v5352_v48 }
0x2512   :  { %v6196_v43 = vpop.eup %6195 }
0x2513   :  { %v2210_v50 = vadd.f32 1.0, %v6196_v43  ;;  %v7409_v43 = vld [vmem:[#allocation26 + $0x18] sm:$0xff] }
0x2515   :  { %6197 = vrcp.f32 %v2210_v50 }
0x2522   :  { %v6198_v44 = vpop.eup %6197 }
0x2523   :  { %v2225_v55 = vsub.f32 1.0, %v6198_v44  ;;  %v2231_v57 = vmul.f32 %v6198_v44, %v2129_v38  ;;  %v2536_v38 = vld [vmem:[%s7825_s19] sm:$0xff] }
0x2575   :  { %v2216_v51 = vpop.permute.xlu1 %2215 }
0x2576   :  { %v2218_v52 = vmul.f32 %v6198_v44, %v2216_v51  ;;  %v7418_v44 = vld [vmem:[#allocation26 + $0x10] sm:$0xff]  ;;  %v7426_v51 = vld [vmem:[#allocation26] sm:$0xff] }
0x2578   :  { %2220 = vrot.lane.b32.xlu0 %v2218_v52, %s6800_s18  ;;  %v5359_v52 = vld [vmem:[#allocation29] ss:$0 sm:$0xff] }
0x25ea   :  { %v2221_v45 = vpop.permute.xlu0 %2220 }
0x25eb   :  { %v2223_v53 = vadd.f32 %v2221_v45, %v2130_v46  ;;  %v5360_v45 = vld [vmem:[%s7826_s20] ss:$0 sm:$0xff] }
0x25ed   :  { %6199 = vtanh.f32 %v2223_v53 }
0x25fa   :  { %v6200_v54 = vpop.eup %6199 }
0x25fb   :  { %2227 = vrot.lane.b32.xlu1 %v6200_v54, %s6801_s23 }
0x266d   :  { %v2228_v56 = vpop.permute.xlu1 %2227 }
0x266e   :  { %v2230_v59 = vmul.f32 %v2228_v56, %v2225_v55 }
0x2670   :  { %v2232_v60 = vadd.f32 %v2231_v57, %v2230_v59 }
0x2672   :  { %2235 = vrot.lane.b32.xlu0 %v2232_v60, %s6801_s23 }
0x26e4   :  { %v2236_v61 = vpop.permute.xlu0 %2235 }
0x26e5   :  { %5844 = vmatmul.mubr.msk.f32.vlgmr.msra.gmra.mxu1 %vm366_vm1, %v2236_v61 }
0x26e6   :  { %5865 = vmatprep.mubr.msk.f32.mxu1 %vm6799_vm0, %v6798_v0  ;;  %5858 = vmatpush3.msra.mxu1 %v2443_v12 }
0x26e7   :  { %5859 = vmatprep.subr.mxu1 %v6798_v0 }
0x26e8   :  { %5860 = vmatpush3.msra.mxu1 %v2442_v32 }
0x26e9   :  { %5861 = vmatprep.subr.mxu1 %v6798_v0 }
0x26ea   :  { %5862 = vmatpush3.msra.mxu1 %v2441_v34 }
0x26eb   :  { %5863 = vmatprep.subr.mxu1 %v6798_v0 }
0x26ec   :  { %5864 = vmatpush3.msra.mxu1 %v2440_v36 }
0x26ed   :  { %5879 = vmatprep.subr.mxu1 %v6798_v0 }
0x27a5   :  { %v2305_v62 = vpop.f32.mrf.mxu1 }
0x27a6   :  { %v2316_v49 = vadd.f32 %v2305_v62, %v7285_v58  ;;  %v2309_v3 = vadd.f32 %v2305_v62, %v2233_v1 }
0x27a7   :  { %v5845_v63 = vpop.f32.mrf.mxu1 }
0x27a8   :  { %2318 = vrot.lane.b32.xlu1 %v2316_v49, %s6800_s18  ;;  %v5354_v5 = vmul.f32 -1.442695, %v2309_v3 }
0x27aa   :  { %6201 = vpow2.f32 %v5354_v5 }
0x27b7   :  { %v6202_v7 = vpop.eup %6201 }
0x27b8   :  { %v2313_v9 = vadd.f32 1.0, %v6202_v7 }
0x27ba   :  { %6203 = vrcp.f32 %v2313_v9 }
0x27c7   :  { %v6204_v10 = vpop.eup %6203 }
0x27c8   :  { %v2328_v18 = vsub.f32 1.0, %v6204_v10  ;;  %v2334_v19 = vmul.f32 %v6204_v10, %v2232_v60 }
0x281a   :  { %v2319_v11 = vpop.permute.xlu1 %2318 }
0x281b   :  { %v2321_v13 = vmul.f32 %v6204_v10, %v2319_v11 }
0x281d   :  { %2323 = vrot.lane.b32.xlu0 %v2321_v13, %s6800_s18 }
0x288f   :  { %v2324_v14 = vpop.permute.xlu0 %2323 }
0x2890   :  { %v2326_v16 = vadd.f32 %v2324_v14, %v2233_v1  ;;  %v5357_v1 = vld [vmem:[#allocation27] ss:$0 sm:$0xff] }
0x2892   :  { %6205 = vtanh.f32 %v2326_v16 }
0x289f   :  { %v6206_v17 = vpop.eup %6205 }
0x28a0   :  { %2330 = vrot.lane.b32.xlu1 %v6206_v17, %s6801_s23 }
0x2912   :  { %v2331_v15 = vpop.permute.xlu1 %2330 }
0x2913   :  { %v2333_v20 = vmul.f32 %v2331_v15, %v2328_v18  ;;  %v2754_v18 = vld [vmem:[#allocation38 + $0x38] sm:$0xff]  ;;  %v2753_v15 = vld [vmem:[#allocation38 + $0x30] sm:$0xff] }
0x2915   :  { %v2335_v2 = vadd.f32 %v2334_v19, %v2333_v20  ;;  %v2752_v19 = vld [vmem:[#allocation38 + $0x28] sm:$0xff]  ;;  %v2751_v20 = vld [vmem:[#allocation38 + $0x20] sm:$0xff] }
0x2917   :  { %2338 = vrot.lane.b32.xlu0 %v2335_v2, %s6801_s23 }
0x2989   :  { %v2339_v21 = vpop.permute.xlu0 %2338 }
0x298a   :  { %5855 = vmatmul.mubr.msk.f32.vlgmr.msra.gmra.mxu0 %vm366_vm1, %v2339_v21  ;;  %v2749_v21 = vld [vmem:[#allocation38 + $0x10] sm:$0xff] }
0x298b   :  { %5876 = vmatprep.mubr.msk.f32.mxu0 %vm6799_vm0, %v6798_v0 }
0x2a4a   :  { %v2408_v22 = vpop.f32.mrf.mxu0 }
0x2a4b   :  { %v2419_v23 = vadd.f32 %v2408_v22, %v7285_v58  ;;  %v2412_v25 = vadd.f32 %v2408_v22, %v2336_v4  ;;  %v2539_v58 = vld [vmem:[%s7825_s19 + $0x18] sm:$0xff]  ;;  %v2748_v22 = vld [vmem:[#allocation38 + $0x8] sm:$0xff] }
0x2a4c   :  { %v5856_v24 = vpop.f32.mrf.mxu0  ;;  %5869 = vmatpush3.msra.mxu0 %v2539_v58 }
0x2a4d   :  { %2421 = vrot.lane.b32.xlu1 %v2419_v23, %s6800_s18  ;;  %v5356_v6 = vmul.f32 -1.442695, %v2412_v25  ;;  %5870 = vmatprep.subr.mxu0 %v6798_v0  ;;  %v2747_v23 = vld [vmem:[#allocation38] sm:$0xff] }
0x2a4e   :  { %5871 = vmatpush3.msra.mxu0 %v2538_v33 }
0x2a4f   :  { %6207 = vpow2.f32 %v5356_v6  ;;  %5872 = vmatprep.subr.mxu0 %v6798_v0 }
0x2a50   :  { %5873 = vmatpush3.msra.mxu0 %v2537_v35 }
0x2a51   :  { %5874 = vmatprep.subr.mxu0 %v6798_v0 }
0x2a52   :  { %5875 = vmatpush3.msra.mxu0 %v2536_v38 }
0x2a53   :  { %2781 = vmatprep.subr.mxu0 %v2754_v18  ;;  %v3130_v18 = vld [vmem:[#allocation38 + $0xa8] sm:$0xff] }
0x2a5c   :  { %v6208_v26 = vpop.eup %6207 }
0x2a5d   :  { %v2416_v27 = vadd.f32 1.0, %v6208_v26 }
0x2a5f   :  { %6209 = vrcp.f32 %v2416_v27 }
0x2a6c   :  { %v6210_v8 = vpop.eup %6209 }
0x2a6d   :  { %v2431_v41 = vsub.f32 1.0, %v6210_v8  ;;  %v2437_v42 = vmul.f32 %v6210_v8, %v2335_v2  ;;  %v2750_v2 = vld [vmem:[#allocation38 + $0x18] sm:$0xff] }
0x2abf   :  { %v2422_v28 = vpop.permute.xlu1 %2421 }
0x2ac0   :  { %v2424_v29 = vmul.f32 %v6210_v8, %v2422_v28 }
0x2ac2   :  { %2426 = vrot.lane.b32.xlu0 %v2424_v29, %s6800_s18 }
0x2b34   :  { %v2427_v30 = vpop.permute.xlu0 %2426 }
0x2b35   :  { %v2429_v31 = vadd.f32 %v2427_v30, %v2336_v4 }
0x2b37   :  { %6211 = vtanh.f32 %v2429_v31 }
0x2b44   :  { %v6212_v39 = vpop.eup %6211 }
0x2b45   :  { %2433 = vrot.lane.b32.xlu1 %v6212_v39, %s6801_s23 }
0x2b49   :  { %2714 = vrot.lane.b32.xlu1 %v5359_v52, %s6800_s18  ;;  %v2936_v52 = vld [vmem:[#allocation38 + $0x40] sm:$0xff] }
0x2bb7   :  { %v2434_v37 = vpop.permute.xlu1 %2433 }
0x2bb8   :  { %v2436_v46 = vmul.f32 %v2434_v37, %v2431_v41  ;;  %v2943_v41 = vld [vmem:[#allocation38 + $0x78] sm:$0xff]  ;;  %v2942_v37 = vld [vmem:[#allocation38 + $0x70] sm:$0xff] }
0x2bba   :  { %v2438_v47 = vadd.f32 %v2437_v42, %v2436_v46  ;;  %v2941_v42 = vld [vmem:[#allocation38 + $0x68] sm:$0xff]  ;;  %v2940_v46 = vld [vmem:[#allocation38 + $0x60] sm:$0xff] }
0x2bbb   :  { %v7445_v61 = vpop.permute.xlu1 %2714 }
0x2bbc   :  { %v2439_v48 = vadd.f32 %v2438_v47, %v7238_v40  ;;  %v7422_v40 = vld [vmem:[#allocation26 + $0x8] sm:$0xff]  ;;  %v2939_v47 = vld [vmem:[#allocation38 + $0x58] sm:$0xff] }
0x2bbe   :  { %2452 = vrot.lane.b32.xlu0 %v2439_v48, %s6801_s23  ;;  %v2938_v48 = vld [vmem:[#allocation38 + $0x50] sm:$0xff] }
0x2c30   :  { %v2453_v50 = vpop.permute.xlu0 %2452 }
0x2c31   :  { %5866 = vmatmul.mubr.msk.f32.vlgmr.msra.gmra.mxu1 %vm366_vm1, %v2453_v50  ;;  %5877 = vmatmul.mubr.msk.f32.vlgmr.msra.gmra.mxu0 %vm366_vm1, %v2453_v50  ;;  %v2937_v50 = vld [vmem:[#allocation38 + $0x48] sm:$0xff] }
0x2c32   :  { %5880 = vmatpush3.msra.mxu1 %v7409_v43  ;;  %5887 = vmatprep.mubr.msk.f32.mxu1 %vm6799_vm0, %v6798_v0 }
0x2c33   :  { %5881 = vmatprep.subr.mxu1 %v6798_v0  ;;  %2821 = vmatprep.mubr.f32.mxu0 %v6798_v0 }
0x2c34   :  { %5882 = vmatpush3.msra.mxu1 %v7418_v44  ;;  %2782 = vmatpush1.msra.mxu0 %v2753_v15  ;;  %v3129_v15 = vld [vmem:[#allocation38 + $0xa0] sm:$0xff] }
0x2c35   :  { %5883 = vmatprep.subr.mxu1 %v6798_v0  ;;  %2783 = vmatprep.subr.mxu0 %v2752_v19  ;;  %v3128_v19 = vld [vmem:[#allocation38 + $0x98] sm:$0xff] }
0x2c36   :  { %5884 = vmatpush3.msra.mxu1 %v7422_v40  ;;  %2784 = vmatpush1.msra.mxu0 %v2751_v20  ;;  %v3127_v20 = vld [vmem:[#allocation38 + $0x90] sm:$0xff] }
0x2c37   :  { %5885 = vmatprep.subr.mxu1 %v6798_v0  ;;  %2785 = vmatprep.subr.mxu0 %v2750_v2  ;;  %v3126_v2 = vld [vmem:[#allocation38 + $0x88] sm:$0xff] }
0x2c38   :  { %5886 = vmatpush3.msra.mxu1 %v7426_v51  ;;  %2786 = vmatpush1.msra.mxu0 %v2749_v21  ;;  %v3125_v21 = vld [vmem:[#allocation38 + $0x80] sm:$0xff] }
0x2c39   :  { %5890 = vmatprep.subr.mxu1 %v6798_v0  ;;  %2787 = vmatprep.subr.mxu0 %v2748_v22 }
0x2c3a   :  { %2788 = vmatpush1.msra.mxu0 %v2747_v23 }
0x2c3b   :  { %2970 = vmatprep.subr.mxu0 %v2943_v41  ;;  %v3318_v41 = vld [vmem:[#allocation38 + $0xe0] sm:$0xff] }
0x2cf1   :  { %v2522_v53 = vpop.f32.mrf.mxu1  ;;  %v2613_v54 = vpop.f32.mrf.mxu0 }
0x2cf2   :  { %v2614_v55 = vadd.f32 %v5360_v45, %v2613_v54  ;;  %v7449_v3 = vadd.f32 %v5357_v1, %v2522_v53 }
0x2cf3   :  { %v5867_v56 = vpop.f32.mrf.mxu1  ;;  %v5878_v57 = vpop.f32.mrf.mxu0 }
0x2cf4   :  { %vm2617_vm4 = vcmp.gt.f32.partialorder %v2614_v55, 0.0  ;;  %v2618_v59 = vmul.f32 0.2, %v2614_v55 }
0x2cf6   :  { %v2619_v60 = vsel %vm2617_vm4, %v2614_v55, %v2618_v59 }
0x2cf7   :  { %5888 = vmatmul.mubr.msk.f32.vlgmr.msra.gmra.mxu1 %vm366_vm1, %v2619_v60 }
0x2cf8   :  { %5891 = vmatpush3.msra.mxu1 %v7409_v43  ;;  %5898 = vmatprep.mubr.msk.f32.mxu1 %vm6799_vm0, %v6798_v0 }
0x2cf9   :  { %5892 = vmatprep.subr.mxu1 %v6798_v0 }
0x2cfa   :  { %5893 = vmatpush3.msra.mxu1 %v7418_v44 }
0x2cfb   :  { %5894 = vmatprep.subr.mxu1 %v6798_v0 }
0x2cfc   :  { %5895 = vmatpush3.msra.mxu1 %v7422_v40 }
0x2cfd   :  { %5896 = vmatprep.subr.mxu1 %v6798_v0 }
0x2cfe   :  { %5897 = vmatpush3.msra.mxu1 %v7426_v51 }
0x2cff   :  { %5901 = vmatprep.subr.mxu1 %v6798_v0 }
0x2db7   :  { %v2703_v62 = vpop.f32.mrf.mxu1 }
0x2db8   :  { %v2717_v49 = vadd.f32 %v7445_v61, %v2703_v62  ;;  %v2707_v5 = vadd.f32 %v2703_v62, %v7449_v3 }
0x2db9   :  { %v5889_v63 = vpop.f32.mrf.mxu1 }
0x2dba   :  { %2719 = vrot.lane.b32.xlu0 %v2717_v49, %s6800_s18  ;;  %v5363_v7 = vmul.f32 -1.442695, %v2707_v5 }
0x2dbc   :  { %6213 = vpow2.f32 %v5363_v7 }
0x2dc9   :  { %v6214_v9 = vpop.eup %6213 }
0x2dca   :  { %v2711_v10 = vadd.f32 1.0, %v6214_v9 }
0x2dcc   :  { %6215 = vrcp.f32 %v2711_v10 }
0x2dd9   :  { %v6216_v11 = vpop.eup %6215 }
0x2dda   :  { %v2729_v25 = vsub.f32 1.0, %v6216_v11 }
0x2e2c   :  { %v2720_v13 = vpop.permute.xlu0 %2719 }
0x2e2d   :  { %v2722_v14 = vmul.f32 %v6216_v11, %v2720_v13 }
0x2e2f   :  { %2724 = vrot.lane.b32.xlu1 %v2722_v14, %s6800_s18 }
0x2e33   :  { %2735 = vrot.lane.b32.xlu1 %v2619_v60, %s6802_s17 }
0x2ea1   :  { %v2725_v16 = vpop.permute.xlu1 %2724 }
0x2ea2   :  { %v2727_v17 = vadd.f32 %v2725_v16, %v7449_v3  ;;  %v3132_v16 = vld [vmem:[#allocation38 + $0xb8] sm:$0xff] }
0x2ea4   :  { %6217 = vtanh.f32 %v2727_v17  ;;  %v3131_v17 = vld [vmem:[#allocation38 + $0xb0] sm:$0xff] }
0x2ea5   :  { %v2736_v4 = vpop.permute.xlu1 %2735 }
0x2ea6   :  { %v2738_v26 = vmul.f32 %v6216_v11, %v2736_v4 }
0x2eb1   :  { %v6218_v24 = vpop.eup %6217 }
0x2eb2   :  { %2731 = vrot.lane.b32.xlu0 %v6218_v24, %s6801_s23 }
0x2f24   :  { %v2732_v6 = vpop.permute.xlu0 %2731 }
0x2f25   :  { %v2734_v27 = vmul.f32 %v2732_v6, %v2729_v25 }
0x2f27   :  { %v2739_v8 = vadd.f32 %v2738_v26, %v2734_v27 }
0x2f29   :  { %2741 = vrot.lane.b32.xlu0 %v2739_v8, %s6801_s23 }
0x2f9b   :  { %v2742_v28 = vpop.permute.xlu0 %2741 }
0x2f9c   :  { %2744 = vst.msk [vmem:[#allocation4] sm:$0xff] %vm366_vm1, %v2742_v28  ;;  %5364 = vmatmul.mubr.msk.f32.vlgmr.msra.gmra.mxu0 %vm366_vm1, %v2742_v28  ;;  %5899 = vmatmul.mubr.msk.f32.vlgmr.msra.gmra.mxu1 %vm366_vm1, %v2742_v28 }
0x2f9d   :  { %5902 = vmatpush3.msra.mxu1 %v7409_v43  ;;  %3010 = vmatprep.mubr.f32.mxu0 %v6798_v0 }
0x2f9e   :  { %5903 = vmatprep.subr.mxu1 %v6798_v0  ;;  %5909 = vmatprep.mubr.msk.f32.mxu1 %vm6799_vm0, %v6798_v0 }
0x2f9f   :  { %5904 = vmatpush3.msra.mxu1 %v7418_v44  ;;  %2971 = vmatpush1.msra.mxu0 %v2942_v37  ;;  %v3317_v37 = vld [vmem:[#allocation38 + $0xd8] sm:$0xff] }
0x2fa0   :  { %5905 = vmatprep.subr.mxu1 %v6798_v0  ;;  %2972 = vmatprep.subr.mxu0 %v2941_v42  ;;  %v3316_v42 = vld [vmem:[#allocation38 + $0xd0] sm:$0xff] }
0x2fa1   :  { %5906 = vmatpush3.msra.mxu1 %v7422_v40  ;;  %2973 = vmatpush1.msra.mxu0 %v2940_v46  ;;  %v3315_v46 = vld [vmem:[#allocation38 + $0xc8] sm:$0xff] }
0x2fa2   :  { %5907 = vmatprep.subr.mxu1 %v6798_v0  ;;  %2974 = vmatprep.subr.mxu0 %v2939_v47  ;;  %v3314_v47 = vld [vmem:[#allocation38 + $0xc0] sm:$0xff] }
0x2fa3   :  { %5908 = vmatpush3.msra.mxu1 %v7426_v51  ;;  %2975 = vmatpush1.msra.mxu0 %v2938_v48 }
0x2fa4   :  { %5912 = vmatprep.subr.mxu1 %v6798_v0  ;;  %2976 = vmatprep.subr.mxu0 %v2937_v50 }
0x2fa5   :  { %2977 = vmatpush1.msra.mxu0 %v2936_v52 }
0x2fa6   :  { %3159 = vmatprep.subr.mxu0 %v3132_v16  ;;  %v3507_v16 = vld [vmem:[#allocation38 + $0x120] sm:$0xff] }
0x305c   :  { %v2898_v29 = vpop.f32.mrf.mxu1 }
0x305d   :  { %v2909_v30 = vadd.f32 %v2898_v29, %v7445_v61  ;;  %v2902_v12 = vadd.f32 %v2898_v29, %v7449_v3 }
0x305e   :  { %v5900_v31 = vpop.f32.mrf.mxu1 }
0x305f   :  { %2911 = vrot.lane.b32.xlu1 %v2909_v30, %s6800_s18  ;;  %v5366_v58 = vmul.f32 -1.442695, %v2902_v12 }
0x3061   :  { %6219 = vpow2.f32 %v5366_v58 }
0x306e   :  { %v6220_v32 = vpop.eup %6219 }
0x306f   :  { %v2906_v33 = vadd.f32 1.0, %v6220_v32 }
0x3071   :  { %6221 = vrcp.f32 %v2906_v33 }
0x307e   :  { %v6222_v34 = vpop.eup %6221 }
0x307f   :  { %v2921_v53 = vsub.f32 1.0, %v6222_v34  ;;  %v2927_v55 = vmul.f32 %v6222_v34, %v2739_v8 }
0x30d1   :  { %v2912_v35 = vpop.permute.xlu1 %2911 }
0x30d2   :  { %v2914_v36 = vmul.f32 %v6222_v34, %v2912_v35 }
0x30d4   :  { %2916 = vrot.lane.b32.xlu0 %v2914_v36, %s6800_s18  ;;  %v3321_v36 = vld [vmem:[#allocation38 + $0xf8] sm:$0xff] }
0x3146   :  { %v2917_v38 = vpop.permute.xlu0 %2916 }
0x3147   :  { %v2919_v39 = vadd.f32 %v2917_v38, %v7449_v3  ;;  %v3320_v38 = vld [vmem:[#allocation38 + $0xf0] sm:$0xff] }
0x3149   :  { %6223 = vtanh.f32 %v2919_v39  ;;  %v3319_v39 = vld [vmem:[#allocation38 + $0xe8] sm:$0xff] }
0x3156   :  { %v6224_v45 = vpop.eup %6223 }
0x3157   :  { %2923 = vrot.lane.b32.xlu1 %v6224_v45, %s6801_s23 }
0x31c9   :  { %v2924_v54 = vpop.permute.xlu1 %2923 }
0x31ca   :  { %v2926_v56 = vmul.f32 %v2924_v54, %v2921_v53 }
0x31cc   :  { %v2928_v57 = vadd.f32 %v2927_v55, %v2926_v56 }
0x31ce   :  { %2930 = vrot.lane.b32.xlu0 %v2928_v57, %s6801_s23 }
0x3240   :  { %v2931_v59 = vpop.permute.xlu0 %2930 }
0x3241   :  { %2933 = vst.msk [vmem:[#allocation4 + $0x8] sm:$0xff] %vm366_vm1, %v2931_v59  ;;  %5367 = vmatmul.mubr.msk.f32.vlgmr.msra.gmra.mxu0 %vm366_vm1, %v2931_v59  ;;  %5910 = vmatmul.mubr.msk.f32.vlgmr.msra.gmra.mxu1 %vm366_vm1, %v2931_v59 }
0x3242   :  { %5913 = vmatpush3.msra.mxu1 %v7409_v43  ;;  %3199 = vmatprep.mubr.f32.mxu0 %v6798_v0 }
0x3243   :  { %5914 = vmatprep.subr.mxu1 %v6798_v0  ;;  %5920 = vmatprep.mubr.msk.f32.mxu1 %vm6799_vm0, %v6798_v0 }
0x3244   :  { %5915 = vmatpush3.msra.mxu1 %v7418_v44  ;;  %3160 = vmatpush1.msra.mxu0 %v3131_v17  ;;  %v3506_v17 = vld [vmem:[#allocation38 + $0x118] sm:$0xff] }
0x3245   :  { %5916 = vmatprep.subr.mxu1 %v6798_v0  ;;  %3161 = vmatprep.subr.mxu0 %v3130_v18  ;;  %v3505_v18 = vld [vmem:[#allocation38 + $0x110] sm:$0xff] }
0x3246   :  { %5917 = vmatpush3.msra.mxu1 %v7422_v40  ;;  %3162 = vmatpush1.msra.mxu0 %v3129_v15  ;;  %v3504_v15 = vld [vmem:[#allocation38 + $0x108] sm:$0xff] }
0x3247   :  { %5918 = vmatprep.subr.mxu1 %v6798_v0  ;;  %3163 = vmatprep.subr.mxu0 %v3128_v19  ;;  %v3503_v19 = vld [vmem:[#allocation38 + $0x100] sm:$0xff] }
0x3248   :  { %5919 = vmatpush3.msra.mxu1 %v7426_v51  ;;  %3164 = vmatpush1.msra.mxu0 %v3127_v20 }
0x3249   :  { %5923 = vmatprep.subr.mxu1 %v6798_v0  ;;  %3165 = vmatprep.subr.mxu0 %v3126_v2 }
0x324a   :  { %3166 = vmatpush1.msra.mxu0 %v3125_v21 }
0x324b   :  { %3348 = vmatprep.subr.mxu0 %v3321_v36  ;;  %v3696_v36 = vld [vmem:[#allocation38 + $0x160] sm:$0xff] }
0x3301   :  { %v3087_v60 = vpop.f32.mrf.mxu1 }
0x3302   :  { %v3098_v62 = vadd.f32 %v3087_v60, %v7445_v61  ;;  %v3091_v63 = vadd.f32 %v3087_v60, %v7449_v3 }
0x3303   :  { %v5911_v49 = vpop.f32.mrf.mxu1 }
0x3304   :  { %3100 = vrot.lane.b32.xlu1 %v3098_v62, %s6800_s18  ;;  %v5369_v1 = vmul.f32 -1.442695, %v3091_v63 }
0x3306   :  { %6225 = vpow2.f32 %v5369_v1 }
0x3313   :  { %v6226_v5 = vpop.eup %6225 }
0x3314   :  { %v3095_v7 = vadd.f32 1.0, %v6226_v5 }
0x3316   :  { %6227 = vrcp.f32 %v3095_v7 }
0x3323   :  { %v6228_v9 = vpop.eup %6227 }
0x3324   :  { %v3110_v23 = vsub.f32 1.0, %v6228_v9  ;;  %v3116_v4 = vmul.f32 %v6228_v9, %v2928_v57 }
0x3376   :  { %v3101_v10 = vpop.permute.xlu1 %3100 }
0x3377   :  { %v3103_v11 = vmul.f32 %v6228_v9, %v3101_v10 }
0x3379   :  { %3105 = vrot.lane.b32.xlu0 %v3103_v11, %s6800_s18  ;;  %v3510_v11 = vld [vmem:[#allocation38 + $0x138] sm:$0xff] }
0x33eb   :  { %v3106_v13 = vpop.permute.xlu0 %3105 }
0x33ec   :  { %v3108_v14 = vadd.f32 %v3106_v13, %v7449_v3  ;;  %v3509_v13 = vld [vmem:[#allocation38 + $0x130] sm:$0xff] }
0x33ee   :  { %6229 = vtanh.f32 %v3108_v14  ;;  %v3508_v14 = vld [vmem:[#allocation38 + $0x128] sm:$0xff] }
0x33fb   :  { %v6230_v22 = vpop.eup %6229 }
0x33fc   :  { %3112 = vrot.lane.b32.xlu1 %v6230_v22, %s6801_s23 }
0x346e   :  { %v3113_v24 = vpop.permute.xlu1 %3112 }
0x346f   :  { %v3115_v25 = vmul.f32 %v3113_v24, %v3110_v23 }
0x3471   :  { %v3117_v6 = vadd.f32 %v3116_v4, %v3115_v25 }
0x3473   :  { %3119 = vrot.lane.b32.xlu0 %v3117_v6, %s6801_s23 }
0x34e5   :  { %v3120_v26 = vpop.permute.xlu0 %3119 }
0x34e6   :  { %3122 = vst.msk [vmem:[#allocation4 + $0x10] sm:$0xff] %vm366_vm1, %v3120_v26  ;;  %5370 = vmatmul.mubr.msk.f32.vlgmr.msra.gmra.mxu0 %vm366_vm1, %v3120_v26  ;;  %5921 = vmatmul.mubr.msk.f32.vlgmr.msra.gmra.mxu1 %vm366_vm1, %v3120_v26 }
0x34e7   :  { %5924 = vmatpush3.msra.mxu1 %v7409_v43  ;;  %3388 = vmatprep.mubr.f32.mxu0 %v6798_v0 }
0x34e8   :  { %5925 = vmatprep.subr.mxu1 %v6798_v0  ;;  %5931 = vmatprep.mubr.msk.f32.mxu1 %vm6799_vm0, %v6798_v0 }
0x34e9   :  { %5926 = vmatpush3.msra.mxu1 %v7418_v44  ;;  %3349 = vmatpush1.msra.mxu0 %v3320_v38  ;;  %v3695_v38 = vld [vmem:[#allocation38 + $0x158] sm:$0xff] }
0x34ea   :  { %5927 = vmatprep.subr.mxu1 %v6798_v0  ;;  %3350 = vmatprep.subr.mxu0 %v3319_v39  ;;  %v3694_v39 = vld [vmem:[#allocation38 + $0x150] sm:$0xff] }
0x34eb   :  { %5928 = vmatpush3.msra.mxu1 %v7422_v40  ;;  %3351 = vmatpush1.msra.mxu0 %v3318_v41  ;;  %v3693_v41 = vld [vmem:[#allocation38 + $0x148] sm:$0xff] }
0x34ec   :  { %5929 = vmatprep.subr.mxu1 %v6798_v0  ;;  %3352 = vmatprep.subr.mxu0 %v3317_v37  ;;  %v3692_v37 = vld [vmem:[#allocation38 + $0x140] sm:$0xff] }
0x34ed   :  { %5930 = vmatpush3.msra.mxu1 %v7426_v51  ;;  %3353 = vmatpush1.msra.mxu0 %v3316_v42 }
0x34ee   :  { %5934 = vmatprep.subr.mxu1 %v6798_v0  ;;  %3354 = vmatprep.subr.mxu0 %v3315_v46 }
0x34ef   :  { %3355 = vmatpush1.msra.mxu0 %v3314_v47 }
0x34f0   :  { %3537 = vmatprep.subr.mxu0 %v3510_v11  ;;  %v3882_v11 = vld [vmem:[#allocation38 + $0x188] sm:$0xff] }
0x35a6   :  { %v3276_v27 = vpop.f32.mrf.mxu1 }
0x35a7   :  { %v3287_v8 = vadd.f32 %v3276_v27, %v7445_v61  ;;  %v3280_v29 = vadd.f32 %v3276_v27, %v7449_v3 }
0x35a8   :  { %v5922_v28 = vpop.f32.mrf.mxu1 }
0x35a9   :  { %3289 = vrot.lane.b32.xlu1 %v3287_v8, %s6800_s18  ;;  %v5372_v30 = vmul.f32 -1.442695, %v3280_v29 }
0x35ab   :  { %6231 = vpow2.f32 %v5372_v30 }
0x35b8   :  { %v6232_v31 = vpop.eup %6231 }
0x35b9   :  { %v3284_v12 = vadd.f32 1.0, %v6232_v31 }
0x35bb   :  { %6233 = vrcp.f32 %v3284_v12 }
0x35c8   :  { %v6234_v58 = vpop.eup %6233 }
0x35c9   :  { %v3299_v50 = vsub.f32 1.0, %v6234_v58  ;;  %v3305_v45 = vmul.f32 %v6234_v58, %v3117_v6 }
0x361b   :  { %v3290_v32 = vpop.permute.xlu1 %3289 }
0x361c   :  { %v3292_v33 = vmul.f32 %v6234_v58, %v3290_v32 }
0x361e   :  { %3294 = vrot.lane.b32.xlu0 %v3292_v33, %s6800_s18  ;;  %v3699_v33 = vld [vmem:[#allocation38 + $0x178] sm:$0xff] }
0x3690   :  { %v3295_v34 = vpop.permute.xlu0 %3294 }
0x3691   :  { %v3297_v35 = vadd.f32 %v3295_v34, %v7449_v3  ;;  %v3698_v34 = vld [vmem:[#allocation38 + $0x170] sm:$0xff] }
0x3693   :  { %6235 = vtanh.f32 %v3297_v35  ;;  %v3697_v35 = vld [vmem:[#allocation38 + $0x168] sm:$0xff] }
0x36a0   :  { %v6236_v48 = vpop.eup %6235 }
0x36a1   :  { %3301 = vrot.lane.b32.xlu1 %v6236_v48, %s6801_s23 }
0x3713   :  { %v3302_v52 = vpop.permute.xlu1 %3301 }
0x3714   :  { %v3304_v53 = vmul.f32 %v3302_v52, %v3299_v50 }
0x3716   :  { %v3306_v54 = vadd.f32 %v3305_v45, %v3304_v53 }
0x3718   :  { %3308 = vrot.lane.b32.xlu0 %v3306_v54, %s6801_s23 }
0x378a   :  { %v3309_v55 = vpop.permute.xlu0 %3308 }
0x378b   :  { %3311 = vst.msk [vmem:[#allocation4 + $0x18] sm:$0xff] %vm366_vm1, %v3309_v55  ;;  %5373 = vmatmul.mubr.msk.f32.vlgmr.msra.gmra.mxu0 %vm366_vm1, %v3309_v55  ;;  %5932 = vmatmul.mubr.msk.f32.vlgmr.msra.gmra.mxu1 %vm366_vm1, %v3309_v55 }
0x378c   :  { %5935 = vmatpush3.msra.mxu1 %v7409_v43  ;;  %3577 = vmatprep.mubr.f32.mxu0 %v6798_v0 }
0x378d   :  { %5936 = vmatprep.subr.mxu1 %v6798_v0  ;;  %5942 = vmatprep.mubr.msk.f32.mxu1 %vm6799_vm0, %v6798_v0 }
0x378e   :  { %5937 = vmatpush3.msra.mxu1 %v7418_v44  ;;  %3538 = vmatpush1.msra.mxu0 %v3509_v13  ;;  %v3881_v13 = vld [vmem:[#allocation38 + $0x180] sm:$0xff] }
0x378f   :  { %5938 = vmatprep.subr.mxu1 %v6798_v0  ;;  %3539 = vmatprep.subr.mxu0 %v3508_v14 }
0x3790   :  { %5939 = vmatpush3.msra.mxu1 %v7422_v40  ;;  %3540 = vmatpush1.msra.mxu0 %v3507_v16 }
0x3791   :  { %5940 = vmatprep.subr.mxu1 %v6798_v0  ;;  %3541 = vmatprep.subr.mxu0 %v3506_v17 }
0x3792   :  { %5941 = vmatpush3.msra.mxu1 %v7426_v51  ;;  %3542 = vmatpush1.msra.mxu0 %v3505_v18 }
0x3793   :  { %5945 = vmatprep.subr.mxu1 %v6798_v0  ;;  %3543 = vmatprep.subr.mxu0 %v3504_v15 }
0x3794   :  { %3544 = vmatpush1.msra.mxu0 %v3503_v19 }
0x3795   :  { %3726 = vmatprep.subr.mxu0 %v3699_v33 }
0x384b   :  { %v3465_v56 = vpop.f32.mrf.mxu1 }
0x384c   :  { %v3476_v57 = vadd.f32 %v3465_v56, %v7445_v61  ;;  %v3469_v60 = vadd.f32 %v3465_v56, %v7449_v3 }
0x384d   :  { %v5933_v59 = vpop.f32.mrf.mxu1 }
0x384e   :  { %3478 = vrot.lane.b32.xlu1 %v3476_v57, %s6800_s18  ;;  %v5375_v62 = vmul.f32 -1.442695, %v3469_v60 }
0x3850   :  { %6237 = vpow2.f32 %v5375_v62 }
0x385d   :  { %v6238_v49 = vpop.eup %6237 }
0x385e   :  { %v3473_v63 = vadd.f32 1.0, %v6238_v49  ;;  %v3888_v49 = vld [vmem:[#allocation38 + $0x1b8] sm:$0xff] }
0x3860   :  { %6239 = vrcp.f32 %v3473_v63  ;;  %v3887_v63 = vld [vmem:[#allocation38 + $0x1b0] sm:$0xff] }
0x386d   :  { %v6240_v1 = vpop.eup %6239 }
0x386e   :  { %v3488_v2 = vsub.f32 1.0, %v6240_v1  ;;  %v3494_v22 = vmul.f32 %v6240_v1, %v3306_v54 }
0x38c0   :  { %v3479_v5 = vpop.permute.xlu1 %3478 }
0x38c1   :  { %v3481_v7 = vmul.f32 %v6240_v1, %v3479_v5  ;;  %v3886_v1 = vld [vmem:[#allocation38 + $0x1a8] sm:$0xff]  ;;  %v3885_v5 = vld [vmem:[#allocation38 + $0x1a0] sm:$0xff] }
0x38c3   :  { %3483 = vrot.lane.b32.xlu0 %v3481_v7, %s6800_s18  ;;  %v3884_v7 = vld [vmem:[#allocation38 + $0x198] sm:$0xff] }
0x3935   :  { %v3484_v9 = vpop.permute.xlu0 %3483 }
0x3936   :  { %v3486_v10 = vadd.f32 %v3484_v9, %v7449_v3  ;;  %v4166_v9 = vld [vmem:[#allocation30 + $0x18] sm:$0xff] }
0x3938   :  { %6241 = vtanh.f32 %v3486_v10  ;;  %v3883_v10 = vld [vmem:[#allocation38 + $0x190] sm:$0xff] }
0x3945   :  { %v6242_v20 = vpop.eup %6241 }
0x3946   :  { %3490 = vrot.lane.b32.xlu1 %v6242_v20, %s6801_s23 }
0x39b8   :  { %v3491_v21 = vpop.permute.xlu1 %3490 }
0x39b9   :  { %v3493_v23 = vmul.f32 %v3491_v21, %v3488_v2  ;;  %v4165_v2 = vld [vmem:[#allocation30 + $0x10] sm:$0xff]  ;;  %v4155_v21 = vld [vmem:[#allocation4] sm:$0xff] }
0x39bb   :  { %v3495_v24 = vadd.f32 %v3494_v22, %v3493_v23  ;;  %v4164_v22 = vld [vmem:[#allocation30 + $0x8] sm:$0xff]  ;;  %v4163_v23 = vld [vmem:[#allocation30] sm:$0xff] }
0x39bd   :  { %3497 = vrot.lane.b32.xlu0 %v3495_v24, %s6801_s23 }
0x3a2f   :  { %v3498_v4 = vpop.permute.xlu0 %3497 }
0x3a30   :  { %3500 = vst.msk [vmem:[#allocation4 + $0x20] sm:$0xff] %vm366_vm1, %v3498_v4  ;;  %5376 = vmatmul.mubr.msk.f32.vlgmr.msra.gmra.mxu0 %vm366_vm1, %v3498_v4  ;;  %5943 = vmatmul.mubr.msk.f32.vlgmr.msra.gmra.mxu1 %vm366_vm1, %v3498_v4  ;;  %v4157_v4 = vld [vmem:[#allocation4 + $0x10] sm:$0xff] }
0x3a31   :  { %5946 = vmatpush3.msra.mxu1 %v7409_v43  ;;  %3766 = vmatprep.mubr.f32.mxu0 %v6798_v0 }
0x3a32   :  { %5947 = vmatprep.subr.mxu1 %v6798_v0  ;;  %5953 = vmatprep.mubr.msk.f32.mxu1 %vm6799_vm0, %v6798_v0 }
0x3a33   :  { %5948 = vmatpush3.msra.mxu1 %v7418_v44  ;;  %3727 = vmatpush1.msra.mxu0 %v3698_v34 }
0x3a34   :  { %5949 = vmatprep.subr.mxu1 %v6798_v0  ;;  %3728 = vmatprep.subr.mxu0 %v3697_v35 }
0x3a35   :  { %5950 = vmatpush3.msra.mxu1 %v7422_v40  ;;  %3729 = vmatpush1.msra.mxu0 %v3696_v36 }
0x3a36   :  { %5951 = vmatprep.subr.mxu1 %v6798_v0  ;;  %3730 = vmatprep.subr.mxu0 %v3695_v38 }
0x3a37   :  { %5952 = vmatpush3.msra.mxu1 %v7426_v51  ;;  %3731 = vmatpush1.msra.mxu0 %v3694_v39 }
0x3a38   :  { %5956 = vmatprep.subr.mxu1 %v6798_v0  ;;  %3732 = vmatprep.subr.mxu0 %v3693_v41 }
0x3a39   :  { %3733 = vmatpush1.msra.mxu0 %v3692_v37 }
0x3a3a   :  { %3915 = vmatprep.subr.mxu0 %v3888_v49 }
0x3af0   :  { %v3654_v25 = vpop.f32.mrf.mxu1 }
0x3af1   :  { %v3665_v6 = vadd.f32 %v3654_v25, %v7445_v61  ;;  %v3658_v27 = vadd.f32 %v3654_v25, %v7449_v3  ;;  %v4158_v25 = vld [vmem:[#allocation4 + $0x18] sm:$0xff] }
0x3af2   :  { %v5944_v26 = vpop.f32.mrf.mxu1 }
0x3af3   :  { %3667 = vrot.lane.b32.xlu1 %v3665_v6, %s6800_s18  ;;  %v5378_v8 = vmul.f32 -1.442695, %v3658_v27  ;;  %v4159_v6 = vld [vmem:[#allocation4 + $0x20] sm:$0xff] }
0x3af5   :  { %6243 = vpow2.f32 %v5378_v8 }
0x3b02   :  { %v6244_v28 = vpop.eup %6243 }
0x3b03   :  { %v3662_v29 = vadd.f32 1.0, %v6244_v28 }
0x3b05   :  { %6245 = vrcp.f32 %v3662_v29 }
0x3b12   :  { %v6246_v30 = vpop.eup %6245 }
0x3b13   :  { %v3677_v46 = vsub.f32 1.0, %v6246_v30  ;;  %v3683_v48 = vmul.f32 %v6246_v30, %v3495_v24  ;;  %v4156_v24 = vld [vmem:[#allocation4 + $0x8] sm:$0xff] }
0x3b65   :  { %v3668_v31 = vpop.permute.xlu1 %3667 }
0x3b66   :  { %v3670_v12 = vmul.f32 %v6246_v30, %v3668_v31  ;;  %v7599_v30 = vld [vmem:[#allocation33] ss:$0 sm:$0xff] }
0x3b68   :  { %3672 = vrot.lane.b32.xlu0 %v3670_v12, %s6800_s18 }
0x3bda   :  { %v3673_v58 = vpop.permute.xlu0 %3672 }
0x3bdb   :  { %v3675_v32 = vadd.f32 %v3673_v58, %v7449_v3 }
0x3bdd   :  { %6247 = vtanh.f32 %v3675_v32 }
0x3bea   :  { %v6248_v42 = vpop.eup %6247 }
0x3beb   :  { %3679 = vrot.lane.b32.xlu1 %v6248_v42, %s6801_s23 }
0x3c5d   :  { %v3680_v47 = vpop.permute.xlu1 %3679 }
0x3c5e   :  { %v3682_v50 = vmul.f32 %v3680_v47, %v3677_v46 }
0x3c60   :  { %v3684_v52 = vadd.f32 %v3683_v48, %v3682_v50 }
0x3c62   :  { %3686 = vrot.lane.b32.xlu0 %v3684_v52, %s6801_s23 }
0x3cd4   :  { %v3687_v45 = vpop.permute.xlu0 %3686 }
0x3cd5   :  { %3689 = vst.msk [vmem:[#allocation4 + $0x28] sm:$0xff] %vm366_vm1, %v3687_v45  ;;  %5379 = vmatmul.mubr.msk.f32.vlgmr.msra.gmra.mxu0 %vm366_vm1, %v3687_v45  ;;  %5954 = vmatmul.mubr.msk.f32.vlgmr.msra.gmra.mxu1 %vm366_vm1, %v3687_v45 }
0x3cd6   :  { %5957 = vmatpush3.msra.mxu1 %v7409_v43  ;;  %3955 = vmatprep.mubr.f32.mxu0 %v6798_v0 }
0x3cd7   :  { %5958 = vmatprep.subr.mxu1 %v6798_v0  ;;  %5964 = vmatprep.mubr.msk.f32.mxu1 %vm6799_vm0, %v6798_v0 }
0x3cd8   :  { %5959 = vmatpush3.msra.mxu1 %v7418_v44  ;;  %3916 = vmatpush1.msra.mxu0 %v3887_v63 }
0x3cd9   :  { %5960 = vmatprep.subr.mxu1 %v6798_v0  ;;  %3917 = vmatprep.subr.mxu0 %v3886_v1  ;;  %v4324_v1 = vld [vmem:[#allocation36 + $0x18] sm:$0xff] }
0x3cda   :  { %5961 = vmatpush3.msra.mxu1 %v7422_v40  ;;  %3918 = vmatpush1.msra.mxu0 %v3885_v5 }
0x3cdb   :  { %5962 = vmatprep.subr.mxu1 %v6798_v0  ;;  %3919 = vmatprep.subr.mxu0 %v3884_v7  ;;  %v4323_v7 = vld [vmem:[#allocation36 + $0x10] sm:$0xff] }
0x3cdc   :  { %5963 = vmatpush3.msra.mxu1 %v7426_v51  ;;  %3920 = vmatpush1.msra.mxu0 %v3883_v10  ;;  %v4160_v26 = vld [vmem:[#allocation4 + $0x28] sm:$0xff] }
0x3cdd   :  { %5967 = vmatprep.subr.mxu1 %v4166_v9  ;;  %3921 = vmatprep.subr.mxu0 %v3882_v11  ;;  %v4321_v10 = vld [vmem:[#allocation36] sm:$0xff] }
0x3cde   :  { %3922 = vmatpush1.msra.mxu0 %v3881_v13  ;;  %v7634_v13 = vld [vmem:[#allocation32 + $0x18] sm:$0xff] }
0x3d95   :  { %v3843_v53 = vpop.f32.mrf.mxu1 }
0x3d96   :  { %v3854_v43 = vadd.f32 %v3843_v53, %v7445_v61  ;;  %v3847_v55 = vadd.f32 %v3843_v53, %v7449_v3 }
0x3d97   :  { %v5955_v54 = vpop.f32.mrf.mxu1 }
0x3d98   :  { %3856 = vrot.lane.b32.xlu1 %v3854_v43, %s6800_s18  ;;  %v5381_v56 = vmul.f32 -1.442695, %v3847_v55  ;;  %v4077_v43 = vld [vmem:[#allocation38 + $0x1f8] sm:$0xff]  ;;  %v4076_v54 = vld [vmem:[#allocation38 + $0x1f0] sm:$0xff]  ;;  %v4075_v55 = vld [vmem:[#allocation38 + $0x1e8] sm:$0xff] }
0x3d99   :  { %4104 = vmatprep.subr.mxu0 %v4077_v43 }
0x3d9a   :  { %6249 = vpow2.f32 %v5381_v56  ;;  %v4074_v56 = vld [vmem:[#allocation38 + $0x1e0] sm:$0xff] }
0x3da7   :  { %v6250_v57 = vpop.eup %6249 }
0x3da8   :  { %v3851_v44 = vadd.f32 1.0, %v6250_v57  ;;  %v4073_v57 = vld [vmem:[#allocation38 + $0x1d8] sm:$0xff] }
0x3daa   :  { %6251 = vrcp.f32 %v3851_v44  ;;  %v4072_v44 = vld [vmem:[#allocation38 + $0x1d0] sm:$0xff] }
0x3db7   :  { %v6252_v59 = vpop.eup %6251 }
0x3db8   :  { %v3866_v16 = vsub.f32 1.0, %v6252_v59  ;;  %v3872_v18 = vmul.f32 %v6252_v59, %v3684_v52 }
0x3e0a   :  { %v3857_v60 = vpop.permute.xlu1 %3856 }
0x3e0b   :  { %v3859_v40 = vmul.f32 %v6252_v59, %v3857_v60  ;;  %v4071_v59 = vld [vmem:[#allocation38 + $0x1c8] sm:$0xff]  ;;  %v4070_v60 = vld [vmem:[#allocation38 + $0x1c0] sm:$0xff] }
0x3e0d   :  { %3861 = vrot.lane.b32.xlu0 %v3859_v40, %s6800_s18 }
0x3e7f   :  { %v3862_v62 = vpop.permute.xlu0 %3861 }
0x3e80   :  { %v3864_v51 = vadd.f32 %v3862_v62, %v7449_v3 }
0x3e82   :  { %6253 = vtanh.f32 %v3864_v51 }
0x3e8f   :  { %v6254_v14 = vpop.eup %6253 }
0x3e90   :  { %3868 = vrot.lane.b32.xlu1 %v6254_v14, %s6801_s23  ;;  %v7640_v14 = vld [vmem:[#allocation32 + $0x10] sm:$0xff] }
0x3f02   :  { %v3869_v17 = vpop.permute.xlu1 %3868 }
0x3f03   :  { %v3871_v15 = vmul.f32 %v3869_v17, %v3866_v16  ;;  %v7645_v16 = vld [vmem:[#allocation32 + $0x8] sm:$0xff]  ;;  %v7651_v17 = vld [vmem:[#allocation32] sm:$0xff] }
0x3f05   :  { %v7581_v19 = vadd.f32 %v3872_v18, %v3871_v15  ;;  %v5395_v18 = vld [vmem:[#allocation35] ss:$0 sm:$0xff]  ;;  %v2823_v15 = vpop.f32.mrf.mxu0 }
0x3f07   :  { %3875 = vrot.lane.b32.xlu0 %v7581_v19, %s6801_s23 }
0x3f79   :  { %v3876_v20 = vpop.permute.xlu0 %3875 }
0x3f7a   :  { %3878 = vst.msk [vmem:[#allocation4 + $0x30] sm:$0xff] %vm366_vm1, %v3876_v20  ;;  %5382 = vmatmul.mubr.msk.f32.vlgmr.msra.gmra.mxu0 %vm366_vm1, %v3876_v20  ;;  %5965 = vmatmul.mubr.msk.f32.vlgmr.msra.gmra.mxu1 %vm366_vm1, %v3876_v20 }
0x3f7b   :  { %5968 = vmatpush3.msra.mxu1 %v4166_v9  ;;  %5975 = vmatprep.mubr.msk.f32.mxu1 %vm366_vm1, %v4155_v21  ;;  %v4322_v9 = vld [vmem:[#allocation36 + $0x8] sm:$0xff] }
0x3f7c   :  { %5969 = vmatprep.subr.mxu1 %v4165_v2  ;;  %4144 = vmatprep.mubr.f32.mxu0 %v6798_v0 }
0x3f7d   :  { %5970 = vmatpush3.msra.mxu1 %v4165_v2  ;;  %4105 = vmatpush1.msra.mxu0 %v4076_v54 }
0x3f7e   :  { %5971 = vmatprep.subr.mxu1 %v4164_v22  ;;  %4106 = vmatprep.subr.mxu0 %v4075_v55  ;;  %v5396_v55 = vld [vmem:[%s7828_s22] ss:$0 sm:$0xff]  ;;  %s6803_s22 = smov [#allocation39]  }
0x3f7f   :  { %5972 = vmatpush3.msra.mxu1 %v4164_v22  ;;  %4107 = vmatpush1.msra.mxu0 %v4074_v56  ;;  %v2622_v22 = vlaneseq  ;;  %s5285_s12 = sshll.u32 %s6803_s22, 4  ;;  %s5286_s12 = int_to_ptr.vmem [resolvable:$true] %s5285_s12 }
0x3f80   :  { %5973 = vmatprep.subr.mxu1 %v4163_v23  ;;  %4108 = vmatprep.subr.mxu0 %v4073_v57  ;;  %s6729_s29 = scalar_lea.vmem %s5286_s12, 256  ;;  %p6734_p8 = scmp.lt.s32.totalorder %s5286_s12, %s5286_s12 }
0x3f81   :  { %5974 = vmatpush3.msra.mxu1 %v4163_v23  ;;  %v4161_v27 = vld [vmem:[#allocation4 + $0x30] sm:$0xff]  ;;  %4109 = vmatpush1.msra.mxu0 %v4072_v44  ;;  %p6730_p7 = scmp.ne.s32.totalorder %s5286_s12, %s6729_s29  ;;  %p6735_p9 = scmp.lt.s32.totalorder %s6729_s29, %s6729_s29 }
0x3f82   :  { %5976 = vmatmul.mubr.msk.f32.vlgmr.msra.gmra.mxu1 %vm366_vm1, %v4156_v24  ;;  %6009 = vmatprep.subr.mxu1 %v6798_v0  ;;  %v2623_v24 = vshrl.u32 %v2622_v22, 7 }
0x3f83   :  { %5978 = vmatprep.mubr.msk.f32.mxu1 %vm366_vm1, %v4157_v4  ;;  %4110 = vmatprep.subr.mxu0 %v4071_v59  ;;  %p6736_p10 = por %p6735_p9, %p6734_p8 }
0x3f84   :  { %4111 = vmatpush1.msra.mxu0 %v4070_v60  ;;  %6010 = vmatpush3.msra.mxu1 %v7634_v13 }
0x3f85   :  { %5987 = vmatprep.subr.mxu0 %v6798_v0  ;;  %6011 = vmatprep.subr.mxu1 %v6798_v0  ;;  %p6737_p11 = pnand %p6736_p10, %p6730_p7 }
0x3f86   :  { %5979 = vmatmul.mubr.msk.f32.gmra.mxu1 %vm366_vm1, %v4158_v25  ;;  %v2624_v25 = vsub.s32 0, %v2623_v24 }
0x3f87   :  { %5981 = vmatprep.mubr.msk.f32.mxu1 %vm366_vm1, %v4159_v6  ;;  %6012 = vmatpush3.msra.mxu1 %v7640_v14  ;;  %v2620_v6 = vld [vmem:[%s7830_s24] sm:$0x3] }
0x3f88   :  { %6013 = vmatprep.subr.mxu1 %v6798_v0 }
0x3f89   :  { %6014 = vmatpush3.msra.mxu1 %v7645_v16 }
0x3f8a   :  { %5982 = vmatmul.mubr.msk.f32.gmra.mxu1 %vm366_vm1, %v4160_v26  ;;  %6015 = vmatprep.subr.mxu1 %v6798_v0 }
0x3f8b   :  { %5984 = vmatprep.mubr.msk.f32.mxu1 %vm366_vm1, %v4161_v27  ;;  %6016 = vmatpush3.msra.mxu1 %v7651_v17  ;;  %v2628_v27 = vsub.s32 1, %v2623_v24 }
0x3f8c   :  { %6031 = vmatprep.subr.mxu1 %v6798_v0 }
0x403a   :  { %v4032_v8 = vpop.f32.mrf.mxu1 }
0x403b   :  { %v4043_v28 = vadd.f32 %v4032_v8, %v7445_v61  ;;  %v4036_v37 = vadd.f32 %v4032_v8, %v7449_v3 }
0x403c   :  { %v5966_v29 = vpop.f32.mrf.mxu1 }
0x403d   :  { %4045 = vrot.lane.b32.xlu1 %v4043_v28, %s6800_s18  ;;  %v5384_v42 = vmul.f32 -1.442695, %v4036_v37  ;;  %v2625_v28 = vrot.slane %v2620_v6, %v2624_v25  ;;  %v2629_v29 = vrot.slane %v2620_v6, %v2628_v27 }
0x403f   :  { %6255 = vpow2.f32 %v5384_v42 }
0x4042   :  { %v5977_v31 = vpop.f32.mrf.mxu1 }
0x4043   :  { %v4270_v12 = vadd.f32 %v5977_v31, %v7599_v30 }
0x4044   :  { %v4264_v58 = vpop.f32.mrf.mxu1 }
0x4045   :  { %4304 = vst.msk [vmem:[#allocation3 + $0x8] sm:$0xff] %vm496_vm2, %v4270_v12  ;;  %v4265_v32 = vadd.f32 %v7599_v30, %v4264_v58  ;;  %v2828_v12 = vadd.f32 %v2823_v15, %v2625_v28 }
0x4046   :  { %v5980_v33 = vpop.f32.mrf.mxu1 }
0x4047   :  { %4303 = vst.msk [vmem:[#allocation3] sm:$0xff] %vm496_vm2, %v4265_v32  ;;  %v4280_v34 = vadd.f32 %v5980_v33, %v7599_v30 }
0x4048   :  { %v4274_v35 = vpop.f32.mrf.mxu1 }
0x4049   :  { %4306 = vst.msk [vmem:[#allocation3 + $0x18] sm:$0xff] %vm496_vm2, %v4280_v34  ;;  %v4275_v61 = vadd.f32 %v7599_v30, %v4274_v35 }
0x404a   :  { %v5983_v36 = vpop.f32.mrf.mxu1 }
0x404b   :  { %4305 = vst.msk [vmem:[#allocation3 + $0x10] sm:$0xff] %vm496_vm2, %v4275_v61  ;;  %v4290_v38 = vadd.f32 %v5983_v36, %v7599_v30 }
0x404c   :  { %v4284_v39 = vpop.f32.mrf.mxu1  ;;  %v6256_v46 = vpop.eup %6255 }
0x404d   :  { %4308 = vst.msk [vmem:[#allocation3 + $0x28] sm:$0xff] %vm496_vm2, %v4290_v38  ;;  %v4285_v41 = vadd.f32 %v7599_v30, %v4284_v39  ;;  %v4040_v47 = vadd.f32 1.0, %v6256_v46 }
0x404f   :  { %4307 = vst.msk [vmem:[#allocation3 + $0x20] sm:$0xff] %vm496_vm2, %v4285_v41  ;;  %6257 = vrcp.f32 %v4040_v47 }
0x405c   :  { %v6258_v48 = vpop.eup %6257 }
0x405d   :  { %v4061_v51 = vmul.f32 %v6258_v48, %v7581_v19  ;;  %v2825_v19 = vpop.f32.mrf.mxu0 }
0x405e   :  { %v2829_v32 = vadd.f32 %v2825_v19, %v2629_v29 }
0x405f   :  { %v3012_v20 = vpop.f32.mrf.mxu0 }
0x4060   :  { %v3017_v33 = vadd.f32 %v3012_v20, %v2828_v12 }
0x4061   :  { %v3014_v2 = vpop.f32.mrf.mxu0 }
0x4062   :  { %v3018_v34 = vadd.f32 %v3014_v2, %v2829_v32 }
0x4063   :  { %v3201_v21 = vpop.f32.mrf.mxu0 }
0x4064   :  { %v3206_v35 = vadd.f32 %v3201_v21, %v3017_v33 }
0x4065   :  { %v3203_v23 = vpop.f32.mrf.mxu0 }
0x4066   :  { %v3207_v36 = vadd.f32 %v3203_v23, %v3018_v34 }
0x4067   :  { %v3390_v4 = vpop.f32.mrf.mxu0 }
0x4068   :  { %v3395_v38 = vadd.f32 %v3390_v4, %v3206_v35 }
0x4069   :  { %v3392_v26 = vpop.f32.mrf.mxu0 }
0x406a   :  { %v3396_v41 = vadd.f32 %v3392_v26, %v3207_v36 }
0x406b   :  { %v3579_v8 = vpop.f32.mrf.mxu0 }
0x406c   :  { %v3584_v37 = vadd.f32 %v3579_v8, %v3395_v38 }
0x406d   :  { %v3581_v31 = vpop.f32.mrf.mxu0 }
0x406e   :  { %v3585_v42 = vadd.f32 %v3581_v31, %v3396_v41  ;;  %v4519_v31 = vld [vmem:[#allocation3 + $0x8] sm:$0xff] }
0x406f   :  { %v3768_v58 = vpop.f32.mrf.mxu0 }
0x4070   :  { %v3773_v46 = vadd.f32 %v3768_v58, %v3584_v37 }
0x4071   :  { %v3770_v61 = vpop.f32.mrf.mxu0 }
0x4073   :  { %v3957_v39 = vpop.f32.mrf.mxu0 }
0x4075   :  { %v3959_v47 = vpop.f32.mrf.mxu0 }
0x40af   :  { %v4046_v50 = vpop.permute.xlu1 %4045 }
0x40b0   :  { %v4048_v52 = vmul.f32 %v6258_v48, %v4046_v50  ;;  %v3962_v50 = vadd.f32 %v3957_v39, %v3773_v46 }
0x40b2   :  { %4050 = vrot.lane.b32.xlu0 %v4048_v52, %s6800_s18 }
0x4124   :  { %v4051_v45 = vpop.permute.xlu0 %4050 }
0x4125   :  { %v4053_v53 = vadd.f32 %v4051_v45, %v7449_v3  ;;  %v4055_v3 = vsub.f32 1.0, %v6258_v48  ;;  %v3774_v48 = vadd.f32 %v3770_v61, %v3585_v42 }
0x4127   :  { %6259 = vtanh.f32 %v4053_v53  ;;  %v3963_v45 = vadd.f32 %v3959_v47, %v3774_v48 }
0x4134   :  { %v6260_v40 = vpop.eup %6259 }
0x4135   :  { %4057 = vrot.lane.b32.xlu1 %v6260_v40, %s6801_s23 }
0x4139   :  { %4486 = vrot.lane.b32.xlu1 %v5395_v18, %s6800_s18 }
0x41a7   :  { %v4058_v62 = vpop.permute.xlu1 %4057 }
0x41a8   :  { %v4060_v49 = vmul.f32 %v4058_v62, %v4055_v3 }
0x41aa   :  { %v4062_v63 = vadd.f32 %v4061_v51, %v4060_v49 }
0x41ac   :  { %4064 = vrot.lane.b32.xlu0 %v4062_v63, %s6801_s23 }
0x421e   :  { %v4065_v5 = vpop.permute.xlu0 %4064 }
0x421f   :  { %4067 = vst.msk [vmem:[#allocation4 + $0x38] sm:$0xff] %vm366_vm1, %v4065_v5  ;;  %5385 = vmatmul.mubr.msk.f32.vlgmr.msra.gmra.mxu0 %vm366_vm1, %v4065_v5 }
0x4220   :  { %5988 = vmatpush3.msra.mxu0 %v4324_v1  ;;  %5995 = vmatprep.mubr.msk.f32.mxu0 %vm6799_vm0, %v6798_v0 }
0x4221   :  { %5989 = vmatprep.subr.mxu0 %v6798_v0 }
0x4222   :  { %5990 = vmatpush3.msra.mxu0 %v4323_v7 }
0x4223   :  { %5991 = vmatprep.subr.mxu0 %v6798_v0 }
0x4224   :  { %5992 = vmatpush3.msra.mxu0 %v4322_v9 }
0x4225   :  { %5993 = vmatprep.subr.mxu0 %v6798_v0 }
0x4226   :  { %5994 = vmatpush3.msra.mxu0 %v4321_v10  ;;  %v4162_v11 = vld [vmem:[#allocation4 + $0x38] sm:$0xff] }
0x4227   :  { %5996 = vmatmul.mubr.msk.f32.vlgmr.msra.gmra.mxu0 %vm366_vm1, %v4065_v5  ;;  %5985 = vmatmul.mubr.msk.f32.gmra.mxu1 %vm366_vm1, %v4162_v11  ;;  %v4405_v5 = vld [vmem:[#allocation3] sm:$0xff] }
0x4228   :  { %5998 = vmatprep.subr.mxu0 %v6798_v0  ;;  %6006 = vmatprep.mubr.msk.f32.mxu0 %vm6799_vm0, %v6798_v0 }
0x4229   :  { %6017 = vmatprep.mubr.msk.f32.mxu1 %vm6799_vm0, %v6798_v0  ;;  %5999 = vmatpush3.msra.mxu0 %v7634_v13 }
0x422a   :  { %6000 = vmatprep.subr.mxu0 %v6798_v0 }
0x422b   :  { %6001 = vmatpush3.msra.mxu0 %v7640_v14 }
0x422c   :  { %6002 = vmatprep.subr.mxu0 %v6798_v0 }
0x422d   :  { %6003 = vmatpush3.msra.mxu0 %v7645_v16 }
0x422e   :  { %6004 = vmatprep.subr.mxu0 %v6798_v0 }
0x422f   :  { %6005 = vmatpush3.msra.mxu0 %v7651_v17 }
0x4230   :  { %6020 = vmatprep.subr.mxu0 %v6798_v0 }
0x42df   :  { %v4146_v52 = vpop.f32.mrf.mxu0 }
0x42e0   :  { %v4151_v53 = vadd.f32 %v4146_v52, %v3962_v50 }
0x42e1   :  { %v4148_v43 = vpop.f32.mrf.mxu0 }
0x42e2   :  { %4153 = vst [vmem:[#allocation5] sm:$0xff] %v4151_v53  ;;  %v7662_v54 = vadd.f32 %v4148_v43, %v3963_v45 }
0x42e4   :  { %4154 = vst [vmem:[#allocation5 + $0x8] sm:$0xff] %v7662_v54 }
0x42e7   :  { %v4398_v56 = vpop.f32.mrf.mxu0  ;;  %v5986_v57 = vpop.f32.mrf.mxu1 }
0x42e8   :  { %v4399_v44 = vadd.f32 %v5396_v55, %v4398_v56  ;;  %v4300_v59 = vadd.f32 %v5986_v57, %v7599_v30  ;;  %v4623_v55 = vld [vmem:[#allocation3 + $0x10] sm:$0xff] }
0x42e9   :  { %v5997_v60 = vpop.f32.mrf.mxu0  ;;  %v4294_v40 = vpop.f32.mrf.mxu1 }
0x42ea   :  { %vm4402_vm5 = vcmp.gt.f32.partialorder %v4399_v44, 0.0  ;;  %v4403_v3 = vmul.f32 0.2, %v4399_v44  ;;  %4310 = vst.msk [vmem:[#allocation3 + $0x38] sm:$0xff] %vm496_vm2, %v4300_v59  ;;  %v4295_v62 = vadd.f32 %v7599_v30, %v4294_v40  ;;  %v7683_v30 = vpop.permute.xlu1 %4486 }
0x42ec   :  { %v4404_v51 = vsel %vm4402_vm5, %v4399_v44, %v4403_v3  ;;  %4309 = vst.msk [vmem:[#allocation3 + $0x30] sm:$0xff] %vm496_vm2, %v4295_v62 }
0x42ed   :  { %6007 = vmatmul.mubr.msk.f32.vlgmr.msra.gmra.mxu0 %vm366_vm1, %v4404_v51 }
0x42ee   :  { %6021 = vmatpush3.msra.mxu0 %v7634_v13  ;;  %6028 = vmatprep.mubr.msk.f32.mxu0 %vm6799_vm0, %v6798_v0 }
0x42ef   :  { %6022 = vmatprep.subr.mxu0 %v6798_v0 }
0x42f0   :  { %6023 = vmatpush3.msra.mxu0 %v7640_v14 }
0x42f1   :  { %6024 = vmatprep.subr.mxu0 %v6798_v0 }
0x42f2   :  { %6025 = vmatpush3.msra.mxu0 %v7645_v16 }
0x42f3   :  { %6026 = vmatprep.subr.mxu0 %v6798_v0 }
0x42f4   :  { %6027 = vmatpush3.msra.mxu0 %v7651_v17 }
0x42f5   :  { %6042 = vmatprep.subr.mxu0 %v6798_v0 }
0x43ad   :  { %v4475_v49 = vpop.f32.mrf.mxu0 }
0x43ae   :  { %v4489_v63 = vadd.f32 %v7683_v30, %v4475_v49  ;;  %v4479_v7 = vadd.f32 %v4475_v49, %v4405_v5 }
0x43af   :  { %v6008_v1 = vpop.f32.mrf.mxu0 }
0x43b0   :  { %4491 = vrot.lane.b32.xlu0 %v4489_v63, %s6800_s18  ;;  %v5399_v9 = vmul.f32 -1.442695, %v4479_v7 }
0x43b2   :  { %6261 = vpow2.f32 %v5399_v9 }
0x43bf   :  { %v6262_v10 = vpop.eup %6261 }
0x43c0   :  { %v4483_v11 = vadd.f32 1.0, %v6262_v10 }
0x43c2   :  { %6263 = vrcp.f32 %v4483_v11 }
0x43cf   :  { %v6264_v18 = vpop.eup %6263 }
0x43d0   :  { %v4501_v23 = vsub.f32 1.0, %v6264_v18 }
0x4422   :  { %v4492_v15 = vpop.permute.xlu0 %4491 }
0x4423   :  { %v4494_v19 = vmul.f32 %v6264_v18, %v4492_v15 }
0x4425   :  { %4496 = vrot.lane.b32.xlu1 %v4494_v19, %s6800_s18  ;;  %v4734_v19 = vld [vmem:[#allocation3 + $0x18] sm:$0xff] }
0x4429   :  { %4507 = vrot.lane.b32.xlu1 %v4404_v51, %s6802_s17 }
0x4497   :  { %v4497_v20 = vpop.permute.xlu1 %4496 }
0x4498   :  { %v4499_v2 = vadd.f32 %v4497_v20, %v4405_v5 }
0x449a   :  { %6265 = vtanh.f32 %v4499_v2 }
0x449b   :  { %v4508_v22 = vpop.permute.xlu1 %4507 }
0x449c   :  { %v4510_v4 = vmul.f32 %v6264_v18, %v4508_v22 }
0x44a7   :  { %v6266_v21 = vpop.eup %6265 }
0x44a8   :  { %4503 = vrot.lane.b32.xlu0 %v6266_v21, %s6801_s23 }
0x451a   :  { %v4504_v24 = vpop.permute.xlu0 %4503 }
0x451b   :  { %v4506_v25 = vmul.f32 %v4504_v24, %v4501_v23 }
0x451d   :  { %v4511_v6 = vadd.f32 %v4510_v4, %v4506_v25 }
0x451f   :  { %4514 = vrot.lane.b32.xlu0 %v4511_v6, %s6801_s23 }
0x4591   :  { %v4515_v26 = vpop.permute.xlu0 %4514 }
0x4592   :  { %v4517_v27 = vadd.f32 %v4515_v26, %v4151_v53  ;;  %6018 = vmatmul.mubr.msk.f32.vlgmr.msra.gmra.mxu1 %vm366_vm1, %v4515_v26 }
0x4593   :  { %6032 = vmatpush3.msra.mxu1 %v7634_v13  ;;  %6039 = vmatprep.mubr.msk.f32.mxu1 %vm6799_vm0, %v6798_v0 }
0x4594   :  { %4518 = vst.msk [vmem:[#allocation5] sm:$0xff] %vm366_vm1, %v4517_v27  ;;  %6033 = vmatprep.subr.mxu1 %v6798_v0 }
0x4595   :  { %6034 = vmatpush3.msra.mxu1 %v7640_v14 }
0x4596   :  { %6035 = vmatprep.subr.mxu1 %v6798_v0 }
0x4597   :  { %6036 = vmatpush3.msra.mxu1 %v7645_v16 }
0x4598   :  { %6037 = vmatprep.subr.mxu1 %v6798_v0 }
0x4599   :  { %6038 = vmatpush3.msra.mxu1 %v7651_v17 }
0x459a   :  { %6053 = vmatprep.subr.mxu1 %v6798_v0 }
0x459b   :  { %v4619_v48 = vld [vmem:[#allocation5] sm:$0xff] }
0x4652   :  { %v4588_v8 = vpop.f32.mrf.mxu1 }
0x4653   :  { %v4599_v28 = vadd.f32 %v4588_v8, %v7683_v30  ;;  %v4592_v12 = vadd.f32 %v4588_v8, %v4519_v31 }
0x4654   :  { %v6019_v29 = vpop.f32.mrf.mxu1 }
0x4655   :  { %4601 = vrot.lane.b32.xlu1 %v4599_v28, %s6800_s18  ;;  %v5401_v58 = vmul.f32 -1.442695, %v4592_v12 }
0x4657   :  { %6267 = vpow2.f32 %v5401_v58 }
0x4664   :  { %v6268_v32 = vpop.eup %6267 }
0x4665   :  { %v4596_v33 = vadd.f32 1.0, %v6268_v32 }
0x4667   :  { %6269 = vrcp.f32 %v4596_v33 }
0x4674   :  { %v6270_v34 = vpop.eup %6269 }
0x4675   :  { %v4611_v41 = vsub.f32 1.0, %v6270_v34  ;;  %v4617_v42 = vmul.f32 %v6270_v34, %v4511_v6 }
0x46c7   :  { %v4602_v35 = vpop.permute.xlu1 %4601 }
0x46c8   :  { %v4604_v61 = vmul.f32 %v6270_v34, %v4602_v35  ;;  %v4844_v34 = vld [vmem:[#allocation3 + $0x20] sm:$0xff] }
0x46ca   :  { %4606 = vrot.lane.b32.xlu0 %v4604_v61, %s6800_s18 }
0x473c   :  { %v4607_v36 = vpop.permute.xlu0 %4606 }
0x473d   :  { %v4609_v38 = vadd.f32 %v4607_v36, %v4519_v31 }
0x473f   :  { %6271 = vtanh.f32 %v4609_v38 }
0x474c   :  { %v6272_v39 = vpop.eup %6271 }
0x474d   :  { %4613 = vrot.lane.b32.xlu1 %v6272_v39, %s6801_s23 }
0x47bf   :  { %v4614_v37 = vpop.permute.xlu1 %4613 }
0x47c0   :  { %v4616_v46 = vmul.f32 %v4614_v37, %v4611_v41 }
0x47c2   :  { %v4618_v47 = vadd.f32 %v4617_v42, %v4616_v46 }
0x47c4   :  { %v4620_v50 = vadd.f32 %v4619_v48, %v4618_v47  ;;  %4625 = vrot.lane.b32.xlu0 %v4618_v47, %s6801_s23 }
0x47c6   :  { %4622 = vst.msk [vmem:[#allocation5] sm:$0xff] %vm4621_vm6, %v4620_v50 }
0x4836   :  { %v4626_v52 = vpop.permute.xlu0 %4625 }
0x4837   :  { %6029 = vmatmul.mubr.msk.f32.vlgmr.msra.gmra.mxu0 %vm366_vm1, %v4626_v52 }
0x4838   :  { %6043 = vmatpush3.msra.mxu0 %v7634_v13  ;;  %6050 = vmatprep.mubr.msk.f32.mxu0 %vm6799_vm0, %v6798_v0 }
0x4839   :  { %6044 = vmatprep.subr.mxu0 %v6798_v0 }
0x483a   :  { %6045 = vmatpush3.msra.mxu0 %v7640_v14 }
0x483b   :  { %6046 = vmatprep.subr.mxu0 %v6798_v0 }
0x483c   :  { %6047 = vmatpush3.msra.mxu0 %v7645_v16 }
0x483d   :  { %6048 = vmatprep.subr.mxu0 %v6798_v0 }
0x483e   :  { %6049 = vmatpush3.msra.mxu0 %v7651_v17 }
0x483f   :  { %6064 = vmatprep.subr.mxu0 %v6798_v0 }
0x48f7   :  { %v4695_v45 = vpop.f32.mrf.mxu0 }
0x48f8   :  { %v4706_v53 = vadd.f32 %v4695_v45, %v7683_v30  ;;  %v4699_v56 = vadd.f32 %v4695_v45, %v4623_v55 }
0x48f9   :  { %v6030_v43 = vpop.f32.mrf.mxu0 }
0x48fa   :  { %4708 = vrot.lane.b32.xlu1 %v4706_v53, %s6800_s18  ;;  %v5403_v57 = vmul.f32 -1.442695, %v4699_v56 }
0x48fc   :  { %6273 = vpow2.f32 %v5403_v57  ;;  %v4953_v57 = vld [vmem:[#allocation3 + $0x28] sm:$0xff] }
0x4909   :  { %v6274_v44 = vpop.eup %6273 }
0x490a   :  { %v4703_v59 = vadd.f32 1.0, %v6274_v44 }
0x490c   :  { %6275 = vrcp.f32 %v4703_v59 }
0x4919   :  { %v6276_v60 = vpop.eup %6275 }
0x491a   :  { %v4718_v63 = vsub.f32 1.0, %v6276_v60  ;;  %v4724_v5 = vmul.f32 %v6276_v60, %v4618_v47 }
0x496c   :  { %v4709_v40 = vpop.permute.xlu1 %4708 }
0x496d   :  { %v4711_v3 = vmul.f32 %v6276_v60, %v4709_v40 }
0x496f   :  { %4713 = vrot.lane.b32.xlu0 %v4711_v3, %s6800_s18 }
0x49e1   :  { %v4714_v62 = vpop.permute.xlu0 %4713 }
0x49e2   :  { %v4716_v51 = vadd.f32 %v4714_v62, %v4623_v55 }
0x49e4   :  { %6277 = vtanh.f32 %v4716_v51 }
0x49f1   :  { %v6278_v49 = vpop.eup %6277 }
0x49f2   :  { %4720 = vrot.lane.b32.xlu1 %v6278_v49, %s6801_s23 }
0x4a64   :  { %v4721_v1 = vpop.permute.xlu1 %4720 }
0x4a65   :  { %v4723_v7 = vmul.f32 %v4721_v1, %v4718_v63 }
0x4a67   :  { %v7724_v9 = vadd.f32 %v4724_v5, %v4723_v7 }
0x4a69   :  { %4735 = vrot.lane.b32.xlu0 %v7724_v9, %s6801_s23 }
0x4adb   :  { %v4736_v10 = vpop.permute.xlu0 %4735 }
0x4adc   :  { %6040 = vmatmul.mubr.msk.f32.vlgmr.msra.gmra.mxu1 %vm366_vm1, %v4736_v10 }
0x4add   :  { %6054 = vmatpush3.msra.mxu1 %v7634_v13  ;;  %6061 = vmatprep.mubr.msk.f32.mxu1 %vm6799_vm0, %v6798_v0 }
0x4ade   :  { %6055 = vmatprep.subr.mxu1 %v6798_v0 }
0x4adf   :  { %6056 = vmatpush3.msra.mxu1 %v7640_v14 }
0x4ae0   :  { %6057 = vmatprep.subr.mxu1 %v6798_v0 }
0x4ae1   :  { %6058 = vmatpush3.msra.mxu1 %v7645_v16 }
0x4ae2   :  { %6059 = vmatprep.subr.mxu1 %v6798_v0 }
0x4ae3   :  { %6060 = vmatpush3.msra.mxu1 %v7651_v17 }
0x4ae4   :  { %6075 = vmatprep.subr.mxu1 %v6798_v0 }
0x4b9c   :  { %v4805_v11 = vpop.f32.mrf.mxu1 }
0x4b9d   :  { %v4816_v18 = vadd.f32 %v4805_v11, %v7683_v30  ;;  %v4809_v20 = vadd.f32 %v4805_v11, %v4734_v19 }
0x4b9e   :  { %v6041_v15 = vpop.f32.mrf.mxu1 }
0x4b9f   :  { %4818 = vrot.lane.b32.xlu1 %v4816_v18, %s6800_s18  ;;  %v5405_v2 = vmul.f32 -1.442695, %v4809_v20  ;;  %v5056_v20 = vld [vmem:[#allocation3 + $0x30] sm:$0xff] }
0x4ba1   :  { %6279 = vpow2.f32 %v5405_v2 }
0x4bae   :  { %v6280_v21 = vpop.eup %6279 }
0x4baf   :  { %v4813_v22 = vadd.f32 1.0, %v6280_v21 }
0x4bb1   :  { %6281 = vrcp.f32 %v4813_v22 }
0x4bbe   :  { %v6282_v23 = vpop.eup %6281 }
0x4bbf   :  { %v4828_v27 = vsub.f32 1.0, %v6282_v23  ;;  %v4834_v28 = vmul.f32 %v6282_v23, %v7724_v9 }
0x4c11   :  { %v4819_v24 = vpop.permute.xlu1 %4818 }
0x4c12   :  { %v4821_v4 = vmul.f32 %v6282_v23, %v4819_v24 }
0x4c14   :  { %4823 = vrot.lane.b32.xlu0 %v4821_v4, %s6800_s18 }
0x4c86   :  { %v4824_v25 = vpop.permute.xlu0 %4823 }
0x4c87   :  { %v4826_v6 = vadd.f32 %v4824_v25, %v4734_v19 }
0x4c89   :  { %6283 = vtanh.f32 %v4826_v6 }
0x4c96   :  { %v6284_v26 = vpop.eup %6283 }
0x4c97   :  { %4830 = vrot.lane.b32.xlu1 %v6284_v26, %s6801_s23 }
0x4d09   :  { %v4831_v8 = vpop.permute.xlu1 %4830 }
0x4d0a   :  { %v4833_v29 = vmul.f32 %v4831_v8, %v4828_v27 }
0x4d0c   :  { %v7744_v31 = vadd.f32 %v4834_v28, %v4833_v29 }
0x4d0e   :  { %4845 = vrot.lane.b32.xlu0 %v7744_v31, %s6801_s23 }
0x4d80   :  { %v4846_v12 = vpop.permute.xlu0 %4845 }
0x4d81   :  { %6051 = vmatmul.mubr.msk.f32.vlgmr.msra.gmra.mxu0 %vm366_vm1, %v4846_v12 }
0x4d82   :  { %6065 = vmatpush3.msra.mxu0 %v7634_v13  ;;  %6072 = vmatprep.mubr.msk.f32.mxu0 %vm6799_vm0, %v6798_v0 }
0x4d83   :  { %6066 = vmatprep.subr.mxu0 %v6798_v0 }
0x4d84   :  { %6067 = vmatpush3.msra.mxu0 %v7640_v14 }
0x4d85   :  { %6068 = vmatprep.subr.mxu0 %v6798_v0 }
0x4d86   :  { %6069 = vmatpush3.msra.mxu0 %v7645_v16 }
0x4d87   :  { %6070 = vmatprep.subr.mxu0 %v6798_v0 }
0x4d88   :  { %6071 = vmatpush3.msra.mxu0 %v7651_v17 }
0x4e41   :  { %v4915_v58 = vpop.f32.mrf.mxu0 }
0x4e42   :  { %v4926_v32 = vadd.f32 %v4915_v58, %v7683_v30  ;;  %v4919_v35 = vadd.f32 %v4915_v58, %v4844_v34 }
0x4e43   :  { %v6052_v33 = vpop.f32.mrf.mxu0 }
0x4e44   :  { %4928 = vrot.lane.b32.xlu1 %v4926_v32, %s6800_s18  ;;  %v5407_v61 = vmul.f32 -1.442695, %v4919_v35 }
0x4e46   :  { %6285 = vpow2.f32 %v5407_v61  ;;  %v5166_v61 = vld [vmem:[#allocation3 + $0x38] sm:$0xff] }
0x4e53   :  { %v6286_v36 = vpop.eup %6285 }
0x4e54   :  { %v4923_v38 = vadd.f32 1.0, %v6286_v36 }
0x4e56   :  { %6287 = vrcp.f32 %v4923_v38 }
0x4e63   :  { %v6288_v39 = vpop.eup %6287 }
0x4e64   :  { %v4938_v48 = vsub.f32 1.0, %v6288_v39  ;;  %v4944_v52 = vmul.f32 %v6288_v39, %v7744_v31 }
0x4eb6   :  { %v4929_v41 = vpop.permute.xlu1 %4928 }
0x4eb7   :  { %v4931_v37 = vmul.f32 %v6288_v39, %v4929_v41 }
0x4eb9   :  { %4933 = vrot.lane.b32.xlu0 %v4931_v37, %s6800_s18 }
0x4f2b   :  { %v4934_v42 = vpop.permute.xlu0 %4933 }
0x4f2c   :  { %v4936_v46 = vadd.f32 %v4934_v42, %v4844_v34 }
0x4f2e   :  { %6289 = vtanh.f32 %v4936_v46 }
0x4f3b   :  { %v6290_v47 = vpop.eup %6289 }
0x4f3c   :  { %4940 = vrot.lane.b32.xlu1 %v6290_v47, %s6801_s23 }
0x4fae   :  { %v4941_v50 = vpop.permute.xlu1 %4940 }
0x4faf   :  { %v4943_v45 = vmul.f32 %v4941_v50, %v4938_v48  ;;  %v4726_v48 = vld [vmem:[#allocation5] sm:$0xff] }
0x4fb1   :  { %v4945_v53 = vadd.f32 %v4944_v52, %v4943_v45 }
0x4fb3   :  { %4948 = vrot.lane.b32.xlu0 %v4945_v53, %s6801_s23 }
0x5025   :  { %v4949_v43 = vpop.permute.xlu0 %4948 }
0x5026   :  { %v4951_v55 = vadd.f32 %v4949_v43, %v7662_v54  ;;  %6062 = vmatmul.mubr.msk.f32.vlgmr.msra.gmra.mxu1 %vm366_vm1, %v4949_v43 }
0x5027   :  { %6076 = vmatpush3.msra.mxu1 %v7634_v13  ;;  %6083 = vmatprep.mubr.msk.f32.mxu1 %vm6799_vm0, %v6798_v0 }
0x5028   :  { %4952 = vst.msk [vmem:[#allocation5 + $0x8] sm:$0xff] %vm366_vm1, %v4951_v55  ;;  %6077 = vmatprep.subr.mxu1 %v6798_v0 }
0x5029   :  { %6078 = vmatpush3.msra.mxu1 %v7640_v14 }
0x502a   :  { %6079 = vmatprep.subr.mxu1 %v6798_v0 }
0x502b   :  { %6080 = vmatpush3.msra.mxu1 %v7645_v16 }
0x502c   :  { %6081 = vmatprep.subr.mxu1 %v6798_v0 }
0x502d   :  { %6082 = vmatpush3.msra.mxu1 %v7651_v17 }
0x502f   :  { %v5053_v7 = vld [vmem:[#allocation5 + $0x8] sm:$0xff] }
0x50e6   :  { %v5022_v54 = vpop.f32.mrf.mxu1 }
0x50e7   :  { %v5033_v13 = vadd.f32 %v5022_v54, %v7683_v30  ;;  %v5026_v44 = vadd.f32 %v5022_v54, %v4953_v57 }
0x50e8   :  { %v6063_v56 = vpop.f32.mrf.mxu1 }
0x50e9   :  { %5035 = vrot.lane.b32.xlu1 %v5033_v13, %s6800_s18  ;;  %v5409_v59 = vmul.f32 -1.442695, %v5026_v44 }
0x50eb   :  { %6291 = vpow2.f32 %v5409_v59 }
0x50f8   :  { %v6292_v60 = vpop.eup %6291 }
0x50f9   :  { %v5030_v14 = vadd.f32 1.0, %v6292_v60 }
0x50fb   :  { %6293 = vrcp.f32 %v5030_v14 }
0x5108   :  { %v6294_v40 = vpop.eup %6293 }
0x5109   :  { %v5045_v51 = vsub.f32 1.0, %v6294_v40  ;;  %v5051_v63 = vmul.f32 %v6294_v40, %v4945_v53 }
0x515b   :  { %v5036_v3 = vpop.permute.xlu1 %5035 }
0x515c   :  { %v5038_v16 = vmul.f32 %v6294_v40, %v5036_v3 }
0x515e   :  { %5040 = vrot.lane.b32.xlu0 %v5038_v16, %s6800_s18 }
0x51d0   :  { %v5041_v0 = vpop.permute.xlu0 %5040 }
0x51d1   :  { %v5043_v17 = vadd.f32 %v5041_v0, %v4953_v57 }
0x51d3   :  { %6295 = vtanh.f32 %v5043_v17 }
0x51e0   :  { %v6296_v62 = vpop.eup %6295 }
0x51e1   :  { %5047 = vrot.lane.b32.xlu1 %v6296_v62, %s6801_s23 }
0x5253   :  { %v5048_v49 = vpop.permute.xlu1 %5047 }
0x5254   :  { %v5050_v1 = vmul.f32 %v5048_v49, %v5045_v51 }
0x5256   :  { %v5052_v5 = vadd.f32 %v5051_v63, %v5050_v1 }
0x5258   :  { %v5054_v10 = vadd.f32 %v5053_v7, %v5052_v5  ;;  %5058 = vrot.lane.b32.xlu0 %v5052_v5, %s6801_s23 }
0x525a   :  { %5055 = vst.msk [vmem:[#allocation5 + $0x8] sm:$0xff] %vm4621_vm6, %v5054_v10 }
0x5261   :  { %v5159_v59 = vld [vmem:[#allocation5 + $0x8] sm:$0xff] }
0x52ca   :  { %v5059_v11 = vpop.permute.xlu0 %5058 }
0x52cb   :  { %6073 = vmatmul.mubr.msk.f32.vlgmr.msra.gmra.mxu0 %vm366_vm1, %v5059_v11 }
0x538b   :  { %v5128_v18 = vpop.f32.mrf.mxu0 }
0x538c   :  { %v5139_v15 = vadd.f32 %v5128_v18, %v7683_v30  ;;  %v5132_v2 = vadd.f32 %v5128_v18, %v5056_v20 }
0x538d   :  { %v6074_v19 = vpop.f32.mrf.mxu0 }
0x538e   :  { %5141 = vrot.lane.b32.xlu1 %v5139_v15, %s6800_s18  ;;  %v5411_v21 = vmul.f32 -1.442695, %v5132_v2 }
0x5390   :  { %6297 = vpow2.f32 %v5411_v21 }
0x539d   :  { %v6298_v22 = vpop.eup %6297 }
0x539e   :  { %v5136_v23 = vadd.f32 1.0, %v6298_v22 }
0x53a0   :  { %6299 = vrcp.f32 %v5136_v23 }
0x53ad   :  { %v6300_v24 = vpop.eup %6299 }
0x53ae   :  { %v5151_v8 = vsub.f32 1.0, %v6300_v24  ;;  %v5157_v29 = vmul.f32 %v6300_v24, %v5052_v5 }
0x5400   :  { %v5142_v4 = vpop.permute.xlu1 %5141 }
0x5401   :  { %v5144_v25 = vmul.f32 %v6300_v24, %v5142_v4 }
0x5403   :  { %5146 = vrot.lane.b32.xlu0 %v5144_v25, %s6800_s18 }
0x5475   :  { %v5147_v6 = vpop.permute.xlu0 %5146 }
0x5476   :  { %v5149_v26 = vadd.f32 %v5147_v6, %v5056_v20 }
0x5478   :  { %6301 = vtanh.f32 %v5149_v26 }
0x5485   :  { %v6302_v27 = vpop.eup %6301 }
0x5486   :  { %5153 = vrot.lane.b32.xlu1 %v6302_v27, %s6801_s23 }
0x54f8   :  { %v5154_v28 = vpop.permute.xlu1 %5153 }
0x54f9   :  { %v5156_v12 = vmul.f32 %v5154_v28, %v5151_v8 }
0x54fb   :  { %v5158_v58 = vadd.f32 %v5157_v29, %v5156_v12 }
0x54fd   :  { %5167 = vrot.lane.b32.xlu0 %v5158_v58, %s6801_s23 }
0x556f   :  { %v5168_v32 = vpop.permute.xlu0 %5167 }
0x5570   :  { %6084 = vmatmul.mubr.msk.f32.vlgmr.msra.gmra.mxu1 %vm366_vm1, %v5168_v32 }
0x5630   :  { %v5237_v33 = vpop.f32.mrf.mxu1 }
0x5631   :  { %v5248_v34 = vadd.f32 %v5237_v33, %v7683_v30  ;;  %v5241_v36 = vadd.f32 %v5237_v33, %v5166_v61 }
0x5632   :  { %v6085_v35 = vpop.f32.mrf.mxu1 }
0x5633   :  { %5250 = vrot.lane.b32.xlu1 %v5248_v34, %s6800_s18  ;;  %v5413_v38 = vmul.f32 -1.442695, %v5241_v36 }
0x5635   :  { %6303 = vpow2.f32 %v5413_v38 }
0x5642   :  { %v6304_v39 = vpop.eup %6303 }
0x5643   :  { %v5245_v41 = vadd.f32 1.0, %v6304_v39 }
0x5645   :  { %6305 = vrcp.f32 %v5245_v41 }
0x5652   :  { %v6306_v37 = vpop.eup %6305 }
0x5653   :  { %v5266_v13 = vmul.f32 %v6306_v37, %v5158_v58 }
0x56a5   :  { %v5251_v42 = vpop.permute.xlu1 %5250 }
0x56a6   :  { %v5253_v46 = vmul.f32 %v6306_v37, %v5251_v42 }
0x56a8   :  { %5255 = vrot.lane.b32.xlu0 %v5253_v46, %s6800_s18 }
0x56ac   :  { %4728 = vrot.lane.b32.xlu0 %v7724_v9, %s6802_s17 }
0x56b0   :  { %4838 = vrot.lane.b32.xlu0 %v7744_v31, %s6800_s18  ;;  %v5260_v31 = vsub.f32 1.0, %v6306_v37 }
0x571a   :  { %v5256_v30 = vpop.permute.xlu0 %5255 }
0x571b   :  { %v5258_v47 = vadd.f32 %v5256_v30, %v5166_v61 }
0x571d   :  { %6307 = vtanh.f32 %v5258_v47 }
0x571e   :  { %v4729_v50 = vpop.permute.xlu0 %4728 }
0x571f   :  { %v4731_v52 = vadd.f32 %v4729_v50, %v4726_v48 }
0x5721   :  { %4733 = vst.msk [vmem:[#allocation5] sm:$0xff] %vm4732_vm7, %v4731_v52 }
0x5722   :  { %v4839_v53 = vpop.permute.xlu0 %4838 }
0x5728   :  { %v4836_v45 = vld [vmem:[#allocation5] sm:$0xff] }
0x5729   :  { %v4841_v43 = vadd.f32 %v4839_v53, %v4836_v45 }
0x572a   :  { %v6308_v55 = vpop.eup %6307 }
0x572b   :  { %4843 = vst.msk [vmem:[#allocation5] sm:$0xff] %vm4842_vm8, %v4841_v43  ;;  %5262 = vrot.lane.b32.xlu1 %v6308_v55, %s6801_s23 }
0x572f   :  { %5161 = vrot.lane.b32.xlu1 %v5158_v58, %s6802_s17 }
0x5732   :  { %v5275_v9 = vld [vmem:[#allocation5] sm:$0xff] }
0x5733   :  { %5277 = vst [vmem:[#allocation39] sm:$0xff] %v5275_v9 }
0x579d   :  { %v5263_v54 = vpop.permute.xlu1 %5262 }
0x579e   :  { %v5265_v56 = vmul.f32 %v5263_v54, %v5260_v31 }
0x57a0   :  { %v5267_v57 = vadd.f32 %v5266_v13, %v5265_v56 }
0x57a1   :  { %v5162_v44 = vpop.permute.xlu1 %5161 }
0x57a2   :  { %v5164_v60 = vadd.f32 %v5162_v44, %v5159_v59  ;;  %5270 = vrot.lane.b32.xlu1 %v5267_v57, %s6800_s18 }
0x57a4   :  { %5165 = vst.msk [vmem:[#allocation5 + $0x8] sm:$0xff] %vm4732_vm7, %v5164_v60 }
0x57ab   :  { %v5268_v40 = vld [vmem:[#allocation5 + $0x8] sm:$0xff] }
0x5814   :  { %v5271_v14 = vpop.permute.xlu1 %5270 }
0x5815   :  { %v5273_v3 = vadd.f32 %v5271_v14, %v5268_v40 }
0x5817   :  { %5274 = vst.msk [vmem:[#allocation5 + $0x8] sm:$0xff] %vm4842_vm8, %v5273_v3 }
0x581e   :  { %v5276_v16 = vld [vmem:[#allocation5 + $0x8] sm:$0xff] }
0x581f   :  { %5278 = vst [vmem:[#allocation39 + $0x8] sm:$0xff] %v5276_v16 }
0x5820   :  { %6740 = shalt.err (!%p6737_p11)
}
0x5821   :  { %s7853_s15 = sld [smem:[#allocation62_spill]] }
0x5827   :  { %5288 = dma.vmem_to_hbm [thread:$0]  %s5286_s12, 256, %s7853_s15, [#allocation8]  }
0x5828   :  { %6771 = dma.done.wait [#allocation8], 256  }
0x5829   :  { %6772 = vsyncadd [#allocation8], 4294967040 }
0x582a   :  { %5292 = vsyncpa [#allocation7], 1 }
0x582b   :  { %5293 = vsyncpa [#allocation10], 1 }
0x582c   :  { %5294 = vsyncpa [#allocation13], 1 }
0x582d   :  { %5295 = vsyncpa [#allocation16], 1 }
0x582e   :  { %5296 = vsyncpa [#allocation19], 1 }
0x582f   :  { %5297 = vsyncpa [#allocation22], 1 }
0x5830   :  { %5298 = vsyncpa [#allocation25], 1 }
0x5831   :  { %5299 = vsyncpa [#allocation28], 1 }
0x5832   :  { %5300 = vsyncpa [#allocation31], 1 }
0x5833   :  { %5301 = vsyncpa [#allocation34], 1 }
0x5834   :  { %5302 = vsyncpa [#allocation37], 1 }
0x5835   :  { %5303 = vsyncpa [#allocation8], 1 }

</bundles_post_ra>
